<compile_context>
chip_gen: v5e
topology: v5e:2x2
jax: 0.10.0
libtpu: 0.0.40
codegen_flags: <defaults>
</compile_context>

<pallas_src>
import functools
import math

import jax
import jax.numpy as jnp
from jax import lax
from jax.experimental import pallas as pl
from jax.experimental.pallas import tpu as pltpu


def hlda_kernel(H, W, w2d_ref, b2d_ref, masks_ref, csum_ref, ones_ref,
                band_ref, x_ref, o_ref):
    """One grid step: full HLDA (spatial_first) forward for one batch tile.

    x_ref / o_ref : (Bt, C, H*W) VMEM blocks (lane-dense last dim).
    w2d_ref  : (18,) SMEM          Conv2d(2->1, 3x3) weights, idx = in*9 + ki*3 + kj.
    b2d_ref  : (1,)  SMEM          Conv2d bias.
    masks_ref: (9, HW) VMEM        0/1 zero-padding masks per 3x3 tap (hoisted).
    csum_ref : (max(Bt,8), Bt*C)   block-diagonal channel-mean selector (1/C folded).
    ones_ref : (HW, 128) VMEM      ones in lane 0 -> MXU row-sum operand.
    band_ref : (Bt, C, C) VMEM     Conv1d(k=3, pad=1, no bias) band matrix (hoisted).
    """
    Bt, C, HW = x_ref.shape
    f32 = jnp.float32
    hi = lax.Precision.HIGHEST

    x = x_ref[...]
    if x.dtype != f32:
        x = x.astype(f32)
    x2d = x.reshape(Bt * C, HW)          # free reshape: leading dims collapse

    # ---- GlobalAttentionModule: spatial attention ---------------------------
    # Channel mean on the (otherwise idle) MXU; channel max stays on VPU/XLU.
    mean_map = jnp.dot(csum_ref[...], x2d, precision=hi,
                       preferred_element_type=f32)[:Bt]           # (Bt, HW)
    max_map = jnp.max(x, axis=1)                                  # (Bt, HW)

    masks = masks_ref[...]                                        # (9, HW)
    acc = jnp.zeros((Bt, HW), f32)
    for ki in range(3):
        for kj in range(3):
            di, dj = ki - 1, kj - 1
            t = ki * 3 + kj
            # shifted[p] = map[p + di*W + dj]  (flat row-major offset)
            shift = (-(di * W + dj)) % HW
            if shift == 0:
                sm, sa = max_map, mean_map
            else:
                sm = pltpu.roll(max_map, shift=shift, axis=1)
                sa = pltpu.roll(mean_map, shift=shift, axis=1)
            tap = w2d_ref[t] * sm + w2d_ref[9 + t] * sa
            if di == 0 and dj == 0:
                acc = acc + tap                       # center tap: mask == 1
            else:
                acc = acc + tap * masks[t:t + 1, :]   # precomputed 0/1 mask
    spat_att = jax.nn.sigmoid(acc + b2d_ref[0])                   # (Bt, HW)

    x1 = x * spat_att[:, None, :]                                 # (Bt, C, HW)
    x1_2d = x1.reshape(Bt * C, HW)
    # TODO(synk): on v7x with very large batch tiles, recompute x*spat_att at
    # the final store instead of keeping x1 resident to save one f32 block.

    # ---- HLDA_L2Pool: channel attention -------------------------------------
    # avg & L2 sums on the MXU (ones-in-lane-0 operand); max on VPU/XLU.
    ones_red = ones_ref[...]                                      # (HW, 128)
    sum_x = jnp.dot(x1_2d, ones_red, precision=hi,
                    preferred_element_type=f32)                   # (Bt*C, 128)
    sum_sq = jnp.dot(x1_2d * x1_2d, ones_red, precision=hi,
                     preferred_element_type=f32)                  # (Bt*C, 128)
    max_c = jnp.max(x1_2d, axis=1, keepdims=True)                 # (Bt*C, 1)
    # Conv1d is bias-free, so conv(avg)+conv(max)+conv(l2) == conv(avg+max+l2).
    s = sum_x * (1.0 / HW) + jnp.sqrt(sum_sq) + max_c             # lane 0 is valid
    s3 = s.reshape(Bt, C, 128)                                    # free leading split
    # 3-tap channel conv as a batched banded matmul (band hoisted to wrapper);
    # output keeps C along sublanes so the final scale is a pure lane broadcast.
    logits = lax.dot_general(band_ref[...], s3,
                             dimension_numbers=(((2,), (1,)), ((0,), (0,))),
                             precision=hi, preferred_element_type=f32)
    chan_att = jax.nn.sigmoid(logits[:, :, 0:1])                  # (Bt, C, 1)

    o_ref[...] = (x1 * chan_att).astype(o_ref.dtype)


def _vmem_budget_bytes():
    """Per-grid-step working-set budget, per TPU generation."""
    kind = ""
    try:
        kind = jax.devices()[0].device_kind.lower()
    except Exception:
        pass
    if "v5" in kind or "v6" in kind:
        return 48 << 20      # 128 MiB VMEM parts: fat tiles amortize step overhead
    return 20 << 20          # v7x (64 MiB physical) / unknown: stay conservative


def _pick_block_b(B, C, HW, itemsize):
    # Temp-aware budget: double-buffered in + out blocks plus ~4 block-sized
    # f32 temporaries (x cast, x1, x1^2 matmul operand, store temp).
    per_b = C * HW * (4 * itemsize + 4 * 4)
    blk = max(1, min(B, _vmem_budget_bytes() // max(per_b, 1)))
    if B >= 8:
        blk = max(blk, 8)                 # fill all 8 sublanes of the (Bt, HW) maps
        if B >= 16:
            blk = min(blk, B // 2)        # >= 2 grid steps for v7x's 2 TensorCores
    elif B >= 2:
        blk = min(blk, pl.cdiv(B, 2))     # small B: still give both v7x TCs a step
    blk = min(blk, B)
    while B % blk:
        blk -= 1
    return blk


def hlda_forward(x, w2d, b2d, w1d):
    """x: (B, C, H, W); w2d: (1,2,3,3); b2d: (1,); w1d: (1,1,3)."""
    B, C, H, W = x.shape
    HW = H * W
    x_flat = x.reshape(B, C, HW)          # free relayout: lane-dense last dim

    itemsize = x.dtype.itemsize
    blk = _pick_block_b(B, C, HW, itemsize)
    grid_b = B // blk
    bt_pad = max(blk, 8)                  # pad selector rows to a full sublane tile

    # ---- hoisted small operands (built once, outside the kernel) ------------
    w2d_flat = w2d.reshape(-1).astype(jnp.float32)    # (18,)
    b2d_flat = b2d.reshape(-1).astype(jnp.float32)    # (1,)
    w1 = w1d.reshape(-1).astype(jnp.float32)          # (3,)

    # 3x3 zero-padding boundary masks, one row per tap (row-major ki, kj).
    pos = jnp.arange(HW, dtype=jnp.int32)
    r, c = pos // W, pos % W
    rows = []
    for ki in range(3):
        for kj in range(3):
            di, dj = ki - 1, kj - 1
            ok = jnp.ones((HW,), jnp.bool_)
            if di == -1:
                ok = ok & (r >= 1)
            if di == 1:
                ok = ok & (r <= H - 2)
            if dj == -1:
                ok = ok & (c >= 1)
            if dj == 1:
                ok = ok & (c <= W - 2)
            rows.append(ok)
    masks = jnp.stack(rows, axis=0).astype(jnp.float32)            # (9, HW)

    # Block-diagonal channel-mean selector (1/C folded in), padded to >= 8 rows.
    bi = jnp.arange(bt_pad, dtype=jnp.int32)[:, None]
    cj = jnp.arange(blk * C, dtype=jnp.int32)[None, :]
    csum = jnp.where((cj // C) == bi, 1.0 / C, 0.0).astype(jnp.float32)

    # MXU row-sum operand: ones in lane 0.
    ones_red = jnp.zeros((HW, 128), jnp.float32).at[:, 0].set(1.0)

    # Banded Conv1d(k=3, pad=1, no bias) matrix, out[o] = sum_i band[o,i]*s[i];
    # broadcast per batch for a batched MXU matmul.
    oi = jnp.arange(C, dtype=jnp.int32)[:, None]
    ii = jnp.arange(C, dtype=jnp.int32)[None, :]
    bandT = (jnp.where(ii == oi - 1, w1[0], 0.0)
             + jnp.where(ii == oi, w1[1], 0.0)
             + jnp.where(ii == oi + 1, w1[2], 0.0)).astype(jnp.float32)
    band_b = jnp.broadcast_to(bandT[None], (blk, C, C))

    # Explicit VMEM limit from the real footprint (blocks + temps + constants).
    per_b = C * HW * (4 * itemsize + 4 * 4)
    const_bytes = 2 * 4 * (9 * HW + bt_pad * blk * C + HW * 128 + blk * C * C)
    vmem_limit = int(min(max(blk * per_b + const_bytes + (8 << 20), 32 << 20),
                         100 << 20))

    smem = pl.BlockSpec(memory_space=pltpu.MemorySpace.SMEM)
    kern = functools.partial(hlda_kernel, H, W)

    out_flat = pl.pallas_call(
        kern,
        out_shape=jax.ShapeDtypeStruct((B, C, HW), x.dtype),
        grid_spec=pltpu.PrefetchScalarGridSpec(
            num_scalar_prefetch=0,
            grid=(grid_b,),
            in_specs=[
                smem,                                             # conv2d weight
                smem,                                             # conv2d bias
                pl.BlockSpec((9, HW), lambda b: (0, 0)),          # boundary masks
                pl.BlockSpec((bt_pad, blk * C), lambda b: (0, 0)),  # mean selector
                pl.BlockSpec((HW, 128), lambda b: (0, 0)),        # ones reduction op
                pl.BlockSpec((blk, C, C), lambda b: (0, 0, 0)),   # conv1d band
                pl.BlockSpec((blk, C, HW), lambda b: (b, 0, 0)),  # x tile
            ],
            out_specs=pl.BlockSpec((blk, C, HW), lambda b: (b, 0, 0)),
        ),
        compiler_params=pltpu.CompilerParams(
            dimension_semantics=("parallel",),
            vmem_limit_bytes=vmem_limit),
    )(w2d_flat, b2d_flat, masks, csum, ones_red, band_b, x_flat)
    return out_flat.reshape(B, C, H, W)


def hlda_reference(x, w2d, b2d, w1d):
    """Pure-JAX reference of the PyTorch HLDA (spatial_first) forward."""
    xf = x.astype(jnp.float32)

    # GlobalAttentionModule
    max_map = jnp.max(xf, axis=1, keepdims=True)
    mean_map = jnp.mean(xf, axis=1, keepdims=True)
    cat = jnp.concatenate([max_map, mean_map], axis=1)           # (B, 2, H, W)
    conv = lax.conv_general_dilated(
        cat, w2d, window_strides=(1, 1), padding=((1, 1), (1, 1)),
        dimension_numbers=("NCHW", "OIHW", "NCHW"),
        precision=lax.Precision.HIGHEST)
    spat_att = jax.nn.sigmoid(conv + b2d.reshape(1, 1, 1, 1))    # (B, 1, H, W)
    x1 = xf * spat_att

    # HLDA_L2Pool
    avg = jnp.mean(x1, axis=(2, 3))                               # (B, C)
    mx = jnp.max(x1, axis=(2, 3))                                 # (B, C)
    l2 = jnp.sqrt(jnp.sum(x1 * x1, axis=(2, 3)))                  # (B, C)

    def conv1(v):  # (B, C) -> (B, C)
        out = lax.conv_general_dilated(
            v[:, None, :], w1d, window_strides=(1,), padding=((1, 1),),
            dimension_numbers=("NCH", "OIH", "NCH"),
            precision=lax.Precision.HIGHEST)
        return out[:, 0, :]

    chan_att = jax.nn.sigmoid(conv1(avg) + conv1(mx) + conv1(l2))  # (B, C)
    return x1 * chan_att[:, :, None, None]


if __name__ == "__main__":
    B, C, H, W = 2, 64, 16, 16   # in_channels=64 fixes the Conv1d kernel size (=3)
    key = jax.random.PRNGKey(0)
    kx, kw2, kb2, kw1 = jax.random.split(key, 4)

    x = jax.random.normal(kx, (B, C, H, W), jnp.float32)

    # Deterministic parameter init (PyTorch-default-style uniform bounds).
    bound2d = 1.0 / math.sqrt(2 * 3 * 3)
    w2d = jax.random.uniform(kw2, (1, 2, 3, 3), jnp.float32, -bound2d, bound2d)
    b2d = jax.random.uniform(kb2, (1,), jnp.float32, -bound2d, bound2d)
    bound1d = 1.0 / math.sqrt(1 * 3)
    w1d = jax.random.uniform(kw1, (1, 1, 3), jnp.float32, -bound1d, bound1d)

    out = jax.block_until_ready(hlda_forward(x, w2d, b2d, w1d))
    ref = hlda_reference(x, w2d, b2d, w1d)

    assert out.shape == (B, C, H, W)
    assert jnp.allclose(out, ref, atol=1e-4, rtol=1e-4), (
        "mismatch vs reference: max abs err = "
        f"{float(jnp.max(jnp.abs(out - ref)))}")
    print("KERNEL_OK")
</pallas_src>

<mosaic_0001>
module attributes {stable_mosaic.version = 11 : i64} {
  func.func @hlda_kernel(%arg0: i32, %arg1: memref<18xf32, #tpu.memory_space<smem>>, %arg2: memref<1xf32, #tpu.memory_space<smem>>, %arg3: memref<9x256xf32, #tpu.memory_space<vmem>>, %arg4: memref<8x64xf32, #tpu.memory_space<vmem>>, %arg5: memref<256x128xf32, #tpu.memory_space<vmem>>, %arg6: memref<1x64x64xf32, #tpu.memory_space<vmem>>, %arg7: memref<1x64x256xf32, #tpu.memory_space<vmem>>, %arg8: memref<1x64x256xf32, #tpu.memory_space<vmem>>) attributes {dimension_semantics = [#tpu.dimension_semantics<parallel>], iteration_bounds = array<i64: 2>, scalar_prefetch = 0 : i64, scratch_operands = 0 : i64, tpu.core_type = #tpu.core_type<tc>, window_params = [{transform_indices = @transform_0, window_bounds = array<i64: 18>}, {transform_indices = @transform_1, window_bounds = array<i64: 1>}, {pipeline_mode = #tpu.pipeline_mode<synchronous>, transform_indices = @transform_2, window_bounds = array<i64: 9, 256>}, {pipeline_mode = #tpu.pipeline_mode<synchronous>, transform_indices = @transform_3, window_bounds = array<i64: 8, 64>}, {pipeline_mode = #tpu.pipeline_mode<synchronous>, transform_indices = @transform_4, window_bounds = array<i64: 256, 128>}, {pipeline_mode = #tpu.pipeline_mode<synchronous>, transform_indices = @transform_5, window_bounds = array<i64: 1, 64, 64>}, {transform_indices = @transform_6, window_bounds = array<i64: 1, 64, 256>}, {transform_indices = @transform_7, window_bounds = array<i64: 1, 64, 256>}]} {
    %c0 = arith.constant 0 : index
    %c0_0 = arith.constant 0 : index
    %c0_1 = arith.constant 0 : index
    %0 = vector.load %arg7[%c0, %c0_0, %c0_1] : memref<1x64x256xf32, #tpu.memory_space<vmem>>, vector<1x64x256xf32>
    %1 = vector.shape_cast %0 : vector<1x64x256xf32> to vector<64x256xf32>
    %c0_2 = arith.constant 0 : index
    %c0_3 = arith.constant 0 : index
    %2 = vector.load %arg4[%c0_2, %c0_3] : memref<8x64xf32, #tpu.memory_space<vmem>>, vector<8x64xf32>
    %cst = arith.constant dense<0.000000e+00> : vector<8x256xf32>
    %3 = tpu.matmul %2, %1, %cst {dimension_numbers = #tpu.dot_dimension_numbers<[1], [0], [0], [1], [0, 0, 1, 1], [], []>, precision = #tpu.contract_precision<fp32>} : vector<8x64xf32>, vector<64x256xf32>, vector<8x256xf32> -> vector<8x256xf32>
    %4 = vector.extract_strided_slice %3 {offsets = [0, 0], sizes = [1, 256], strides = [1, 1]} : vector<8x256xf32> to vector<1x256xf32>
    %cst_4 = arith.constant dense<0xFF800000> : vector<1x256xf32>
    %5 = vector.multi_reduction <maximumf>, %0, %cst_4 [1] : vector<1x64x256xf32> to vector<1x256xf32>
    %c0_5 = arith.constant 0 : index
    %c0_6 = arith.constant 0 : index
    %6 = vector.load %arg3[%c0_5, %c0_6] : memref<9x256xf32, #tpu.memory_space<vmem>>, vector<9x256xf32>
    %cst_7 = arith.constant 0.000000e+00 : f32
    %7 = vector.broadcast %cst_7 : f32 to vector<1x256xf32>
    %c17_i32 = arith.constant 17 : i32
    %8 = tpu.dynamic_rotate %5 by %c17_i32 dim 1 : vector<1x256xf32>, i32 -> vector<1x256xf32>
    %c17_i32_8 = arith.constant 17 : i32
    %9 = tpu.dynamic_rotate %4 by %c17_i32_8 dim 1 : vector<1x256xf32>, i32 -> vector<1x256xf32>
    %c0_9 = arith.constant 0 : index
    %10 = memref.load %arg1[%c0_9] : memref<18xf32, #tpu.memory_space<smem>>
    %11 = vector.broadcast %10 : f32 to vector<1x256xf32>
    %12 = arith.mulf %11, %8 : vector<1x256xf32>
    %c9 = arith.constant 9 : index
    %13 = memref.load %arg1[%c9] : memref<18xf32, #tpu.memory_space<smem>>
    %14 = vector.broadcast %13 : f32 to vector<1x256xf32>
    %15 = arith.mulf %14, %9 : vector<1x256xf32>
    %16 = arith.addf %12, %15 : vector<1x256xf32>
    %17 = vector.extract_strided_slice %6 {offsets = [0, 0], sizes = [1, 256], strides = [1, 1]} : vector<9x256xf32> to vector<1x256xf32>
    %18 = arith.mulf %16, %17 : vector<1x256xf32>
    %19 = arith.addf %7, %18 : vector<1x256xf32>
    %c16_i32 = arith.constant 16 : i32
    %20 = tpu.dynamic_rotate %5 by %c16_i32 dim 1 : vector<1x256xf32>, i32 -> vector<1x256xf32>
    %c16_i32_10 = arith.constant 16 : i32
    %21 = tpu.dynamic_rotate %4 by %c16_i32_10 dim 1 : vector<1x256xf32>, i32 -> vector<1x256xf32>
    %c1 = arith.constant 1 : index
    %22 = memref.load %arg1[%c1] : memref<18xf32, #tpu.memory_space<smem>>
    %23 = vector.broadcast %22 : f32 to vector<1x256xf32>
    %24 = arith.mulf %23, %20 : vector<1x256xf32>
    %c10 = arith.constant 10 : index
    %25 = memref.load %arg1[%c10] : memref<18xf32, #tpu.memory_space<smem>>
    %26 = vector.broadcast %25 : f32 to vector<1x256xf32>
    %27 = arith.mulf %26, %21 : vector<1x256xf32>
    %28 = arith.addf %24, %27 : vector<1x256xf32>
    %29 = vector.extract_strided_slice %6 {offsets = [1, 0], sizes = [1, 256], strides = [1, 1]} : vector<9x256xf32> to vector<1x256xf32>
    %30 = arith.mulf %28, %29 : vector<1x256xf32>
    %31 = arith.addf %19, %30 : vector<1x256xf32>
    %c15_i32 = arith.constant 15 : i32
    %32 = tpu.dynamic_rotate %5 by %c15_i32 dim 1 : vector<1x256xf32>, i32 -> vector<1x256xf32>
    %c15_i32_11 = arith.constant 15 : i32
    %33 = tpu.dynamic_rotate %4 by %c15_i32_11 dim 1 : vector<1x256xf32>, i32 -> vector<1x256xf32>
    %c2 = arith.constant 2 : index
    %34 = memref.load %arg1[%c2] : memref<18xf32, #tpu.memory_space<smem>>
    %35 = vector.broadcast %34 : f32 to vector<1x256xf32>
    %36 = arith.mulf %35, %32 : vector<1x256xf32>
    %c11 = arith.constant 11 : index
    %37 = memref.load %arg1[%c11] : memref<18xf32, #tpu.memory_space<smem>>
    %38 = vector.broadcast %37 : f32 to vector<1x256xf32>
    %39 = arith.mulf %38, %33 : vector<1x256xf32>
    %40 = arith.addf %36, %39 : vector<1x256xf32>
    %41 = vector.extract_strided_slice %6 {offsets = [2, 0], sizes = [1, 256], strides = [1, 1]} : vector<9x256xf32> to vector<1x256xf32>
    %42 = arith.mulf %40, %41 : vector<1x256xf32>
    %43 = arith.addf %31, %42 : vector<1x256xf32>
    %c1_i32 = arith.constant 1 : i32
    %44 = tpu.dynamic_rotate %5 by %c1_i32 dim 1 : vector<1x256xf32>, i32 -> vector<1x256xf32>
    %c1_i32_12 = arith.constant 1 : i32
    %45 = tpu.dynamic_rotate %4 by %c1_i32_12 dim 1 : vector<1x256xf32>, i32 -> vector<1x256xf32>
    %c3 = arith.constant 3 : index
    %46 = memref.load %arg1[%c3] : memref<18xf32, #tpu.memory_space<smem>>
    %47 = vector.broadcast %46 : f32 to vector<1x256xf32>
    %48 = arith.mulf %47, %44 : vector<1x256xf32>
    %c12 = arith.constant 12 : index
    %49 = memref.load %arg1[%c12] : memref<18xf32, #tpu.memory_space<smem>>
    %50 = vector.broadcast %49 : f32 to vector<1x256xf32>
    %51 = arith.mulf %50, %45 : vector<1x256xf32>
    %52 = arith.addf %48, %51 : vector<1x256xf32>
    %53 = vector.extract_strided_slice %6 {offsets = [3, 0], sizes = [1, 256], strides = [1, 1]} : vector<9x256xf32> to vector<1x256xf32>
    %54 = arith.mulf %52, %53 : vector<1x256xf32>
    %55 = arith.addf %43, %54 : vector<1x256xf32>
    %c4 = arith.constant 4 : index
    %56 = memref.load %arg1[%c4] : memref<18xf32, #tpu.memory_space<smem>>
    %57 = vector.broadcast %56 : f32 to vector<1x256xf32>
    %58 = arith.mulf %57, %5 : vector<1x256xf32>
    %c13 = arith.constant 13 : index
    %59 = memref.load %arg1[%c13] : memref<18xf32, #tpu.memory_space<smem>>
    %60 = vector.broadcast %59 : f32 to vector<1x256xf32>
    %61 = arith.mulf %60, %4 : vector<1x256xf32>
    %62 = arith.addf %58, %61 : vector<1x256xf32>
    %63 = arith.addf %55, %62 : vector<1x256xf32>
    %c255_i32 = arith.constant 255 : i32
    %64 = tpu.dynamic_rotate %5 by %c255_i32 dim 1 : vector<1x256xf32>, i32 -> vector<1x256xf32>
    %c255_i32_13 = arith.constant 255 : i32
    %65 = tpu.dynamic_rotate %4 by %c255_i32_13 dim 1 : vector<1x256xf32>, i32 -> vector<1x256xf32>
    %c5 = arith.constant 5 : index
    %66 = memref.load %arg1[%c5] : memref<18xf32, #tpu.memory_space<smem>>
    %67 = vector.broadcast %66 : f32 to vector<1x256xf32>
    %68 = arith.mulf %67, %64 : vector<1x256xf32>
    %c14 = arith.constant 14 : index
    %69 = memref.load %arg1[%c14] : memref<18xf32, #tpu.memory_space<smem>>
    %70 = vector.broadcast %69 : f32 to vector<1x256xf32>
    %71 = arith.mulf %70, %65 : vector<1x256xf32>
    %72 = arith.addf %68, %71 : vector<1x256xf32>
    %73 = vector.extract_strided_slice %6 {offsets = [5, 0], sizes = [1, 256], strides = [1, 1]} : vector<9x256xf32> to vector<1x256xf32>
    %74 = arith.mulf %72, %73 : vector<1x256xf32>
    %75 = arith.addf %63, %74 : vector<1x256xf32>
    %c241_i32 = arith.constant 241 : i32
    %76 = tpu.dynamic_rotate %5 by %c241_i32 dim 1 : vector<1x256xf32>, i32 -> vector<1x256xf32>
    %c241_i32_14 = arith.constant 241 : i32
    %77 = tpu.dynamic_rotate %4 by %c241_i32_14 dim 1 : vector<1x256xf32>, i32 -> vector<1x256xf32>
    %c6 = arith.constant 6 : index
    %78 = memref.load %arg1[%c6] : memref<18xf32, #tpu.memory_space<smem>>
    %79 = vector.broadcast %78 : f32 to vector<1x256xf32>
    %80 = arith.mulf %79, %76 : vector<1x256xf32>
    %c15 = arith.constant 15 : index
    %81 = memref.load %arg1[%c15] : memref<18xf32, #tpu.memory_space<smem>>
    %82 = vector.broadcast %81 : f32 to vector<1x256xf32>
    %83 = arith.mulf %82, %77 : vector<1x256xf32>
    %84 = arith.addf %80, %83 : vector<1x256xf32>
    %85 = vector.extract_strided_slice %6 {offsets = [6, 0], sizes = [1, 256], strides = [1, 1]} : vector<9x256xf32> to vector<1x256xf32>
    %86 = arith.mulf %84, %85 : vector<1x256xf32>
    %87 = arith.addf %75, %86 : vector<1x256xf32>
    %c240_i32 = arith.constant 240 : i32
    %88 = tpu.dynamic_rotate %5 by %c240_i32 dim 1 : vector<1x256xf32>, i32 -> vector<1x256xf32>
    %c240_i32_15 = arith.constant 240 : i32
    %89 = tpu.dynamic_rotate %4 by %c240_i32_15 dim 1 : vector<1x256xf32>, i32 -> vector<1x256xf32>
    %c7 = arith.constant 7 : index
    %90 = memref.load %arg1[%c7] : memref<18xf32, #tpu.memory_space<smem>>
    %91 = vector.broadcast %90 : f32 to vector<1x256xf32>
    %92 = arith.mulf %91, %88 : vector<1x256xf32>
    %c16 = arith.constant 16 : index
    %93 = memref.load %arg1[%c16] : memref<18xf32, #tpu.memory_space<smem>>
    %94 = vector.broadcast %93 : f32 to vector<1x256xf32>
    %95 = arith.mulf %94, %89 : vector<1x256xf32>
    %96 = arith.addf %92, %95 : vector<1x256xf32>
    %97 = vector.extract_strided_slice %6 {offsets = [7, 0], sizes = [1, 256], strides = [1, 1]} : vector<9x256xf32> to vector<1x256xf32>
    %98 = arith.mulf %96, %97 : vector<1x256xf32>
    %99 = arith.addf %87, %98 : vector<1x256xf32>
    %c239_i32 = arith.constant 239 : i32
    %100 = tpu.dynamic_rotate %5 by %c239_i32 dim 1 : vector<1x256xf32>, i32 -> vector<1x256xf32>
    %c239_i32_16 = arith.constant 239 : i32
    %101 = tpu.dynamic_rotate %4 by %c239_i32_16 dim 1 : vector<1x256xf32>, i32 -> vector<1x256xf32>
    %c8 = arith.constant 8 : index
    %102 = memref.load %arg1[%c8] : memref<18xf32, #tpu.memory_space<smem>>
    %103 = vector.broadcast %102 : f32 to vector<1x256xf32>
    %104 = arith.mulf %103, %100 : vector<1x256xf32>
    %c17 = arith.constant 17 : index
    %105 = memref.load %arg1[%c17] : memref<18xf32, #tpu.memory_space<smem>>
    %106 = vector.broadcast %105 : f32 to vector<1x256xf32>
    %107 = arith.mulf %106, %101 : vector<1x256xf32>
    %108 = arith.addf %104, %107 : vector<1x256xf32>
    %109 = vector.extract_strided_slice %6 {offsets = [8, 0], sizes = [1, 256], strides = [1, 1]} : vector<9x256xf32> to vector<1x256xf32>
    %110 = arith.mulf %108, %109 : vector<1x256xf32>
    %111 = arith.addf %99, %110 : vector<1x256xf32>
    %c0_17 = arith.constant 0 : index
    %112 = memref.load %arg2[%c0_17] : memref<1xf32, #tpu.memory_space<smem>>
    %113 = vector.broadcast %112 : f32 to vector<1x256xf32>
    %114 = arith.addf %111, %113 : vector<1x256xf32>
    %115 = arith.negf %114 : vector<1x256xf32>
    %116 = math.exp %115 : vector<1x256xf32>
    %cst_18 = arith.constant 1.000000e+00 : f32
    %117 = vector.broadcast %cst_18 : f32 to vector<1x256xf32>
    %118 = arith.addf %117, %116 : vector<1x256xf32>
    %119 = arith.divf %117, %118 : vector<1x256xf32>
    %120 = vector.shape_cast %119 : vector<1x256xf32> to vector<1x1x256xf32>
    %121 = vector.broadcast %120 : vector<1x1x256xf32> to vector<1x64x256xf32>
    %122 = arith.mulf %0, %121 : vector<1x64x256xf32>
    %123 = vector.shape_cast %122 : vector<1x64x256xf32> to vector<64x256xf32>
    %c0_19 = arith.constant 0 : index
    %c0_20 = arith.constant 0 : index
    %124 = vector.load %arg5[%c0_19, %c0_20] : memref<256x128xf32, #tpu.memory_space<vmem>>, vector<256x128xf32>
    %cst_21 = arith.constant dense<0.000000e+00> : vector<64x128xf32>
    %125 = tpu.matmul %123, %124, %cst_21 {dimension_numbers = #tpu.dot_dimension_numbers<[1], [0], [0], [1], [0, 0, 1, 1], [], []>, precision = #tpu.contract_precision<fp32>} : vector<64x256xf32>, vector<256x128xf32>, vector<64x128xf32> -> vector<64x128xf32>
    %126 = arith.mulf %123, %123 : vector<64x256xf32>
    %cst_22 = arith.constant dense<0.000000e+00> : vector<64x128xf32>
    %127 = tpu.matmul %126, %124, %cst_22 {dimension_numbers = #tpu.dot_dimension_numbers<[1], [0], [0], [1], [0, 0, 1, 1], [], []>, precision = #tpu.contract_precision<fp32>} : vector<64x256xf32>, vector<256x128xf32>, vector<64x128xf32> -> vector<64x128xf32>
    %cst_23 = arith.constant dense<0xFF800000> : vector<64xf32>
    %128 = vector.multi_reduction <maximumf>, %123, %cst_23 [1] : vector<64x256xf32> to vector<64xf32>
    %129 = vector.shape_cast %128 : vector<64xf32> to vector<64x1xf32>
    %cst_24 = arith.constant 3.906250e-03 : f32
    %130 = vector.broadcast %cst_24 : f32 to vector<64x128xf32>
    %131 = arith.mulf %125, %130 : vector<64x128xf32>
    %132 = math.sqrt %127 : vector<64x128xf32>
    %133 = arith.addf %131, %132 : vector<64x128xf32>
    %134 = vector.broadcast %129 : vector<64x1xf32> to vector<64x128xf32>
    %135 = arith.addf %133, %134 : vector<64x128xf32>
    %136 = vector.shape_cast %135 : vector<64x128xf32> to vector<1x64x128xf32>
    %c0_25 = arith.constant 0 : index
    %c0_26 = arith.constant 0 : index
    %c0_27 = arith.constant 0 : index
    %137 = vector.load %arg6[%c0_25, %c0_26, %c0_27] : memref<1x64x64xf32, #tpu.memory_space<vmem>>, vector<1x64x64xf32>
    %cst_28 = arith.constant dense<0.000000e+00> : vector<1x64x128xf32>
    %138 = tpu.matmul %137, %136, %cst_28 {dimension_numbers = #tpu.dot_dimension_numbers<[2], [1], [1], [2], [0, 0, 0, 1, 1, 2], [0], [0]>, precision = #tpu.contract_precision<fp32>} : vector<1x64x64xf32>, vector<1x64x128xf32>, vector<1x64x128xf32> -> vector<1x64x128xf32>
    %139 = vector.extract_strided_slice %138 {offsets = [0, 0, 0], sizes = [1, 64, 1], strides = [1, 1, 1]} : vector<1x64x128xf32> to vector<1x64x1xf32>
    %140 = arith.negf %139 : vector<1x64x1xf32>
    %141 = math.exp %140 : vector<1x64x1xf32>
    %cst_29 = arith.constant 1.000000e+00 : f32
    %142 = vector.broadcast %cst_29 : f32 to vector<1x64x1xf32>
    %143 = arith.addf %142, %141 : vector<1x64x1xf32>
    %144 = arith.divf %142, %143 : vector<1x64x1xf32>
    %145 = vector.broadcast %144 : vector<1x64x1xf32> to vector<1x64x256xf32>
    %146 = arith.mulf %122, %145 : vector<1x64x256xf32>
    %c0_30 = arith.constant 0 : index
    %c0_31 = arith.constant 0 : index
    %c0_32 = arith.constant 0 : index
    %147 = vector.load %arg8[%c0_30, %c0_31, %c0_32] : memref<1x64x256xf32, #tpu.memory_space<vmem>>, vector<1x64x256xf32>
    tpu.vector_store %arg8[%c0_30, %c0_31, %c0_32], %146 {strides = array<i32>} : memref<1x64x256xf32, #tpu.memory_space<vmem>>, vector<1x64x256xf32>,
    return
  }
  func.func @transform_0(%arg0: i32) -> i32 {
    %c0_i32 = arith.constant 0 : i32
    %c0_i32_0 = arith.constant 0 : i32
    return %c0_i32 : i32
  }
  func.func @transform_1(%arg0: i32) -> i32 {
    %c0_i32 = arith.constant 0 : i32
    %c0_i32_0 = arith.constant 0 : i32
    return %c0_i32 : i32
  }
  func.func @transform_2(%arg0: i32) -> (i32, i32) {
    %c0_i32 = arith.constant 0 : i32
    %c0_i32_0 = arith.constant 0 : i32
    %c0_i32_1 = arith.constant 0 : i32
    return %c0_i32, %c0_i32_0 : i32, i32
  }
  func.func @transform_3(%arg0: i32) -> (i32, i32) {
    %c0_i32 = arith.constant 0 : i32
    %c0_i32_0 = arith.constant 0 : i32
    %c0_i32_1 = arith.constant 0 : i32
    return %c0_i32, %c0_i32_0 : i32, i32
  }
  func.func @transform_4(%arg0: i32) -> (i32, i32) {
    %c0_i32 = arith.constant 0 : i32
    %c0_i32_0 = arith.constant 0 : i32
    %c0_i32_1 = arith.constant 0 : i32
    return %c0_i32, %c0_i32_0 : i32, i32
  }
  func.func @transform_5(%arg0: i32) -> (i32, i32, i32) {
    %c0_i32 = arith.constant 0 : i32
    %c0_i32_0 = arith.constant 0 : i32
    %c0_i32_1 = arith.constant 0 : i32
    %c0_i32_2 = arith.constant 0 : i32
    return %c0_i32, %c0_i32_0, %c0_i32_1 : i32, i32, i32
  }
  func.func @transform_6(%arg0: i32) -> (i32, i32, i32) {
    %c0_i32 = arith.constant 0 : i32
    %c0_i32_0 = arith.constant 0 : i32
    %c0_i32_1 = arith.constant 0 : i32
    return %arg0, %c0_i32, %c0_i32_0 : i32, i32, i32
  }
  func.func @transform_7(%arg0: i32) -> (i32, i32, i32) {
    %c0_i32 = arith.constant 0 : i32
    %c0_i32_0 = arith.constant 0 : i32
    %c0_i32_1 = arith.constant 0 : i32
    return %arg0, %c0_i32, %c0_i32_0 : i32, i32, i32
  }
}

</mosaic_0001>

<bundles_post_ra>
// kernel: tpu_custom_call.1
= control target key start
LH: loop header
LB: loop body
LE: loop exit
PB: predicated region body
PF: predicated region fallthrough
CT: control target
= control target key end

     0   :  { %s7799_s0 = inlined_call_operand.vmem [shape: f32[18], index: 0, kind: input, shape index: {}]   ;;  %s7800_s1 = inlined_call_operand.<no memory space> [shape: f32[1], index: 1, kind: input, shape index: {}]   ;;  %s7801_s2 = inlined_call_operand.hbm [shape: f32[9,256], index: 2, kind: input, shape index: {}]   ;;  %s7802_s3 = inlined_call_operand.hbm [shape: f32[8,64], index: 3, kind: input, shape index: {}]   ;;  %s7803_s4 = inlined_call_operand.hbm [shape: f32[256,128], index: 4, kind: input, shape index: {}]   ;;  %s7804_s5 = inlined_call_operand.hbm [shape: f32[1,64,64], index: 5, kind: input, shape index: {}]   ;;  %s7805_s6 = inlined_call_operand.hbm [shape: f32[2,64,256], index: 6, kind: input, shape index: {}]   ;;  %s7806_s7 = inlined_call_operand.hbm [shape: f32[2,64,256], index: 7, kind: output, shape index: {}]  }
   0x1   :  { %12 = sst [smem:[#allocation2]] %s7800_s1 }
   0x2   :  { %13 = vsyncpa [#allocation6], 0 }
   0x3   :  { %14 = vsyncpa [#allocation4], 0 }
   0x4   :  { %15 = vsyncpa [#allocation9], 0 }
   0x5   :  { %16 = vsyncpa [#allocation12], 0 }
   0x6   :  { %17 = vsyncpa [#allocation5], 0 }
   0x7   :  { %19 = vsyncpa [#allocation5 + $0x1], 0  ;;  %s5072_s26 = smov 0   ;;  %s5074_s27 = smov 0  }
   0x8   :  { %s5076_s28 = smov 0   ;;  %s5078_s29 = smov 0  }
   0x9 LB: > { %s5093_s1 = sadd.s32 4294967295, %s5008_s29   ;;  %s4490_s30 = sadd.s32 4294967294, %s5008_s29   ;;  %s5008_s29 = sphi %s5078_s29, %s8249_s29   ;;  %s5004_s28 = sphi %s5076_s28, %s8248_s28   ;;  %s5000_s27 = sphi %s5074_s27, %s8247_s27   ;;  %s4996_s26 = sphi %s5072_s26, %s8246_s26  }
   0xa   : > { %p171_p0 = scmp.ne.s32.totalorder %s5000_s27, %s4996_s26  ;;  %p172_p1 = scmp.eq.s32.totalorder %s5093_s1, 0 }
   0xb   : > { %p195_p2 = scmp.eq.s32.totalorder %s5093_s1, 1  ;;  %p201_p3 = scmp.eq.s32.totalorder %s4490_s30, 1 }
   0xc   : > { %p5102_p4 = por %p172_p1, %p171_p0  ;;  %p4491_p5 = scmp.ge.s32.totalorder %s5008_s29, 1 }
   0xd   : > { %p5107_p6 = por %p201_p3, %p171_p0  ;;  %p208_p7 = scmp.lt.s32.totalorder %s5008_s29, 3 }
   0xe   : > { %s232_s12 = sshll.u32 %s7801_s2, 4  ;;  %s5010_s14 = smov [#allocation7]   ;;  %s233_s12 = int_to_ptr.hbm [resolvable:$true] %s232_s12 }
   0xf   : > { %p5115_p8 = pnand %p4491_p5, %p208_p7  ;;  %s234_s15 = sshll.u32 %s5010_s14, 4  ;;  %s235_s15 = int_to_ptr.vmem [resolvable:$true] %s234_s15 }
  0x10   : > { %s247_s19 = sshll.u32 %s7802_s3, 4  ;;  %s7807_s20 = smov 256   ;;  %s248_s19 = int_to_ptr.hbm [resolvable:$true] %s247_s19 }
  0x11   : > { %p4599_p9 = pneg %p5115_p8  ;;  %s7808_s21 = smov 16  }
  0x12   : > { %s5013_s22 = smov [#allocation8]   ;;  %s220_s30 = sshll.u32 %s7799_s0, 4  ;;  %s221_s30 = int_to_ptr.vmem [resolvable:$true] %s220_s30 }
  0x13   : > { %p5123_p10 = pnand %p4599_p9, %p172_p1  ;;  %s249_s23 = sshll.u32 %s5013_s22, 4  ;;  %s250_s23 = int_to_ptr.vmem [resolvable:$true] %s249_s23 }
  0x14   : > { %s258_s14 = sshll.u32 %s7803_s4, 4  ;;  %s5014_s17 = smov [#allocation3]   ;;  %s259_s14 = int_to_ptr.hbm [resolvable:$true] %s258_s14 }
  0x15   : > { %4605 = dma.hbm_to_vmem [thread:$0]  (!%p5123_p10), %s233_s12, 512, %s235_s15, [#allocation4], %s7807_s20, %s7807_s20, %s7808_s21  }
  0x16   : > { %4608 = dma.hbm_to_vmem [thread:$0]  (!%p5123_p10), %s248_s19, 128, %s250_s23, [#allocation9]  }
  0x17   : > { %4602 = dma.vmem_to_smem (!%p5123_p10), %s221_s30, 16, %s5014_s17, [#allocation6]  }
  0x18   : > { %s5015_s12 = smov [#allocation10]   ;;  %s5016_s18 = smov 128  }
  0x19   : > { %s260_s15 = sshll.u32 %s5015_s12, 4  ;;  %s5017_s19 = smov 8   ;;  %s261_s15 = int_to_ptr.vmem [resolvable:$true] %s260_s15 }
  0x1a   : > { %4611 = dma.hbm_to_vmem [thread:$0]  (!%p5123_p10), %s259_s14, 4096, %s261_s15, [#allocation9], %s5016_s18, %s5016_s18, %s5017_s19  }
  0x1b   : > { %s272_s24 = sshll.u32 %s7804_s5, 4  ;;  %s5018_s25 = smov [#allocation11]   ;;  %s273_s24 = int_to_ptr.hbm [resolvable:$true] %s272_s24 }
  0x1c   : > { %s274_s30 = sshll.u32 %s5018_s25, 4  ;;  %s5154_s10 = sadd.s32 1, %s5008_s29   ;;  %s275_s30 = int_to_ptr.vmem [resolvable:$true] %s274_s30 }
  0x1d   : > { %4614 = dma.hbm_to_vmem [thread:$0]  (!%p5123_p10), %s273_s24, 1024, %s275_s30, [#allocation12], %s5016_s18, %s5016_s18, %s5017_s19  }
  0x1e   : > { %s155_s11 = ssub.s32 %s5008_s29, %s5154_s10  ;;  %s158_s17 = sadd.s32 1, %s5004_s28 }
  0x1f   : > { %p156_p12 = scmp.eq.s32.totalorder %s155_s11, 0  ;;  %p165_p13 = scmp.ne.s32.totalorder %s5004_s28, %s5000_s27 }
  0x20   : > { %p166_p0 = scmp.eq.s32.totalorder %s5008_s29, 0  ;;  %p4628_p3 = scmp.lt.s32.totalorder %s5008_s29, 2 }
  0x21   : > { %s5164_s14 = scalar_select %p156_p12, %s5004_s28, %s158_s17  }
  0x22   : > { %p167_p5 = por %p166_p0, %p165_p13  ;;  %p5168_p7 = por %p195_p2, %p165_p13 }
  0x23   : > { %s288_s16 = sand.u32 1, %s5008_s29   ;;  %s290_s15 = sand.u32 1, %s5004_s28  }
  0x24   : > { %s4498_s18 = sshll.u32 %s290_s15, 7  ;;  %s4541_s19 = sshll.u32 %s5008_s29, 7 }
  0x25   : > { %s297_s24 = scalar_lea.hbm %s7805_s6, %s4541_s19  ;;  %s292_s25 = scalar_lea.vmem [#allocation13], %s4498_s18 }
  0x26   : > { %s300_s30 = sshll.u32 %s292_s25, 4  ;;  %s298_s11 = sshll.u32 %s297_s24, 4  ;;  %s301_s30 = int_to_ptr.vmem [resolvable:$true] %s300_s30  ;;  %s299_s11 = int_to_ptr.hbm [resolvable:$true] %s298_s11 }
  0x27   : > { %p5180_p9 = pnand %p4628_p3, %p167_p5  ;;  %s289_s20 = scalar_lea.sflag [#allocation4], %s288_s16 }
  0x28   : > { %s4896_s21 = sshra.s32 %s299_s11, 4  ;;  %s4903_s22 = scalar_lea.hbm %s7805_s6, 256  ;;  %s4897_s21 = int_to_ptr.hbm [resolvable:$true] %s4896_s21 }
  0x29   : > { %s4898_s15 = scalar_lea.hbm %s4897_s21, 128  ;;  %p4900_p10 = pneg %p5180_p9 }
  0x2a   : > { %p4899_p2 = scmp.ne.s32.totalorder %s4897_s21, %s4898_s15  ;;  %p4904_p0 = scmp.lt.s32.totalorder %s4897_s21, %s7805_s6 }
  0x2b   : > { %p4905_p3 = scmp.lt.s32.totalorder %s4903_s22, %s4898_s15 }
  0x2c   : > { %p4901_p12 = pnand %p4900_p10, %p4899_p2 }
  0x2d   : > { %p4906_p5 = por %p4905_p3, %p4904_p0 }
  0x2e   : > { %p4902_p13 = pneg %p4901_p12 }
  0x30   : > { %p4907_p11 = pnand %p4906_p5, %p4902_p13 }
  0x32   : > { %4910 = shalt.err (!%p4907_p11)
}
  0x33   : > { %s7971_s16 = smov 16   ;;  %s7972_s25 = smov 256  }
  0x34   : > { %4618 = dma.hbm_to_vmem [thread:$0]  (!%p5180_p9), %s299_s11, 2048, %s301_s30, %s289_s20, %s7972_s25, %s7972_s25, %s7971_s16  }
  0x35   : > { %312 = sbr.rel (%p5115_p8) target bundleno = 1455 (0x5af), region = 48 }
  0x3a   : > { %4971 = dma.done.wait (%p172_p1), [#allocation6], 16  }
  0x3b   : > { %4973 = vsyncadd (%p172_p1), [#allocation6], 4294967280 }
  0x3c   : > { %4975 = dma.done.wait (%p172_p1), [#allocation4], 512  }
  0x3d   : > { %4977 = vsyncadd (%p172_p1), [#allocation4], 4294966784 }
  0x3e   : > { %4979 = dma.done.wait (%p172_p1), [#allocation9], 4224  }
  0x3f   : > { %4981 = vsyncadd (%p172_p1), [#allocation9], 4294963072 }
  0x40   : > { %4983 = dma.done.wait (%p172_p1), [#allocation12], 1024  }
  0x41   : > { %4985 = vsyncadd (%p172_p1), [#allocation12], 4294966272  ;;  %s339_s13 = sand.u32 1, %s5093_s1   ;;  %s341_s20 = sand.u32 1, %s5000_s27  }
  0x42   : > { %s5219_s21 = sshll.u32 %s341_s20, 7  ;;  %s340_s30 = scalar_lea.sflag [#allocation4], %s339_s13 }
  0x43   : > { %s5222_s11 = scalar_lea.vmem [#allocation13], %s5219_s21 }
  0x44   : > { %4987 = dma.done.wait (%p5102_p4), %s340_s30, 2048  }
  0x45   : > { %4989 = vsyncadd (%p5102_p4), %s340_s30, 4294965248 }
  0x46   : > { %349 = sfence }
  0x47   : > { %v5229_v0 = vld [vmem:[%s5222_s11 + $0x70] sm:$0xff]  ;;  %v5232_v1 = vld [vmem:[%s5222_s11 + $0x60] sm:$0xff]  ;;  %v5328_v32 = vld [vmem:[%s5222_s11 + $0x78] sm:$0xff]  ;;  %vm393_vm0 = vcmask 523264   ;;  %s5019_s8 = smov 17   ;;  %s5020_s17 = smov 16  }
  0x48   : > { %v5235_v2 = vld [vmem:[%s5222_s11 + $0x50] sm:$0xff]  ;;  %v5238_v3 = vand.u32 4294901760, %v5229_v0  ;;  %v5241_v4 = vand.u32 4294901760, %v5232_v1  ;;  %v5247_v6 = vld [vmem:[%s5222_s11 + $0x40] sm:$0xff]  ;;  %v5331_v33 = vld [vmem:[%s5222_s11 + $0x68] sm:$0xff]  ;;  %v5351_v42 = vand.u32 4294901760, %v5328_v32 }
  0x49   : > { %v5244_v5 = vand.u32 4294901760, %v5235_v2  ;;  %v5250_v7 = vld [vmem:[%s5222_s11 + $0x30] sm:$0xff]  ;;  %v5253_v8 = vld [vmem:[%s5222_s11 + $0x20] sm:$0xff]  ;;  %v5256_v9 = vand.u32 4294901760, %v5247_v6  ;;  %v5339_v37 = vld [vmem:[%s5222_s11 + $0x58] sm:$0xff]  ;;  %v5355_v44 = vand.u32 4294901760, %v5331_v33 }
  0x4a   : > { %v5259_v10 = vand.u32 4294901760, %v5250_v7  ;;  %v5262_v11 = vand.u32 4294901760, %v5253_v8  ;;  %v5265_v12 = vld [vmem:[%s5222_s11 + $0x10] sm:$0xff]  ;;  %406 = vmatpush.msra.mxu0 %v5238_v3  ;;  %v5270_v13 = vsub.f32 %v5229_v0, %v5238_v3  ;;  %v5274_v14 = vsub.f32 %v5232_v1, %v5241_v4  ;;  %538 = vmatpush.msra.mxu3 %v5238_v3  ;;  %v5285_v17 = vld [vmem:[%s5222_s11] sm:$0xff]  ;;  %v392_v38 = vld [vmem:[#allocation8] sm:$0xff]  ;;  %s5021_s15 = smov 1  }
  0x4b   : > { %v5279_v15 = vsub.f32 %v5235_v2, %v5244_v5  ;;  %v5282_v16 = vand.u32 4294901760, %v5265_v12  ;;  %v5289_v18 = vsub.f32 %v5247_v6, %v5256_v9  ;;  %v5312_v27 = vand.u32 4294901760, %v5285_v17  ;;  %v5358_v45 = vld [vmem:[%s5222_s11 + $0x48] sm:$0xff]  ;;  %v5382_v54 = vld [vmem:[%s5222_s11 + $0x38] sm:$0xff]  ;;  %s5022_s18 = smov 127   ;;  %s5023_s19 = smov 15  }
  0x4c   : > { %v5293_v19 = vsub.f32 %v5250_v7, %v5259_v10  ;;  %v5297_v20 = vsub.f32 %v5253_v8, %v5262_v11  ;;  %501 = vmatpush.msra.mxu2 %v5270_v13  ;;  %408 = vmatpush.msra.mxu0 %v5241_v4  ;;  %v440_v21 = vand.u32 4294901760, %v5270_v13  ;;  %v446_v22 = vand.u32 4294901760, %v5274_v14  ;;  %v381_v63 = vld [vmem:[%s5222_s11 + $0x28] sm:$0xff]  ;;  %s5024_s22 = smov 112   ;;  %s5025_s23 = smov 111  }
  0x4d   : > { %v452_v23 = vand.u32 4294901760, %v5279_v15  ;;  %540 = vmatpush.msra.mxu3 %v5241_v4  ;;  %v458_v24 = vand.u32 4294901760, %v5289_v18  ;;  %v5309_v26 = vsub.f32 %v5265_v12, %v5282_v16  ;;  %v5347_v40 = vsub.f32 %v5285_v17, %v5312_v27  ;;  %s5026_s24 = smov 113   ;;  %s4516_s16 = sld [smem:[#allocation3 + $0x4]] }
  0x4e   : > { %v464_v25 = vand.u32 4294901760, %v5293_v19  ;;  %504 = vmatpush.msra.mxu2 %v5274_v14  ;;  %410 = vmatpush.msra.mxu0 %v5244_v5  ;;  %v441_v28 = vsub.f32 %v5270_v13, %v440_v21  ;;  %v447_v29 = vsub.f32 %v5274_v14, %v446_v22  ;;  %v470_v31 = vand.u32 4294901760, %v5297_v20  ;;  %s4517_s25 = sld [smem:[#allocation3 + $0xd]] }
  0x4f   : > { %v453_v30 = vsub.f32 %v5279_v15, %v452_v23  ;;  %542 = vmatpush.msra.mxu3 %v5244_v5  ;;  %v459_v36 = vsub.f32 %v5289_v18, %v458_v24  ;;  %v7813_v43 = vand.u32 4294901760, %v5309_v26  ;;  %v7812_v47 = vand.u32 4294901760, %v5347_v40  ;;  %s5646_s13 = sld [smem:[#allocation3 + $0x1]] }
  0x50   : > { %v442_v34 = vand.u32 4294901760, %v441_v28  ;;  %507 = vmatpush.msra.mxu2 %v5279_v15  ;;  %412 = vmatpush.msra.mxu0 %v5256_v9  ;;  %v448_v35 = vand.u32 4294901760, %v447_v29  ;;  %v465_v39 = vsub.f32 %v5293_v19, %v464_v25  ;;  %v471_v46 = vsub.f32 %v5297_v20, %v470_v31  ;;  %s5648_s30 = sld [smem:[#allocation3]] }
  0x51   : > { %544 = vmatpush.msra.mxu3 %v5256_v9  ;;  %v454_v41 = vand.u32 4294901760, %v453_v30  ;;  %v5367_v48 = vand.u32 4294901760, %v5339_v37  ;;  %v395_v49 = vsel %vm393_vm0, %v392_v38, 0  ;;  %v460_v50 = vand.u32 4294901760, %v459_v36  ;;  %v379_v38 = vld [vmem:[%s5222_s11 + $0x18] sm:$0xff] }
  0x52   : > { %443 = vmatpush.msra.mxu1 %v442_v34  ;;  %510 = vmatpush.msra.mxu2 %v5289_v18  ;;  %v5373_v51 = vsub.f32 %v5328_v32, %v5351_v42  ;;  %v5377_v52 = vsub.f32 %v5331_v33, %v5355_v44  ;;  %v5379_v53 = vand.u32 4294901760, %v395_v49  ;;  %v872_v55 = vmax.f32 %v5265_v12, %v5250_v7 }
  0x53   : > { %414 = vmatpush.msra.mxu0 %v5259_v10  ;;  %546 = vmatpush.msra.mxu3 %v5259_v10  ;;  %v477_v56 = vsub.f32 %v5309_v26, %v7813_v43  ;;  %v5392_v57 = vand.u32 4294901760, %v5358_v45  ;;  %v5396_v58 = vsub.f32 %v5339_v37, %v5367_v48  ;;  %v466_v59 = vand.u32 4294901760, %v465_v39 }
  0x54   : > { %449 = vmatpush.msra.mxu1 %v448_v35  ;;  %513 = vmatpush.msra.mxu2 %v5293_v19  ;;  %v7810_v60 = vand.u32 4294901760, %v5373_v51  ;;  %v7809_v61 = vand.u32 4294901760, %v5377_v52  ;;  %v5402_v62 = vsub.f32 %v395_v49, %v5379_v53  ;;  %v472_v7 = vand.u32 4294901760, %v471_v46 }
  0x55   : > { %416 = vmatpush.msra.mxu0 %v5262_v11  ;;  %548 = vmatpush.msra.mxu3 %v5262_v11  ;;  %v483_v12 = vsub.f32 %v5347_v40, %v7812_v47  ;;  %v7811_v28 = vand.u32 4294901760, %v5396_v58  ;;  %v5412_v29 = vand.u32 4294901760, %v5382_v54  ;;  %v5426_v36 = vsub.f32 %v5358_v45, %v5392_v57 }
  0x56   : > { %455 = vmatpush.msra.mxu1 %v454_v41  ;;  %516 = vmatpush.msra.mxu2 %v5297_v20  ;;  %v678_v30 = vsub.f32 %v5373_v51, %v7810_v60  ;;  %v684_v34 = vsub.f32 %v5377_v52, %v7809_v61  ;;  %v5422_v35 = vand.u32 4294901760, %v5402_v62  ;;  %v871_v39 = vmax.f32 %v5285_v17, %v5253_v8  ;;  %v377_v17 = vld [vmem:[%s5222_s11 + $0x8] sm:$0xff] }
  0x57   : > { %418 = vmatpush.msra.mxu0 %v5282_v16  ;;  %550 = vmatpush.msra.mxu3 %v5282_v16  ;;  %v478_v41 = vand.u32 4294901760, %v477_v56  ;;  %v5433_v46 = vand.u32 4294901760, %v381_v63  ;;  %v5437_v49 = vsub.f32 %v5382_v54, %v5412_v29  ;;  %v690_v60 = vsub.f32 %v5396_v58, %v7811_v28 }
  0x58   : > { %461 = vmatpush.msra.mxu1 %v460_v50  ;;  %519 = vmatpush.msra.mxu2 %v5309_v26  ;;  %v679_v50 = vand.u32 4294901760, %v678_v30  ;;  %v685_v61 = vand.u32 4294901760, %v684_v34  ;;  %v695_v8 = vand.u32 4294901760, %v5426_v36  ;;  %v424_v56 = vsub.f32 %v5402_v62, %v5422_v35 }
  0x59   : > { %420 = vmatpush.msra.mxu0 %v5312_v27  ;;  %552 = vmatpush.msra.mxu3 %v5312_v27  ;;  %v874_v30 = vmax.f32 %v872_v55, %v5235_v2  ;;  %v484_v34 = vand.u32 4294901760, %v483_v12  ;;  %v701_v28 = vand.u32 4294901760, %v5437_v49  ;;  %v5455_v47 = vsub.f32 %v381_v63, %v5433_v46 }
  0x5a   : > { %467 = vmatpush.msra.mxu1 %v466_v59  ;;  %522 = vmatpush.msra.mxu2 %v5347_v40  ;;  %v5450_v59 = vand.u32 4294901760, %v379_v38  ;;  %v873_v13 = vmax.f32 %v871_v39, %v5247_v6  ;;  %v5462_v43 = vand.u32 4294901760, %v377_v17  ;;  %v884_v2 = vmax.f32 %v377_v17, %v381_v63 }
  0x5b   : > { %571 = vmatpush.msrb.mxu0 %v440_v21  ;;  %680 = vmatpush.msrb.mxu3 %v679_v50  ;;  %v885_v21 = vmax.f32 %v379_v38, %v5382_v54  ;;  %v691_v55 = vand.u32 4294901760, %v690_v60  ;;  %v707_v12 = vand.u32 4294901760, %v5455_v47  ;;  %v5474_v14 = vand.u32 4294901760, %v424_v56 }
  0x5c   : > { %643 = vmatpush.msrb.mxu2 %v5351_v42  ;;  %473 = vmatpush.msra.mxu1 %v472_v7  ;;  %v696_v7 = vsub.f32 %v5426_v36, %v695_v8  ;;  %v5469_v6 = vsub.f32 %v379_v38, %v5450_v59  ;;  %v702_v54 = vsub.f32 %v5437_v49, %v701_v28  ;;  %v7974_v20 = vand.u32 4294901760, %v5347_v40 }
  0x5d   : > { %575 = vmatpush.msrb.mxu0 %v446_v22  ;;  %686 = vmatpush.msrb.mxu3 %v685_v61  ;;  %v5477_v22 = vsub.f32 %v377_v17, %v5462_v43  ;;  %v876_v61 = vmax.f32 %v874_v30, %v5229_v0  ;;  %v887_v15 = vmax.f32 %v885_v21, %v5339_v37 }
  0x5e   : > { %645 = vmatpush.msrb.mxu2 %v5355_v44  ;;  %479 = vmatpush.msra.mxu1 %v478_v41  ;;  %v713_v60 = vand.u32 4294901760, %v5469_v6  ;;  %v875_v63 = vmax.f32 %v873_v13, %v5232_v1  ;;  %v697_v38 = vand.u32 4294901760, %v696_v7  ;;  %v708_v39 = vsub.f32 %v5455_v47, %v707_v12 }
  0x5f   : > { %579 = vmatpush.msrb.mxu0 %v452_v23  ;;  %525 = vmatmul.f32.vlgmr.msra.gmra.mxu2 %v5402_v62  ;;  %v886_v23 = vmax.f32 %v884_v2, %v5358_v45  ;;  %v719_v0 = vand.u32 4294901760, %v5477_v22  ;;  %v703_v1 = vand.u32 4294901760, %v702_v54  ;;  %v889_v18 = vmax.f32 %v887_v15, %v5328_v32 }
  0x60   : > { %647 = vmatpush.msrb.mxu2 %v5367_v48  ;;  %485 = vmatpush.msra.mxu1 %v484_v34  ;;  %v709_v37 = vand.u32 4294901760, %v708_v39 }
  0x61   : > { %583 = vmatpush.msrb.mxu0 %v458_v24  ;;  %692 = vmatpush.msrb.mxu3 %v691_v55  ;;  %v877_v24 = vmax.f32 %v875_v63, %v876_v61  ;;  %v720_v19 = vsub.f32 %v5477_v22, %v719_v0 }
  0x62   : > { %614 = vmatpush.msrb.mxu1 %v5238_v3  ;;  %649 = vmatpush.msrb.mxu2 %v5392_v57  ;;  %v714_v3 = vsub.f32 %v5469_v6, %v713_v60 }
  0x63   : > { %426 = vmatmul.f32.vlgmr.msra.gmra.mxu0 %v5474_v14  ;;  %556 = vmatmul.f32.vlgmr.msra.gmra.mxu3 %v5422_v35  ;;  %v721_v45 = vand.u32 4294901760, %v720_v19 }
  0x64   : > { %616 = vmatpush.msrb.mxu1 %v5241_v4  ;;  %587 = vmatpush.msrb.mxu0 %v464_v25  ;;  %v888_v4 = vmax.f32 %v886_v23, %v5331_v33  ;;  %v7973_v25 = vand.u32 4294901760, %v5309_v26  ;;  %v878_v33 = vrot.slane %v877_v24, 4  ;;  %v7975_v26 = vand.u32 4294901760, %v5373_v51 }
  0x65   : > { %651 = vmatpush.msrb.mxu2 %v5412_v29  ;;  %698 = vmatpush.msrb.mxu3 %v697_v38 }
  0x66   : > { %618 = vmatpush.msrb.mxu1 %v5244_v5  ;;  %591 = vmatpush.msrb.mxu0 %v470_v31  ;;  %v715_v5 = vand.u32 4294901760, %v714_v3  ;;  %v890_v32 = vmax.f32 %v888_v4, %v889_v18  ;;  %v7976_v31 = vand.u32 4294901760, %v5377_v52  ;;  %v905_v3 = vlaneseq }
  0x67   : > { %487 = vmatmul.f32.vlgmr.msra.gmra.mxu1 %v5379_v53  ;;  %653 = vmatpush.msrb.mxu2 %v5433_v46 }
  0x68   : > { %620 = vmatpush.msrb.mxu1 %v5256_v9  ;;  %704 = vmatpush.msrb.mxu3 %v703_v1  ;;  %v891_v9 = vrot.slane %v890_v32, 4  ;;  %v5656_v19 = vand.u32 127, %v905_v3 }
  0x69   : > { %595 = vmatpush.msrb.mxu0 %v7973_v25  ;;  %655 = vmatpush.msrb.mxu2 %v5450_v59 }
  0x6a   : > { %622 = vmatpush.msrb.mxu1 %v5259_v10  ;;  %710 = vmatpush.msrb.mxu3 %v709_v37  ;;  %v879_v10 = vmax.f32 %v877_v24, %v878_v33  ;;  %v1026_v24 = vstv %s4516_s16  ;;  %v1030_v37 = vstv %s4517_s25  ;;  %vm934_vm1 = vcmp.lt.s32.totalorder %v5656_v19, 16  ;;  %s5709_s16 = sld [smem:[#allocation3 + $0xf]] }
  0x6b   : > { %599 = vmatpush.msrb.mxu0 %v7974_v20  ;;  %657 = vmatpush.msrb.mxu2 %v5462_v43  ;;  %vm907_vm2 = vcmp.lt.s32.totalorder %v5656_v19, 17  ;;  %vm967_vm3 = vcmp.lt.s32.totalorder %v5656_v19, 15  ;;  %vm998_vm4 = vcmp.lt.s32.totalorder %v5656_v19, 1  ;;  %vm1041_vm5 = vcmp.lt.s32.totalorder %v5656_v19, 127  ;;  %s5718_s25 = sld [smem:[#allocation3 + $0xc]] }
  0x6c   : > { %624 = vmatpush.msrb.mxu1 %v5262_v11  ;;  %716 = vmatpush.msrb.mxu3 %v715_v5  ;;  %v892_v11 = vmax.f32 %v890_v32, %v891_v9  ;;  %v880_v40 = vrot.slane %v879_v10, 2  ;;  %v944_v9 = vstv %s5646_s13  ;;  %vm1072_vm6 = vcmp.lt.s32.totalorder %v5656_v19, 113  ;;  %s5735_s13 = sld [smem:[#allocation3 + $0x9]] }
  0x6d   : > { %601 = vmatmul.f32.vlgmr.msrb.gmra.mxu0 %v5379_v53  ;;  %808 = vmatpush.msra.mxu2 %v7975_v26  ;;  %v917_v26 = vstv %s5648_s30  ;;  %vm1103_vm7 = vcmp.lt.s32.totalorder %v5656_v19, 112  ;;  %s5746_s30 = sld [smem:[#allocation3 + $0x10]]  ;;  %vm1134_vm8 = vcmp.lt.s32.totalorder %v5656_v19, 111  ;;  %v900_v19 = vld [vmem:[#allocation7 + $0x18] sm:$0x1] }
  0x6e   : > { %626 = vmatpush.msrb.mxu1 %v5282_v16  ;;  %722 = vmatpush.msrb.mxu3 %v721_v45  ;;  %v7977_v16 = vand.u32 4294901760, %v5396_v58 }
  0x6f   : > { %738 = vmatpush.msra.mxu0 %v5373_v51  ;;  %812 = vmatpush.msra.mxu2 %v7976_v31  ;;  %v881_v51 = vmax.f32 %v879_v10, %v880_v40 }
  0x70   : > { %851 = vmatpush.msra.mxu3 %v5351_v42  ;;  %628 = vmatpush.msrb.mxu1 %v5312_v27  ;;  %v893_v27 = vrot.slane %v892_v11, 2 }
  0x71   : > { %630 = vmatmul.f32.vlgmr.msrb.gmra.mxu1 %v5379_v53  ;;  %741 = vmatpush.msra.mxu0 %v5377_v52 }
  0x72   : > { %775 = vmatpush.msra.mxu1 %v5351_v42  ;;  %816 = vmatpush.msra.mxu2 %v7977_v16  ;;  %v894_v42 = vmax.f32 %v892_v11, %v893_v27 }
  0x73   : > { %853 = vmatpush.msra.mxu3 %v5355_v44  ;;  %744 = vmatpush.msra.mxu0 %v5396_v58 }
  0x74   : > { %777 = vmatpush.msra.mxu1 %v5355_v44  ;;  %820 = vmatpush.msra.mxu2 %v695_v8  ;;  %v882_v44 = vrot.slane %v881_v51, 1 }
  0x75   : > { %855 = vmatpush.msra.mxu3 %v5367_v48  ;;  %663 = vmatmul.f32.vlgmr.msrb.gmra.mxu2 %v5474_v14 }
  0x76   : > { %747 = vmatpush.msra.mxu0 %v5426_v36  ;;  %779 = vmatpush.msra.mxu1 %v5367_v48  ;;  %v895_v48 = vrot.slane %v894_v42, 1  ;;  %v5565_v52 = vmax.f32 %v881_v51, %v882_v44 }
  0x77   : > { %824 = vmatpush.msra.mxu2 %v701_v28  ;;  %857 = vmatpush.msra.mxu3 %v5392_v57 }
  0x78   : > { %724 = vmatmul.f32.vlgmr.msrb.gmra.mxu3 %v5379_v53  ;;  %750 = vmatpush.msra.mxu0 %v5437_v49  ;;  %v1027_v25 = vmul.f32 %v1026_v24, %v5565_v52 }
  0x79   : > { %781 = vmatpush.msra.mxu1 %v5392_v57  ;;  %828 = vmatpush.msra.mxu2 %v707_v12 }
  0x7a   : > { %859 = vmatpush.msra.mxu3 %v5412_v29  ;;  %753 = vmatpush.msra.mxu0 %v5455_v47  ;;  %v5573_v47 = vmax.f32 %v894_v42, %v895_v48 }
  0x7b   : > { %783 = vmatpush.msra.mxu1 %v5412_v29  ;;  %832 = vmatpush.msra.mxu2 %v713_v60 }
  0x7c   : > { %861 = vmatpush.msra.mxu3 %v5433_v46  ;;  %756 = vmatpush.msra.mxu0 %v5469_v6  ;;  %v1028_v45 = vmul.f32 %v1026_v24, %v5573_v47 }
  0x7d   : > { %785 = vmatpush.msra.mxu1 %v5433_v46  ;;  %836 = vmatpush.msra.mxu2 %v719_v0 }
  0x7e   : > { %863 = vmatpush.msra.mxu3 %v5450_v59  ;;  %838 = vmatmul.f32.vlgmr.msra.gmra.mxu2 %v5379_v53 }
  0x7f   : > { %759 = vmatpush.msra.mxu0 %v5477_v22  ;;  %787 = vmatpush.msra.mxu1 %v5450_v59 }
  0x80   : > { %865 = vmatpush.msra.mxu3 %v5462_v43  ;;  %762 = vmatmul.f32.vlgmr.msra.gmra.mxu0 %v5402_v62 }
  0x81   : > { %867 = vmatmul.f32.vlgmr.msra.gmra.mxu3 %v5379_v53  ;;  %789 = vmatpush.msra.mxu1 %v5462_v43 }
  0x82   : > { %793 = vmatmul.f32.vlgmr.msra.gmra.mxu1 %v5422_v35  ;;  %901 = vrot.lane.b32.xlu0 %v5565_v52, %s5019_s8 }
  0x83   : > { %930 = vrot.lane.b32.xlu2 %v5565_v52, %s5020_s17  ;;  %996 = vrot.lane.b32.xlu1 %v5573_v47, %s5021_s15 }
  0x8a   : > { %903 = vrot.lane.b32.xlu0 %v5573_v47, %s5019_s8 }
  0x8b   : > { %932 = vrot.lane.b32.xlu2 %v5573_v47, %s5020_s17  ;;  %1037 = vrot.lane.b32.xlu1 %v5565_v52, %s5022_s18 }
  0x92   : > { %965 = vrot.lane.b32.xlu0 %v5573_v47, %s5023_s19 }
  0x93   : > { %963 = vrot.lane.b32.xlu2 %v5565_v52, %s5023_s19  ;;  %1101 = vrot.lane.b32.xlu1 %v5573_v47, %s5024_s22 }
  0x9a   : > { %994 = vrot.lane.b32.xlu0 %v5565_v52, %s5021_s15 }
  0x9b   : > { %1039 = vrot.lane.b32.xlu2 %v5573_v47, %s5022_s18  ;;  %1130 = vrot.lane.b32.xlu1 %v5565_v52, %s5025_s23 }
  0xa2   : > { %1070 = vrot.lane.b32.xlu0 %v5573_v47, %s5026_s24 }
  0xa3   : > { %1068 = vrot.lane.b32.xlu2 %v5565_v52, %s5026_s24 }
  0xaa   : > { %1099 = vrot.lane.b32.xlu0 %v5565_v52, %s5024_s22 }
  0xdd   : > { %v931_v55 = vpop.permute.xlu2 %930 }
  0xe0   : > { %v427_v43 = vpop.f32.mrf.mxu0 }
  0xe2   : > { %v526_v57 = vpop.f32.mrf.mxu2 }
  0xe4   : > { %v488_v53 = vpop.f32.mrf.mxu1 }
  0xe5   : > { %v489_v58 = vadd.f32 %v488_v53, %v427_v43  ;;  %v933_v7 = vpop.permute.xlu2 %932 }
  0xe6   : > { %v557_v28 = vpop.f32.mrf.mxu3  ;;  %v935_v11 = vsel %vm934_vm1, %v931_v55, %v933_v7  ;;  %v936_v40 = vsel %vm934_vm1, %v933_v7, %v931_v55 }
  0xe7   : > { %v527_v62 = vadd.f32 %v526_v57, %v489_v58  ;;  %v5701_v43 = vmul.f32 %v944_v9, %v936_v40  ;;  %v5703_v53 = vmul.f32 %v944_v9, %v935_v11  ;;  %v921_v40 = vstv %s5735_s13  ;;  %s4352_s13 = scalar_lea.sflag [#allocation5], %s341_s20 }
  0xe9   : > { %v558_v29 = vadd.f32 %v557_v28, %v527_v62 }
  0xea   : > { %v602_v35 = vpop.f32.mrf.mxu0 }
  0xeb   : > { %v603_v36 = vadd.f32 %v602_v35, %v558_v29 }
  0xed   : > { %v5626_v6 = vpop.permute.xlu2 %963 }
  0xee   : > { %v631_v41 = vpop.f32.mrf.mxu1 }
  0xef   : > { %v632_v46 = vadd.f32 %v631_v41, %v603_v36 }
  0xf1   : > { %1001 = vrot.lane.b32.xlu2 %v632_v46, %s5021_s15  ;;  %937 = vrot.lane.b32.xlu0 %v632_v46, %s5020_s17  ;;  %v1031_v32 = vmul.f32 %v1030_v37, %v632_v46 }
  0xf2   : > { %910 = vrot.lane.b32.xlu1 %v632_v46, %s5019_s8 }
  0xf3   : > { %v5678_v31 = vadd.f32 %v1031_v32, %v1027_v25 }
  0xf4   : > { %v902_v12 = vpop.permute.xlu0 %901 }
  0xf5   : > { %v5628_v22 = vpop.permute.xlu2 %1039  ;;  %v5630_v54 = vpop.permute.xlu1 %996 }
  0xf8   : > { %v664_v49 = vpop.f32.mrf.mxu2 }
  0xf9   : > { %1106 = vrot.lane.b32.xlu2 %v632_v46, %s5024_s22  ;;  %1044 = vrot.lane.b32.xlu0 %v632_v46, %s5022_s18 }
  0xfa   : > { %970 = vrot.lane.b32.xlu1 %v632_v46, %s5023_s19 }
  0xfb   : > { %v725_v50 = vpop.f32.mrf.mxu3 }
  0xfc   : > { %v726_v8 = vadd.f32 %v725_v50, %v664_v49  ;;  %v904_v14 = vpop.permute.xlu0 %903 }
  0xfd   : > { %v763_v17 = vpop.f32.mrf.mxu0  ;;  %v5632_v61 = vpop.permute.xlu2 %1068  ;;  %v908_v16 = vsel %vm907_vm2, %v902_v12, %v904_v14  ;;  %v909_v27 = vsel %vm907_vm2, %v904_v14, %v902_v12 }
  0xfe   : > { %v764_v56 = vadd.f32 %v763_v17, %v726_v8  ;;  %v5634_v15 = vpop.permute.xlu1 %1037  ;;  %v5705_v57 = vmul.f32 %v917_v26, %v909_v27  ;;  %v5707_v58 = vmul.f32 %v917_v26, %v908_v16  ;;  %v1117_v16 = vstv %s5746_s30 }
  0xff   : > { %v794_v59 = vpop.f32.mrf.mxu1  ;;  %v1042_v41 = vsel %vm1041_vm5, %v5634_v15, %v5628_v22 }
 0x100   : > { %v795_v30 = vadd.f32 %v794_v59, %v764_v56 }
 0x101   : > { %v839_v34 = vpop.f32.mrf.mxu2 }
 0x102   : > { %v840_v13 = vadd.f32 %v839_v34, %v795_v30  ;;  %1075 = vrot.lane.b32.xlu1 %v632_v46, %s5026_s24 }
 0x104   : > { %v868_v21 = vpop.f32.mrf.mxu3  ;;  %v966_v60 = vpop.permute.xlu0 %965 }
 0x105   : > { %v869_v2 = vadd.f32 %v868_v21, %v840_v13  ;;  %v969_v51 = vsel %vm967_vm3, %v966_v60, %v5626_v6  ;;  %v968_v28 = vsel %vm967_vm3, %v5626_v6, %v966_v60  ;;  %v5757_v21 = vld [vmem:[#allocation7] sm:$0xff] }
 0x106   : > { %v5638_v38 = vpop.permute.xlu1 %1101  ;;  %v1122_v27 = vrot.slane %v5757_v21, 7 }
 0x107   : > { %972 = vrot.lane.b32.xlu2 %v869_v2, %s5023_s19  ;;  %1003 = vrot.lane.b32.xlu0 %v869_v2, %s5021_s15  ;;  %s5654_s15 = sld [smem:[#allocation3 + $0x3]]  ;;  %v1032_v20 = vmul.f32 %v1030_v37, %v869_v2 }
 0x108   : > { %s5660_s19 = sld [smem:[#allocation3 + $0x6]] }
 0x10a   : > { %912 = vrot.lane.b32.xlu1 %v869_v2, %s5019_s8  ;;  %s5652_s8 = sld [smem:[#allocation3 + $0x2]] }
 0x10c   : > { %v995_v23 = vpop.permute.xlu0 %994 }
 0x10d   : > { %v1008_v42 = vstv %s5654_s15  ;;  %v999_v35 = vsel %vm998_vm4, %v995_v23, %v5630_v54  ;;  %v1000_v36 = vsel %vm998_vm4, %v5630_v54, %v995_v23  ;;  %s5769_s15 = sld [smem:[#allocation3 + $0xe]] }
 0x10e   : > { %v5644_v1 = vpop.permute.xlu1 %1130  ;;  %v1082_v48 = vstv %s5660_s19  ;;  %v1009_v55 = vmul.f32 %v1008_v42, %v1000_v36  ;;  %v1010_v7 = vmul.f32 %v1008_v42, %v999_v35  ;;  %s5795_s19 = sld [smem:[#allocation2]] }
 0x10f   : > { %1077 = vrot.lane.b32.xlu2 %v869_v2, %s5026_s24  ;;  %1108 = vrot.lane.b32.xlu0 %v869_v2, %s5024_s22  ;;  %s5670_s22 = sld [smem:[#allocation3 + $0xb]] }
 0x110   : > { %v977_v10 = vstv %s5652_s8  ;;  %s5697_s24 = sld [smem:[#allocation3 + $0x8]] }
 0x111   : > { %v978_v29 = vmul.f32 %v977_v10, %v969_v51  ;;  %v979_v59 = vmul.f32 %v977_v10, %v968_v28  ;;  %s5761_s8 = sld [smem:[#allocation3 + $0xa]]  ;;  %v1017_v10 = vrot.slane %v5757_v21, 3 }
 0x112   : > { %939 = vrot.lane.b32.xlu1 %v869_v2, %s5020_s17 }
 0x113   : > { %v1055_v36 = vstv %s5769_s15 }
 0x114   : > { %v5640_v39 = vpop.permute.xlu0 %1070 }
 0x115   : > { %v1073_v49 = vsel %vm1072_vm6, %v5632_v61, %v5640_v39  ;;  %v1074_v50 = vsel %vm1072_vm6, %v5640_v39, %v5632_v61  ;;  %v981_v8 = vstv %s5670_s22 }
 0x116   : > { %v1084_v54 = vmul.f32 %v1082_v48, %v1074_v50  ;;  %v1144_v3 = vstv %s5697_s24 }
 0x117   : > { %1132 = vrot.lane.b32.xlu2 %v5573_v47, %s5025_s23  ;;  %1137 = vrot.lane.b32.xlu0 %v632_v46, %s5025_s23  ;;  %v5699_v47 = vadd.f32 %v1032_v20, %v1028_v45  ;;  %v1043_v46 = vsel %vm1041_vm5, %v5628_v22, %v5634_v15  ;;  %v1083_v22 = vmul.f32 %v1082_v48, %v1073_v49  ;;  %v1012_v20 = vstv %s5718_s25 }
 0x11a   : > { %1046 = vrot.lane.b32.xlu1 %v869_v2, %s5022_s18  ;;  %s5658_s18 = sld [smem:[#allocation3 + $0x5]] }
 0x11c   : > { %v5650_v18 = vpop.permute.xlu0 %1099 }
 0x11d   : > { %v1104_v34 = vsel %vm1103_vm7, %v5650_v18, %v5638_v38  ;;  %v1105_v13 = vsel %vm1103_vm7, %v5638_v38, %v5650_v18  ;;  %v986_v38 = vrot.slane %v5757_v21, 2  ;;  %v1086_v18 = vstv %s5709_s16 }
 0x120   : > { %v1051_v44 = vstv %s5658_s18  ;;  %s5789_s18 = sld [smem:[#allocation3 + $0x11]] }
 0x121   : > { %v5763_v12 = vmul.f32 %v1051_v44, %v1042_v41  ;;  %v5765_v6 = vmul.f32 %v1051_v44, %v1043_v46 }
 0x122   : > { %1139 = vrot.lane.b32.xlu1 %v869_v2, %s5025_s23  ;;  %s5676_s23 = sld [smem:[#allocation3 + $0x7]]  ;;  %v5759_v2 = vld [vmem:[#allocation7 + $0x8] sm:$0xff] }
 0x123   : > { %v987_v39 = vrot.slane %v5759_v2, 2  ;;  %v1092_v25 = vrot.slane %v5759_v2, 6  ;;  %v1018_v11 = vrot.slane %v5759_v2, 3  ;;  %v1123_v51 = vrot.slane %v5759_v2, 7 }
 0x124   : > { %v956_v35 = vrot.slane %v5759_v2, 1 }
 0x128   : > { %v1113_v30 = vstv %s5676_s23 }
 0x129   : > { %v5771_v15 = vmul.f32 %v1113_v30, %v1104_v34  ;;  %v5773_v23 = vmul.f32 %v1113_v30, %v1105_v13 }
 0x14b   : > { %v5636_v63 = vpop.permute.xlu2 %1001 }
 0x153   : > { %v5642_v0 = vpop.permute.xlu2 %1106 }
 0x161   : > { %v973_v4 = vpop.permute.xlu2 %972 }
 0x163   : > { %v5668_v33 = vpop.permute.xlu0 %937 }
 0x164   : > { %v5662_v5 = vpop.permute.xlu1 %910 }
 0x169   : > { %v1078_v52 = vpop.permute.xlu2 %1077 }
 0x16b   : > { %v5767_v14 = vpop.permute.xlu0 %1044 }
 0x16c   : > { %v971_v62 = vpop.permute.xlu1 %970 }
 0x16d   : > { %v974_v17 = vsel %vm967_vm3, %v971_v62, %v973_v4  ;;  %v975_v56 = vsel %vm967_vm3, %v973_v4, %v971_v62  ;;  %v1091_v4 = vrot.slane %v5757_v21, 6 }
 0x16e   : > { %v982_v60 = vmul.f32 %v981_v8, %v975_v56  ;;  %v983_v61 = vmul.f32 %v981_v8, %v974_v17  ;;  %v1232_v8 = vld [vmem:[#allocation10 + $0x78] sm:$0xff] }
 0x170   : > { %v984_v9 = vadd.f32 %v982_v60, %v978_v29  ;;  %v985_v26 = vadd.f32 %v983_v61, %v979_v59  ;;  %v955_v29 = vrot.slane %v5757_v21, 1  ;;  %v5819_v59 = vand.u32 4294901760, %v1232_v8 }
 0x171   : > { %v1133_v37 = vpop.permute.xlu2 %1132  ;;  %v1060_v61 = vrot.slane %v5757_v21, 5 }
 0x172   : > { %v1135_v42 = vsel %vm1134_vm8, %v5644_v1, %v1133_v37  ;;  %v1136_v62 = vsel %vm1134_vm8, %v1133_v37, %v5644_v1  ;;  %v5807_v41 = vmul.f32 %v986_v38, %v984_v9  ;;  %v5809_v46 = vmul.f32 %v987_v39, %v985_v26  ;;  %v1231_v38 = vld [vmem:[#allocation10 + $0x70] sm:$0xff]  ;;  %1250 = vmatpush.msrb.mxu0 %v5819_v59 }
 0x173   : > { %v5817_v1 = vmul.f32 %v1144_v3, %v1135_v42  ;;  %v5821_v30 = vmul.f32 %v1144_v3, %v1136_v62  ;;  %v5832_v3 = vsub.f32 %v1232_v8, %v5819_v59  ;;  %v5834_v37 = vand.u32 4294901760, %v1231_v38  ;;  %4543 = vmatpush.msrb.mxu2 %v5819_v59  ;;  %v1229_v42 = vld [vmem:[#allocation10 + $0x60] sm:$0xff] }
 0x174   : > { %v1076_v24 = vpop.permute.xlu1 %1075 }
 0x175   : > { %v1079_v32 = vsel %vm1072_vm6, %v1076_v24, %v1078_v52  ;;  %v1080_v45 = vsel %vm1072_vm6, %v1078_v52, %v1076_v24  ;;  %v948_v52 = vstv %s5761_s8  ;;  %7978 = vst [vmem:[#allocation21_spill] sm:$0xff] %v5832_v3  ;;  %v5846_v26 = vand.u32 4294901760, %v5832_v3  ;;  %1252 = vmatpush.msrb.mxu0 %v5834_v37  ;;  %4544 = vmatpush.msrb.mxu2 %v5834_v37 }
 0x176   : > { %v1087_v44 = vmul.f32 %v1086_v18, %v1079_v32  ;;  %v1088_v48 = vmul.f32 %v1086_v18, %v1080_v45  ;;  %v1230_v32 = vld [vmem:[#allocation10 + $0x68] sm:$0xff] }
 0x177   : > { %7979 = vst [vmem:[#allocation22_spill] sm:$0xff] %v5846_v26 }
 0x178   : > { %v1089_v34 = vadd.f32 %v1087_v44, %v1083_v22  ;;  %v1090_v13 = vadd.f32 %v1088_v48, %v1084_v54 }
 0x179   : > { %v1004_v28 = vpop.permute.xlu0 %1003 }
 0x17a   : > { %v1005_v49 = vsel %vm998_vm4, %v5636_v63, %v1004_v28  ;;  %v1006_v50 = vsel %vm998_vm4, %v1004_v28, %v5636_v63  ;;  %v5842_v9 = vmul.f32 %v1091_v4, %v1089_v34  ;;  %v5853_v44 = vmul.f32 %v1092_v25, %v1090_v13 }
 0x17b   : > { %v1013_v17 = vmul.f32 %v1012_v20, %v1006_v50  ;;  %v1014_v56 = vmul.f32 %v1012_v20, %v1005_v49  ;;  %v5840_v20 = vand.u32 4294901760, %v1230_v32 }
 0x17c   : > { %v913_v60 = vpop.permute.xlu1 %912 }
 0x17d   : > { %v1015_v39 = vadd.f32 %v1013_v17, %v1009_v55  ;;  %v1016_v18 = vadd.f32 %v1014_v56, %v1010_v7  ;;  %v914_v63 = vsel %vm907_vm2, %v5662_v5, %v913_v60  ;;  %v915_v24 = vsel %vm907_vm2, %v913_v60, %v5662_v5  ;;  %1254 = vmatpush.msrb.mxu0 %v5840_v20 }
 0x17e   : > { %v922_v22 = vmul.f32 %v921_v40, %v915_v24  ;;  %v923_v54 = vmul.f32 %v921_v40, %v914_v63  ;;  %v1061_v55 = vrot.slane %v5759_v2, 5  ;;  %v1148_v7 = vstv %s5789_s18  ;;  %4545 = vmatpush.msrb.mxu2 %v5840_v20  ;;  %s4946_s18 = scalar_lea.hbm %s7806_s7, 256 }
 0x17f   : > { %v5849_v40 = vsub.f32 %v1231_v38, %v5834_v37  ;;  %v5855_v48 = vmul.f32 %v1017_v10, %v1015_v39  ;;  %v5858_v4 = vsub.f32 %v1230_v32, %v5840_v20  ;;  %v5862_v28 = vmul.f32 %v1018_v11, %v1016_v18  ;;  %v1228_v10 = vld [vmem:[#allocation10 + $0x58] sm:$0xff] }
 0x180   : > { %v924_v5 = vadd.f32 %v922_v22, %v5705_v57  ;;  %v5860_v57 = vand.u32 4294901760, %v1229_v42  ;;  %v925_v49 = vadd.f32 %v923_v54, %v5707_v58  ;;  %v1349_v11 = vsub.f32 %v5832_v3, %v5846_v26  ;;  %v1226_v54 = vld [vmem:[#allocation10 + $0x48] sm:$0xff] }
 0x181   : > { %7980 = vst [vmem:[#allocation23_spill] sm:$0xff] %v5849_v40  ;;  %v1109_v62 = vpop.permute.xlu0 %1108  ;;  %v5875_v58 = vand.u32 4294901760, %v5849_v40  ;;  %v5885_v60 = vand.u32 4294901760, %v1228_v10 }
 0x182   : > { %7981 = vst [vmem:[#allocation24_spill] sm:$0xff] %v5858_v4  ;;  %v1110_v50 = vsel %vm1103_vm7, %v5642_v0, %v1109_v62  ;;  %v1111_v25 = vsel %vm1103_vm7, %v1109_v62, %v5642_v0  ;;  %v926_v56 = vmul.f32 %v924_v5, %v5757_v21  ;;  %v5880_v0 = vand.u32 4294901760, %v5858_v4  ;;  %1256 = vmatpush.msrb.mxu0 %v5860_v57 }
 0x183   : > { %v1118_v8 = vmul.f32 %v1117_v16, %v1110_v50  ;;  %v1119_v17 = vmul.f32 %v1117_v16, %v1111_v25  ;;  %7982 = vst [vmem:[#allocation25_spill] sm:$0xff] %v5875_v58  ;;  %v5883_v13 = vsub.f32 %v1229_v42, %v5860_v57  ;;  %4546 = vmatpush.msrb.mxu2 %v5860_v57  ;;  %v5901_v22 = vand.u32 4294901760, %v1349_v11  ;;  %v1225_v50 = vld [vmem:[#allocation10 + $0x40] sm:$0xff] }
 0x184   : > { %v940_v34 = vpop.permute.xlu1 %939  ;;  %7983 = vst [vmem:[#allocation26_spill] sm:$0xff] %v5880_v0  ;;  %1258 = vmatpush.msrb.mxu0 %v5885_v60  ;;  %v927_v32 = vmul.f32 %v925_v49, %v5759_v2  ;;  %v1361_v5 = vsub.f32 %v5858_v4, %v5880_v0 }
 0x185   : > { %7984 = vst [vmem:[#allocation27_spill] sm:$0xff] %v5883_v13  ;;  %v1120_v16 = vadd.f32 %v1118_v8, %v5771_v15  ;;  %v1121_v38 = vadd.f32 %v1119_v17, %v5773_v23  ;;  %v941_v39 = vsel %vm934_vm1, %v5668_v33, %v940_v34  ;;  %v942_v18 = vsel %vm934_vm1, %v940_v34, %v5668_v33  ;;  %v1227_v23 = vld [vmem:[#allocation10 + $0x50] sm:$0xff] }
 0x186   : > { %v949_v63 = vmul.f32 %v948_v52, %v942_v18  ;;  %v950_v24 = vmul.f32 %v948_v52, %v941_v39  ;;  %v1355_v15 = vsub.f32 %v5849_v40, %v5875_v58  ;;  %v5914_v52 = vand.u32 4294901760, %v5883_v13  ;;  %4547 = vmatpush.msrb.mxu2 %v5885_v60  ;;  %1351 = vmatpush.msrb.mxu1 %v5901_v22 }
 0x187   : > { %v5909_v33 = vmul.f32 %v1122_v27, %v1120_v16  ;;  %4559 = vmatpush.msrb.mxu3 %v5901_v22  ;;  %v5924_v27 = vsub.f32 %v1228_v10, %v5885_v60  ;;  %v5926_v25 = vand.u32 4294901760, %v1361_v5  ;;  %v5930_v17 = vand.u32 4294901760, %v1227_v23  ;;  %v1224_v16 = vld [vmem:[#allocation10 + $0x38] sm:$0xff] }
 0x188   : > { %7985 = vst [vmem:[#allocation28_spill] sm:$0xff] %v5914_v52  ;;  %v951_v42 = vadd.f32 %v949_v63, %v5701_v43  ;;  %v952_v62 = vadd.f32 %v950_v24, %v5703_v53  ;;  %v5921_v49 = vand.u32 4294901760, %v1355_v15  ;;  %v1367_v8 = vsub.f32 %v5883_v13, %v5914_v52 }
 0x189   : > { %7986 = vst [vmem:[#allocation29_spill] sm:$0xff] %v5924_v27  ;;  %v5932_v43 = vand.u32 4294901760, %v1226_v54  ;;  %v5936_v53 = vmul.f32 %v1123_v51, %v1121_v38  ;;  %v5945_v34 = vand.u32 4294901760, %v5924_v27  ;;  %v5950_v18 = vsub.f32 %v1227_v23, %v5930_v17  ;;  %1260 = vmatpush.msrb.mxu0 %v5930_v17  ;;  %4548 = vmatpush.msrb.mxu2 %v5930_v17 }
 0x18a   : > { %v959_v11 = vmul.f32 %v955_v29, %v951_v42  ;;  %v960_v10 = vmul.f32 %v956_v35, %v952_v62  ;;  %1357 = vmatpush.msrb.mxu1 %v5921_v49  ;;  %4560 = vmatpush.msrb.mxu3 %v5921_v49  ;;  %v5947_v39 = vand.u32 4294901760, %v1367_v8  ;;  %v5955_v29 = vand.u32 4294901760, %v1225_v50 }
 0x18b   : > { %7987 = vst [vmem:[#allocation30_spill] sm:$0xff] %v5945_v34  ;;  %v5953_v51 = vsub.f32 %v1226_v54, %v5932_v43  ;;  %v1373_v24 = vsub.f32 %v5924_v27, %v5945_v34  ;;  %v5963_v15 = vand.u32 4294901760, %v1224_v16  ;;  %v5972_v54 = vand.u32 4294901760, %v5950_v18  ;;  %1262 = vmatpush.msrb.mxu0 %v5932_v43  ;;  %4549 = vmatpush.msrb.mxu2 %v5932_v43 }
 0x18c   : > { %7988 = vst [vmem:[#allocation31_spill] sm:$0xff] %v5950_v18  ;;  %v961_v35 = vadd.f32 %v959_v11, %v926_v56  ;;  %v962_v38 = vadd.f32 %v960_v10, %v927_v32  ;;  %v1047_v63 = vpop.permute.xlu1 %1046  ;;  %1363 = vmatpush.msrb.mxu1 %v5926_v25  ;;  %4561 = vmatpush.msrb.mxu3 %v5926_v25 }
 0x18d   : > { %7989 = vst [vmem:[#allocation32_spill] sm:$0xff] %v5953_v51  ;;  %v1048_v23 = vsel %vm1041_vm5, %v5767_v14, %v1047_v63  ;;  %v1049_v56 = vsel %vm1041_vm5, %v1047_v63, %v5767_v14  ;;  %v5975_v32 = vand.u32 4294901760, %v5953_v51  ;;  %v5987_v14 = vand.u32 4294901760, %v1373_v24  ;;  %1264 = vmatpush.msrb.mxu0 %v5955_v29  ;;  %v1223_v63 = vld [vmem:[#allocation10 + $0x30] sm:$0xff]  ;;  %v1222_v24 = vld [vmem:[#allocation10 + $0x28] sm:$0xff]  ;;  %4550 = vmatpush.msrb.mxu2 %v5955_v29 }
 0x18e   : > { %7990 = vst [vmem:[#allocation33_spill] sm:$0xff] %v5955_v29  ;;  %v992_v5 = vadd.f32 %v5807_v41, %v961_v35  ;;  %v993_v42 = vadd.f32 %v5809_v46, %v962_v38  ;;  %v1056_v62 = vmul.f32 %v1055_v36, %v1048_v23  ;;  %v1057_v8 = vmul.f32 %v1055_v36, %v1049_v56 }
 0x18f   : > { %7991 = vst [vmem:[#allocation34_spill] sm:$0xff] %v5963_v15  ;;  %1369 = vmatpush.msrb.mxu1 %v5947_v39  ;;  %4562 = vmatpush.msrb.mxu3 %v5947_v39  ;;  %v1379_v11 = vsub.f32 %v5950_v18, %v5972_v54  ;;  %v1385_v10 = vsub.f32 %v5953_v51, %v5975_v32  ;;  %v6030_v21 = vand.u32 4294901760, %v1222_v24 }
 0x190   : > { %7992 = vst [vmem:[#allocation35_spill] sm:$0xff] %v5972_v54  ;;  %v5994_v41 = vsub.f32 %v1225_v50, %v5955_v29  ;;  %v1023_v46 = vadd.f32 %v5855_v48, %v992_v5  ;;  %v1024_v36 = vadd.f32 %v5862_v28, %v993_v42  ;;  %v1058_v35 = vadd.f32 %v1056_v62, %v5763_v12  ;;  %v1221_v12 = vld [vmem:[#allocation10 + $0x20] sm:$0xff]  ;;  %v1220_v62 = vld [vmem:[#allocation10 + $0x18] sm:$0xff] }
 0x191   : > { %7993 = vst [vmem:[#allocation36_spill] sm:$0xff] %v5975_v32  ;;  %v1059_v38 = vadd.f32 %v1057_v8, %v5765_v6  ;;  %1375 = vmatpush.msrb.mxu1 %v5987_v14  ;;  %4563 = vmatpush.msrb.mxu3 %v5987_v14  ;;  %v6004_v50 = vand.u32 4294901760, %v1379_v11  ;;  %v6006_v23 = vand.u32 4294901760, %v1385_v10  ;;  %v6012_v28 = vsub.f32 %v1224_v16, %v5963_v15 }
 0x192   : > { %7994 = vst [vmem:[#allocation37_spill] sm:$0xff] %v5994_v41  ;;  %v6009_v48 = vand.u32 4294901760, %v5994_v41  ;;  %v1036_v6 = vadd.f32 %v5699_v47, %v1024_v36  ;;  %v1035_v56 = vadd.f32 %v5678_v31, %v1023_v46  ;;  %v1064_v5 = vmul.f32 %v1060_v61, %v1058_v35  ;;  %1266 = vmatpush.msrb.mxu0 %v5963_v15  ;;  %v1138_v61 = vpop.permute.xlu0 %1137 }
 0x193   : > { %7995 = vst [vmem:[#allocation38_spill] sm:$0xff] %v6004_v50  ;;  %v1065_v42 = vmul.f32 %v1061_v55, %v1059_v38  ;;  %1381 = vmatpush.msrb.mxu1 %v6004_v50  ;;  %4564 = vmatpush.msrb.mxu3 %v6004_v50  ;;  %v6026_v47 = vand.u32 4294901760, %v6012_v28  ;;  %v6028_v31 = vand.u32 4294901760, %v1223_v63  ;;  %v6032_v11 = vand.u32 4294901760, %v1221_v12 }
 0x194   : > { %7996 = vst [vmem:[#allocation39_spill] sm:$0xff] %v6006_v23  ;;  %v1391_v16 = vsub.f32 %v5994_v41, %v6009_v48  ;;  %v1066_v2 = vadd.f32 %v1064_v5, %v1035_v56  ;;  %v1140_v8 = vpop.permute.xlu1 %1139  ;;  %4551 = vmatpush.msrb.mxu2 %v5963_v15  ;;  %v6035_v10 = vand.u32 4294901760, %v1220_v62  ;;  %v899_v5 = vld [vmem:[#allocation7 + $0x10] sm:$0x1] }
 0x195   : > { %7997 = vst [vmem:[#allocation40_spill] sm:$0xff] %v6009_v48  ;;  %v1067_v55 = vadd.f32 %v1065_v42, %v1036_v6  ;;  %v1141_v46 = vsel %vm1134_vm8, %v1138_v61, %v1140_v8  ;;  %v1142_v36 = vsel %vm1134_vm8, %v1140_v8, %v1138_v61  ;;  %1387 = vmatpush.msrb.mxu1 %v6006_v23 }
 0x196   : > { %7998 = vst [vmem:[#allocation41_spill] sm:$0xff] %v6012_v28  ;;  %4565 = vmatpush.msrb.mxu3 %v6006_v23  ;;  %v6043_v35 = vand.u32 4294901760, %v1391_v16  ;;  %v1397_v38 = vsub.f32 %v6012_v28, %v6026_v47  ;;  %v1097_v6 = vadd.f32 %v5842_v9, %v1066_v2  ;;  %v1149_v42 = vmul.f32 %v1148_v7, %v1141_v46  ;;  %v1219_v2 = vld [vmem:[#allocation10 + $0x10] sm:$0xff] }
 0x197   : > { %7999 = vst [vmem:[#allocation42_spill] sm:$0xff] %v6026_v47  ;;  %v1098_v56 = vadd.f32 %v5853_v44, %v1067_v55  ;;  %v1150_v45 = vmul.f32 %v1148_v7, %v1142_v36  ;;  %1268 = vmatpush.msrb.mxu0 %v6028_v31  ;;  %v6059_v61 = vsub.f32 %v1223_v63, %v6028_v31  ;;  %v1218_v7 = vld [vmem:[#allocation10 + $0x8] sm:$0xff] }
 0x198   : > { %8000 = vst [vmem:[#allocation43_spill] sm:$0xff] %v6028_v31  ;;  %1393 = vmatpush.msrb.mxu1 %v6043_v35  ;;  %4566 = vmatpush.msrb.mxu3 %v6043_v35  ;;  %v6056_v16 = vand.u32 4294901760, %v1397_v38  ;;  %v6062_v9 = vsub.f32 %v1222_v24, %v6030_v21  ;;  %v6065_v44 = vsub.f32 %v1221_v12, %v6032_v11  ;;  %v6090_v12 = vand.u32 4294901760, %v1218_v7 }
 0x199   : > { %8001 = vst [vmem:[#allocation44_spill] sm:$0xff] %v6030_v21  ;;  %v1129_v55 = vadd.f32 %v5936_v53, %v1098_v56  ;;  %v1128_v8 = vadd.f32 %v5909_v33, %v1097_v6  ;;  %v1151_v46 = vadd.f32 %v1149_v42, %v5817_v1  ;;  %v1152_v36 = vadd.f32 %v1150_v45, %v5821_v30 }
 0x19a   : > { %8002 = vst [vmem:[#allocation45_spill] sm:$0xff] %v6032_v11  ;;  %4552 = vmatpush.msrb.mxu2 %v6028_v31  ;;  %1399 = vmatpush.msrb.mxu1 %v6056_v16  ;;  %v6075_v63 = vand.u32 4294901760, %v6059_v61  ;;  %v6078_v24 = vand.u32 4294901760, %v6062_v9  ;;  %v6081_v53 = vand.u32 4294901760, %v6065_v44  ;;  %v6084_v33 = vsub.f32 %v1220_v62, %v6035_v10 }
 0x19b   : > { %8003 = vst [vmem:[#allocation46_spill] sm:$0xff] %v6035_v10  ;;  %4567 = vmatpush.msrb.mxu3 %v6056_v16  ;;  %v1153_v1 = vmul.f32 %v1151_v46, %v899_v5  ;;  %v1154_v30 = vmul.f32 %v1152_v36, %v900_v19  ;;  %v6086_v45 = vand.u32 4294901760, %v1219_v2  ;;  %1270 = vmatpush.msrb.mxu0 %v6030_v21  ;;  %v1217_v36 = vld [vmem:[#allocation10] sm:$0xff] }
 0x19c   : > { %8004 = vst [vmem:[#allocation47_spill] sm:$0xff] %v6043_v35  ;;  %4553 = vmatpush.msrb.mxu2 %v6030_v21  ;;  %v1403_v38 = vsub.f32 %v6059_v61, %v6075_v63  ;;  %v1409_v6 = vsub.f32 %v6062_v9, %v6078_v24  ;;  %v1415_v62 = vsub.f32 %v6065_v44, %v6081_v53  ;;  %v6099_v56 = vand.u32 4294901760, %v6084_v33 }
 0x19d   : > { %8005 = vst [vmem:[#allocation48_spill] sm:$0xff] %v6056_v16  ;;  %v1155_v5 = vadd.f32 %v1153_v1, %v1128_v8  ;;  %v1156_v42 = vadd.f32 %v1154_v30, %v1129_v55  ;;  %v6102_v19 = vsub.f32 %v1219_v2, %v6086_v45  ;;  %v6105_v46 = vsub.f32 %v1218_v7, %v6090_v12 }
 0x19e   : > { %8006 = vst [vmem:[#allocation49_spill] sm:$0xff] %v6059_v61  ;;  %1272 = vmatpush.msrb.mxu0 %v6032_v11  ;;  %v6108_v16 = vand.u32 4294901760, %v1403_v38  ;;  %v6110_v35 = vand.u32 4294901760, %v1409_v6  ;;  %v1421_v23 = vsub.f32 %v6084_v33, %v6099_v56  ;;  %4554 = vmatpush.msrb.mxu2 %v6032_v11  ;;  %v8019_v8 = vstv %s5795_s19 }
 0x19f   : > { %8007 = vst [vmem:[#allocation50_spill] sm:$0xff] %v6062_v9  ;;  %v1159_v55 = vadd.f32 %v8019_v8, %v1155_v5  ;;  %v8020_v1 = vmov %v8019_v8  ;;  %v6120_v30 = vand.u32 4294901760, %v6102_v19  ;;  %v6123_v7 = vand.u32 4294901760, %v6105_v46 }
 0x1a0   : > { %8008 = vst [vmem:[#allocation51_spill] sm:$0xff] %v6065_v44  ;;  %v1160_v2 = vadd.f32 %v8020_v1, %v1156_v42  ;;  %1274 = vmatpush.msrb.mxu0 %v6035_v10  ;;  %1405 = vmatpush.msrb.mxu1 %v6108_v16  ;;  %v6128_v38 = vand.u32 4294901760, %v1415_v62  ;;  %v6130_v6 = vand.u32 4294901760, %v1217_v36  ;;  %v6138_v8 = vand.u32 4294901760, %v1421_v23 }
 0x1a1   : > { %8009 = vst [vmem:[#allocation52_spill] sm:$0xff] %v6075_v63  ;;  %4568 = vmatpush.msrb.mxu3 %v6108_v16  ;;  %v4526_v50 = vmul.f32 -1.442695, %v1159_v55  ;;  %v1427_v42 = vsub.f32 %v6102_v19, %v6120_v30  ;;  %4555 = vmatpush.msrb.mxu2 %v6035_v10  ;;  %v1433_v62 = vsub.f32 %v6105_v46, %v6123_v7 }
 0x1a2   : > { %8010 = vst [vmem:[#allocation53_spill] sm:$0xff] %v6078_v24  ;;  %v4527_v5 = vmul.f32 -1.442695, %v1160_v2  ;;  %1276 = vmatpush.msrb.mxu0 %v6086_v45  ;;  %1411 = vmatpush.msrb.mxu1 %v6110_v35  ;;  %v6143_v1 = vsub.f32 %v1217_v36, %v6130_v6 }
 0x1a3   : > { %8011 = vst [vmem:[#allocation54_spill] sm:$0xff] %v6081_v53  ;;  %4569 = vmatpush.msrb.mxu3 %v6110_v35  ;;  %4689 = vpow2.f32 %v4526_v50  ;;  %4556 = vmatpush.msrb.mxu2 %v6086_v45  ;;  %v6149_v55 = vand.u32 4294901760, %v1427_v42  ;;  %v6158_v50 = vand.u32 4294901760, %v1433_v62 }
 0x1a4   : > { %8012 = vst [vmem:[#allocation55_spill] sm:$0xff] %v6084_v33  ;;  %1278 = vmatpush.msrb.mxu0 %v6090_v12  ;;  %4691 = vpow2.f32 %v4527_v5  ;;  %1417 = vmatpush.msrb.mxu1 %v6128_v38  ;;  %v6152_v23 = vand.u32 4294901760, %v6143_v1 }
 0x1a5   : > { %8013 = vst [vmem:[#allocation56_spill] sm:$0xff] %v6086_v45  ;;  %4570 = vmatpush.msrb.mxu3 %v6128_v38  ;;  %4557 = vmatpush.msrb.mxu2 %v6090_v12 }
 0x1a6   : > { %8014 = vst [vmem:[#allocation57_spill] sm:$0xff] %v6090_v12  ;;  %1280 = vmatpush.msrb.mxu0 %v6130_v6  ;;  %1423 = vmatpush.msrb.mxu1 %v6138_v8  ;;  %v1439_v36 = vsub.f32 %v6143_v1, %v6152_v23 }
 0x1a7   : > { %8015 = vst [vmem:[#allocation58_spill] sm:$0xff] %v6099_v56  ;;  %4571 = vmatpush.msrb.mxu3 %v6138_v8  ;;  %4558 = vmatpush.msrb.mxu2 %v6130_v6 }
 0x1a8   : > { %8016 = vst [vmem:[#allocation59_spill] sm:$0xff] %v6102_v19  ;;  %1648 = vmatpush.msra.mxu0 %v5846_v26  ;;  %1429 = vmatpush.msrb.mxu1 %v6149_v55  ;;  %v6166_v2 = vand.u32 4294901760, %v1439_v36 }
 0x1a9   : > { %8017 = vst [vmem:[#allocation60_spill] sm:$0xff] %v6105_v46  ;;  %4572 = vmatpush.msrb.mxu3 %v6149_v55  ;;  %v4690_v5 = vpop.eup %4689  ;;  %1477 = vmatpush.msra.mxu2 %v5832_v3 }
 0x1aa   : > { %8018 = vst [vmem:[#allocation61_spill] sm:$0xff] %v6110_v35  ;;  %1652 = vmatpush.msra.mxu0 %v5875_v58  ;;  %v4692_v42 = vpop.eup %4691  ;;  %v1167_v62 = vadd.f32 1.0, %v4690_v5  ;;  %1435 = vmatpush.msrb.mxu1 %v6158_v50  ;;  %v1233_v35 = vld [vmem:[#allocation10 + $0x80] sm:$0xff] }
 0x1ab   : > { %8021 = vst [vmem:[#allocation62_spill] sm:$0xff] %v6120_v30  ;;  %4573 = vmatpush.msrb.mxu3 %v6158_v50  ;;  %1480 = vmatpush.msra.mxu2 %v5849_v40 }
 0x1ac   : > { %8022 = vst [vmem:[#allocation63_spill] sm:$0xff] %v6123_v7  ;;  %1656 = vmatpush.msra.mxu0 %v5880_v0  ;;  %4693 = vrcp.f32 %v1167_v62  ;;  %1441 = vmatpush.msrb.mxu1 %v6166_v2  ;;  %v1178_v0 = vand.u32 2147483647, %v1167_v62  ;;  %vm1174_vm11 = vweird.f32 %v1167_v62 }
 0x1ad   : > { %8023 = vst [vmem:[#allocation64_spill] sm:$0xff] %v6128_v38  ;;  %4574 = vmatpush.msrb.mxu3 %v6166_v2  ;;  %1483 = vmatpush.msra.mxu2 %v5858_v4 }
 0x1ae   : > { %8024 = vst [vmem:[#allocation65_spill] sm:$0xff] %v6130_v6  ;;  %1743 = vmatpush.msra.mxu1 %v5819_v59  ;;  %1660 = vmatpush.msra.mxu0 %v5914_v52  ;;  %vm1179_vm14 = vcmp.eq.f32.partialorder %v1178_v0, 8.507059e+37 }
 0x1af   : > { %8025 = vst [vmem:[#allocation66_spill] sm:$0xff] %v6138_v8  ;;  %v6172_v8 = vadd.f32 1.0, %v4692_v42  ;;  %1565 = vmatpush.msra.mxu3 %v5819_v59  ;;  %1486 = vmatpush.msra.mxu2 %v5883_v13 }
 0x1b0   : > { %8026 = vst [vmem:[#allocation67_spill] sm:$0xff] %v6143_v1  ;;  %1745 = vmatpush.msra.mxu1 %v5834_v37  ;;  %1664 = vmatpush.msra.mxu0 %v5945_v34 }
 0x1b1   : > { %8027 = vst [vmem:[#allocation68_spill] sm:$0xff] %v6149_v55  ;;  %4695 = vrcp.f32 %v6172_v8  ;;  %1567 = vmatpush.msra.mxu3 %v5834_v37  ;;  %1489 = vmatpush.msra.mxu2 %v5924_v27  ;;  %v1180_v27 = vand.u32 2147483648, %v1167_v62  ;;  %v1195_v4 = vand.u32 2147483648, %v6172_v8  ;;  %vm1189_vm13 = vweird.f32 %v6172_v8  ;;  %v1239_v55 = vld [vmem:[#allocation10 + $0xb0] sm:$0xff] }
 0x1b2   : > { %8028 = vst [vmem:[#allocation69_spill] sm:$0xff] %v6152_v23  ;;  %1747 = vmatpush.msra.mxu1 %v5840_v20  ;;  %v4694_v36 = vpop.eup %4693  ;;  %1668 = vmatpush.msra.mxu0 %v5972_v54 }
 0x1b3   : > { %8029 = vst [vmem:[#allocation70_spill] sm:$0xff] %v6158_v50  ;;  %1569 = vmatpush.msra.mxu3 %v5840_v20  ;;  %v1170_v42 = vmul.f32 %v4694_v36, %v1167_v62  ;;  %1492 = vmatpush.msra.mxu2 %v5950_v18  ;;  %vm1175_vm9 = vweird.f32 %v4694_v36 }
 0x1b4   : > { %8030 = vst [vmem:[#allocation71_spill] sm:$0xff] %v6166_v2  ;;  %1749 = vmatpush.msra.mxu1 %v5860_v57  ;;  %1672 = vmatpush.msra.mxu0 %v5975_v32  ;;  %v1193_v32 = vand.u32 2147483647, %v6172_v8  ;;  %vm1176_vm12 = vmor %vm1174_vm11, %vm1175_vm9 }
 0x1b5   : > { %1571 = vmatpush.msra.mxu3 %v5860_v57  ;;  %v1171_v34 = vsub.f32 1.0, %v1170_v42  ;;  %1495 = vmatpush.msra.mxu2 %v5953_v51 }
 0x1b6   : > { %1751 = vmatpush.msra.mxu1 %v5885_v60  ;;  %1676 = vmatpush.msra.mxu0 %v6009_v48  ;;  %vm1194_vm1 = vcmp.eq.f32.partialorder %v1193_v32, 8.507059e+37  ;;  %v4745_v32 = vld [vmem:[%s5222_s11 + $0x70] sm:$0xff] }
 0x1b7   : > { %v4696_v5 = vpop.eup %4695  ;;  %1573 = vmatpush.msra.mxu3 %v5885_v60  ;;  %v1172_v54 = vmul.f32 %v4694_v36, %v1171_v34  ;;  %1498 = vmatpush.msra.mxu2 %v5994_v41  ;;  %v1181_v34 = vor.u32 1.1754944e-38, %v1180_v27 }
 0x1b8   : > { %v1185_v52 = vmul.f32 %v4696_v5, %v6172_v8  ;;  %1753 = vmatpush.msra.mxu1 %v5930_v17  ;;  %vm1190_vm10 = vweird.f32 %v4696_v5  ;;  %1680 = vmatpush.msra.mxu0 %v6026_v47 }
 0x1b9   : > { %1575 = vmatpush.msra.mxu3 %v5930_v17  ;;  %1501 = vmatpush.msra.mxu2 %v6012_v28  ;;  %vm1191_vm15 = vmor %vm1189_vm13, %vm1190_vm10 }
 0x1ba   : > { %v1186_v13 = vsub.f32 1.0, %v1185_v52  ;;  %v1173_v52 = vadd.f32 %v4694_v36, %v1172_v54  ;;  %1755 = vmatpush.msra.mxu1 %v5932_v43  ;;  %1684 = vmatpush.msra.mxu0 %v6075_v63  ;;  %v1196_v54 = vor.u32 1.1754944e-38, %v1195_v4 }
 0x1bb   : > { %1577 = vmatpush.msra.mxu3 %v5932_v43  ;;  %1504 = vmatpush.msra.mxu2 %v6059_v61 }
 0x1bc   : > { %v1187_v42 = vmul.f32 %v4696_v5, %v1186_v13  ;;  %v1177_v13 = vsel %vm1176_vm12, %v4694_v36, %v1173_v52  ;;  %1757 = vmatpush.msra.mxu1 %v5955_v29  ;;  %1688 = vmatpush.msra.mxu0 %v6078_v24  ;;  %v4746_v36 = vld [vmem:[%s5222_s11 + $0x60] sm:$0xff] }
 0x1bd   : > { %1579 = vmatpush.msra.mxu3 %v5955_v29  ;;  %v1182_v62 = vsel %vm1179_vm14, %v1181_v34, %v1177_v13  ;;  %1507 = vmatpush.msra.mxu2 %v6062_v9  ;;  %v4748_v34 = vld [vmem:[%s5222_s11] sm:$0xff] }
 0x1be   : > { %v1188_v48 = vadd.f32 %v4696_v5, %v1187_v42  ;;  %v6216_v0 = vperm.slane %v1182_v62, 0  ;;  %1759 = vmatpush.msra.mxu1 %v5963_v15  ;;  %1692 = vmatpush.msra.mxu0 %v6081_v53  ;;  %v4747_v42 = vld [vmem:[%s5222_s11 + $0x50] sm:$0xff] }
 0x1bf   : > { %1581 = vmatpush.msra.mxu3 %v5963_v15  ;;  %1510 = vmatpush.msra.mxu2 %v6065_v44  ;;  %v4753_v44 = vld [vmem:[%s5222_s11 + $0x10] sm:$0xff] }
 0x1c0   : > { %v1192_v27 = vsel %vm1191_vm15, %v4696_v5, %v1188_v48  ;;  %v6226_v48 = vmul.f32 %v4745_v32, %v6216_v0  ;;  %v6230_v5 = vmul.f32 %v4746_v36, %v6216_v0  ;;  %v6234_v52 = vmul.f32 %v4747_v42, %v6216_v0  ;;  %v4751_v32 = vld [vmem:[%s5222_s11 + $0x58] sm:$0xff]  ;;  %v4752_v42 = vld [vmem:[%s5222_s11 + $0x40] sm:$0xff]  ;;  %1761 = vmatpush.msra.mxu1 %v6028_v31 }
 0x1c1   : > { %v1197_v8 = vsel %vm1194_vm1, %v1196_v54, %v1192_v27  ;;  %v6238_v13 = vmul.f32 %v4748_v34, %v6216_v0  ;;  %1583 = vmatpush.msra.mxu3 %v6028_v31  ;;  %v4749_v54 = vld [vmem:[%s5222_s11 + $0x78] sm:$0xff]  ;;  %v4750_v27 = vld [vmem:[%s5222_s11 + $0x68] sm:$0xff]  ;;  %v6255_v53 = vmul.f32 %v4752_v42, %v6216_v0  ;;  %1696 = vmatpush.msra.mxu0 %v6099_v56  ;;  %v1237_v31 = vld [vmem:[#allocation10 + $0xa0] sm:$0xff] }
 0x1c2   : > { %v6220_v4 = vperm.slane %v1197_v8, 0  ;;  %8031 = vst [vmem:[#allocation72_spill] sm:$0xff] %v6226_v48  ;;  %1763 = vmatpush.msra.mxu1 %v6030_v21  ;;  %v6280_v9 = vmul.f32 %v4753_v44, %v6216_v0  ;;  %v4754_v56 = vld [vmem:[%s5222_s11 + $0x48] sm:$0xff]  ;;  %1513 = vmatpush.msra.mxu2 %v6084_v33 }
 0x1c3   : > { %8032 = vst [vmem:[#allocation73_spill] sm:$0xff] %v6230_v5  ;;  %v6259_v34 = vand.u32 4294901760, %v6238_v13  ;;  %1585 = vmatpush.msra.mxu3 %v6030_v21  ;;  %v6273_v24 = vand.u32 4294901760, %v6255_v53  ;;  %1700 = vmatpush.msra.mxu0 %v6120_v30 }
 0x1c4   : > { %8033 = vst [vmem:[#allocation74_spill] sm:$0xff] %v6234_v52  ;;  %v6243_v62 = vmul.f32 %v4749_v54, %v6220_v4  ;;  %v6247_v8 = vmul.f32 %v4750_v27, %v6220_v4  ;;  %v6251_v36 = vmul.f32 %v4751_v32, %v6220_v4  ;;  %v6262_v54 = vand.u32 4294901760, %v6234_v52  ;;  %1765 = vmatpush.msra.mxu1 %v6032_v11 }
 0x1c5   : > { %8034 = vst [vmem:[#allocation75_spill] sm:$0xff] %v6238_v13  ;;  %1443 = vmatmul.f32.vlgmr.msrb.gmra.mxu1 %v6259_v34  ;;  %v6284_v63 = vsub.f32 %v6255_v53, %v6273_v24  ;;  %v6288_v61 = vsub.f32 %v6238_v13, %v6259_v34  ;;  %1459 = vmatmul.f32.vlgmr.msrb.gmra.mxu3 %v6273_v24  ;;  %v6296_v44 = vand.u32 4294901760, %v6280_v9 }
 0x1c6   : > { %8035 = vst [vmem:[#allocation76_spill] sm:$0xff] %v6243_v62  ;;  %v3518_v27 = vmax.f32 %v6226_v48, %v6243_v62  ;;  %v3515_v32 = vmax.f32 %v6230_v5, %v6247_v8  ;;  %v3512_v42 = vmax.f32 %v6234_v52, %v6251_v36  ;;  %v6293_v47 = vmul.f32 %v4754_v56, %v6220_v4  ;;  %v4756_v56 = vld [vmem:[%s5222_s11 + $0x28] sm:$0xff] }
 0x1c7   : > { %8036 = vst [vmem:[#allocation77_spill] sm:$0xff] %v6247_v8  ;;  %v6302_v28 = vsub.f32 %v6234_v52, %v6262_v54  ;;  %1587 = vmatpush.msra.mxu3 %v6032_v11  ;;  %v6312_v51 = vmul.f32 %v4756_v56, %v6220_v4  ;;  %v4757_v52 = vld [vmem:[%s5222_s11 + $0x18] sm:$0xff]  ;;  %v8044_v18 = vand.u32 4294901760, %v6288_v61  ;;  %v6328_v56 = vsub.f32 %v6280_v9, %v6296_v44 }
 0x1c8   : > { %8037 = vst [vmem:[#allocation78_spill] sm:$0xff] %v6251_v36  ;;  %3519 = vmax.xlane.f32.xlu2 %v3518_v27  ;;  %3516 = vmax.xlane.f32.xlu0 %v3515_v32  ;;  %v7845_v27 = vand.u32 4294901760, %v6284_v63  ;;  %v6321_v62 = vmul.f32 %v4757_v52, %v6220_v4  ;;  %v3509_v30 = vmax.f32 %v6255_v53, %v6293_v47 }
 0x1c9   : > { %8038 = vst [vmem:[#allocation79_spill] sm:$0xff] %v6255_v53  ;;  %3513 = vmax.xlane.f32.xlu1 %v3512_v42  ;;  %v4755_v42 = vld [vmem:[%s5222_s11 + $0x20] sm:$0xff]  ;;  %1589 = vmatpush.msra.mxu3 %v6035_v10 }
 0x1ca   : > { %8039 = vst [vmem:[#allocation80_spill] sm:$0xff] %v6280_v9  ;;  %v6308_v41 = vmul.f32 %v4755_v42, %v6216_v0  ;;  %v1316_v32 = vsub.f32 %v6284_v63, %v7845_v27  ;;  %v1284_v42 = vsub.f32 %v6288_v61, %v8044_v18  ;;  %1767 = vmatpush.msra.mxu1 %v6035_v10  ;;  %v6337_v18 = vand.u32 4294901760, %v6230_v5  ;;  %v1241_v10 = vld [vmem:[#allocation10 + $0xc0] sm:$0xff] }
 0x1cb   : > { %8040 = vst [vmem:[#allocation81_spill] sm:$0xff] %v6293_v47  ;;  %1516 = vmatpush.msra.mxu2 %v6102_v19  ;;  %1591 = vmatpush.msra.mxu3 %v6086_v45  ;;  %v1243_v47 = vld [vmem:[#allocation10 + $0xd0] sm:$0xff] }
 0x1cc   : > { %8041 = vst [vmem:[#allocation82_spill] sm:$0xff] %v6308_v41  ;;  %v1317_v27 = vand.u32 4294901760, %v1316_v32  ;;  %v1285_v52 = vand.u32 4294901760, %v1284_v42  ;;  %1704 = vmatpush.msra.mxu0 %v6123_v7  ;;  %v3503_v53 = vmax.f32 %v6308_v41, %v6312_v51  ;;  %v3500_v32 = vmax.f32 %v6280_v9, %v6321_v62  ;;  %v4758_v7 = vld [vmem:[%s5222_s11 + $0x30] sm:$0xff]  ;;  %1769 = vmatpush.msra.mxu1 %v6086_v45 }
 0x1cd   : > { %8042 = vst [vmem:[#allocation83_spill] sm:$0xff] %v6312_v51  ;;  %1447 = vmatmul.f32.gmra.mxu1 %v6296_v44  ;;  %1519 = vmatpush.msra.mxu2 %v6105_v46  ;;  %v6349_v33 = vand.u32 4294901760, %v6308_v41  ;;  %v6354_v19 = vmul.f32 %v4758_v7, %v6216_v0  ;;  %v4759_v46 = vld [vmem:[%s5222_s11 + $0x38] sm:$0xff]  ;;  %v6365_v42 = vsub.f32 %v6230_v5, %v6337_v18 }
 0x1ce   : > { %8043 = vst [vmem:[#allocation84_spill] sm:$0xff] %v6321_v62  ;;  %1318 = vmatmul.f32.vlgmr.msrb.gmra.mxu2 %v1317_v27  ;;  %1463 = vmatmul.f32.gmra.mxu3 %v6262_v54  ;;  %v6361_v9 = vmul.f32 %v4759_v46, %v6220_v4 }
 0x1cf   : > { %8045 = vst [vmem:[#allocation85_spill] sm:$0xff] %v6354_v19  ;;  %1286 = vmatmul.f32.vlgmr.msrb.gmra.mxu0 %v1285_v52  ;;  %1593 = vmatpush.msra.mxu3 %v6090_v12  ;;  %v6374_v0 = vsub.f32 %v6308_v41, %v6349_v33 }
 0x1d0   : > { %3510 = vmax.xlane.f32.xlu2 %v3509_v30  ;;  %3504 = vmax.xlane.f32.xlu0 %v3503_v53  ;;  %v8046_v30 = vand.u32 4294901760, %v6302_v28  ;;  %8047 = vst [vmem:[#allocation86_spill] sm:$0xff] %v6361_v9  ;;  %v8048_v53 = vand.u32 4294901760, %v6328_v56  ;;  %v3506_v52 = vmax.f32 %v6354_v19, %v6361_v9  ;;  %v6556_v9 = vand.u32 4294901760, %v1239_v55 }
 0x1d1   : > { %3501 = vmax.xlane.f32.xlu1 %v3500_v32  ;;  %1522 = vmatpush.msra.mxu2 %v6143_v1  ;;  %v7860_v32 = vand.u32 4294901760, %v6365_v42  ;;  %v7863_v5 = vand.u32 4294901760, %v6374_v0  ;;  %v4760_v1 = vld [vmem:[%s5222_s11 + $0x8] sm:$0xff]  ;;  %v8074_v50 = vand.u32 4294901760, %v6374_v0  ;;  %s7731_s11 = scalar_lea.vmem [#allocation14], %s5219_s21  ;;  %s4542_s21 = sshll.u32 %s5093_s1, 7 }
 0x1d2   : > { %v1324_v27 = vsub.f32 %v6302_v28, %v8046_v30  ;;  %v1292_v7 = vsub.f32 %v6328_v56, %v8048_v53  ;;  %1708 = vmatpush.msra.mxu0 %v6152_v23  ;;  %1771 = vmatpush.msra.mxu1 %v6090_v12  ;;  %v6384_v30 = vand.u32 4294901760, %v6226_v48  ;;  %v6389_v23 = vand.u32 4294901760, %v6354_v19  ;;  %s4363_s24 = scalar_lea.hbm %s7806_s7, %s4542_s21  ;;  %s4364_s16 = sshll.u32 %s7731_s11, 4  ;;  %s4365_s16 = int_to_ptr.vmem [resolvable:$true] %s4364_s16 }
 0x1d3   : > { %1595 = vmatpush.msra.mxu3 %v6130_v6  ;;  %v6398_v41 = vmul.f32 %v4760_v1, %v6220_v4  ;;  %s4366_s25 = sshll.u32 %s4363_s24, 4  ;;  %s4367_s25 = int_to_ptr.hbm [resolvable:$true] %s4366_s25 }
 0x1d4   : > { %v1325_v46 = vand.u32 4294901760, %v1324_v27  ;;  %v1293_v53 = vand.u32 4294901760, %v1292_v7  ;;  %1773 = vmatpush.msra.mxu1 %v6130_v6  ;;  %v1332_v27 = vsub.f32 %v6365_v42, %v7860_v32  ;;  %v6402_v7 = vsub.f32 %v6226_v48, %v6384_v30  ;;  %s4940_s30 = sshra.s32 %s4367_s25, 4  ;;  %s4941_s30 = int_to_ptr.hbm [resolvable:$true] %s4940_s30 }
 0x1d5   : > { %1451 = vmatmul.f32.gmra.mxu1 %v6349_v33  ;;  %8049 = vst [vmem:[#allocation87_spill] sm:$0xff] %v6398_v41  ;;  %v3497_v32 = vmax.f32 %v6238_v13, %v6398_v41  ;;  %v8061_v6 = vand.u32 4294901760, %v6328_v56  ;;  %s4942_s1 = scalar_lea.hbm %s4941_s30, 128  ;;  %p4947_p11 = scmp.lt.s32.totalorder %s4941_s30, %s7806_s7 }
 0x1d6   : > { %1326 = vmatmul.f32.gmra.mxu2 %v1325_v46  ;;  %1467 = vmatmul.f32.gmra.mxu3 %v6337_v18  ;;  %v1300_v46 = vsub.f32 %v6374_v0, %v7863_v5  ;;  %v7870_v8 = vand.u32 4294901760, %v6402_v7  ;;  %p4943_p1 = scmp.ne.s32.totalorder %s4941_s30, %s4942_s1  ;;  %p4948_p9 = scmp.lt.s32.totalorder %s4946_s18, %s4942_s1 }
 0x1d7   : > { %1294 = vmatmul.f32.gmra.mxu0 %v1293_v53  ;;  %v1333_v53 = vand.u32 4294901760, %v1332_v27 }
 0x1d8   : > { %3507 = vmax.xlane.f32.xlu2 %v3506_v52  ;;  %v6409_v52 = vsub.f32 %v6354_v19, %v6389_v23  ;;  %v1301_v1 = vand.u32 4294901760, %v1300_v46  ;;  %v1340_v5 = vsub.f32 %v6402_v7, %v7870_v8  ;;  %v1248_v19 = vld [vmem:[#allocation10 + $0xf8] sm:$0xff]  ;;  %v8051_v46 = vand.u32 4294901760, %v6288_v61  ;;  %p4944_p4 = pnand %p4943_p1, %p5168_p7  ;;  %p4949_p2 = por %p4948_p9, %p4947_p11 }
 0x1da   : > { %v7871_v4 = vand.u32 4294901760, %v6409_v52  ;;  %v1341_v48 = vand.u32 4294901760, %v1340_v5  ;;  %v1246_v5 = vld [vmem:[#allocation10 + $0xe8] sm:$0xff]  ;;  %v8085_v29 = vand.u32 4294901760, %v6409_v52  ;;  %p4945_p8 = pneg %p4944_p4 }
 0x1db   : > { %v6434_v58 = vand.u32 4294901760, %v1246_v5 }
 0x1dc   : > { %v1308_v27 = vsub.f32 %v6409_v52, %v7871_v4  ;;  %v1245_v4 = vld [vmem:[#allocation10 + $0xe0] sm:$0xff]  ;;  %p4950_p10 = pnand %p4949_p2, %p4945_p8 }
 0x1dd   : > { %1455 = vmatmul.f32.gmra.mxu1 %v6389_v23 }
 0x1de   : > { %1334 = vmatmul.f32.gmra.mxu2 %v1333_v53  ;;  %1471 = vmatmul.f32.gmra.mxu3 %v6384_v30  ;;  %v1309_v53 = vand.u32 4294901760, %v1308_v27  ;;  %v6436_v27 = vand.u32 4294901760, %v1245_v4 }
 0x1df   : > { %1302 = vmatmul.f32.gmra.mxu0 %v1301_v1  ;;  %v1247_v1 = vld [vmem:[#allocation10 + $0xf0] sm:$0xff] }
 0x1e0   : > { %3498 = vmax.xlane.f32.xlu2 %v3497_v32  ;;  %v6424_v32 = vand.u32 4294901760, %v1248_v19  ;;  %v6432_v8 = vand.u32 4294901760, %v1247_v1 }
 0x1e2   : > { %8050 = vst [vmem:[#allocation88_spill] sm:$0xff] %v6424_v32  ;;  %v6429_v13 = vsub.f32 %v1248_v19, %v6424_v32  ;;  %2123 = vmatpush.msrb.mxu1 %v6424_v32  ;;  %1808 = vmatpush.msrb.mxu2 %v6424_v32  ;;  %v6448_v19 = vsub.f32 %v1246_v5, %v6434_v58  ;;  %v1244_v5 = vld [vmem:[#allocation10 + $0xd8] sm:$0xff] }
 0x1e3   : > { %v6475_v3 = vand.u32 4294901760, %v1244_v5 }
 0x1e4   : > { %8052 = vst [vmem:[#allocation89_spill] sm:$0xff] %v6429_v13  ;;  %2125 = vmatpush.msrb.mxu1 %v6432_v8  ;;  %2035 = vmatpush.msrb.mxu0 %v6429_v13 }
 0x1e5   : > { %1775 = vmatmul.f32.vlgmr.msra.gmra.mxu1 %v6259_v34  ;;  %8055 = vst [vmem:[#allocation92_spill] sm:$0xff] %v6448_v19  ;;  %1810 = vmatpush.msrb.mxu2 %v6432_v8 }
 0x1e6   : > { %1342 = vmatmul.f32.gmra.mxu2 %v1341_v48  ;;  %1599 = vmatmul.f32.vlgmr.msra.gmra.mxu3 %v8051_v46  ;;  %v6440_v48 = vand.u32 4294901760, %v6429_v13  ;;  %v6451_v46 = vsub.f32 %v1245_v4, %v6436_v27 }
 0x1e7   : > { %1310 = vmatmul.f32.gmra.mxu0 %v1309_v53  ;;  %v6443_v53 = vsub.f32 %v1247_v1, %v6432_v8  ;;  %2127 = vmatpush.msrb.mxu1 %v6434_v58  ;;  %v6463_v1 = vand.u32 4294901760, %v6448_v19 }
 0x1e8   : > { %8053 = vst [vmem:[#allocation90_spill] sm:$0xff] %v6440_v48  ;;  %v1907_v40 = vsub.f32 %v6429_v13, %v6440_v48  ;;  %v6466_v4 = vand.u32 4294901760, %v6451_v46  ;;  %1812 = vmatpush.msrb.mxu2 %v6434_v58 }
 0x1e9   : > { %8054 = vst [vmem:[#allocation91_spill] sm:$0xff] %v6443_v53  ;;  %v6457_v26 = vand.u32 4294901760, %v6443_v53  ;;  %2038 = vmatpush.msrb.mxu0 %v6443_v53  ;;  %2129 = vmatpush.msrb.mxu1 %v6436_v27  ;;  %v1919_v12 = vsub.f32 %v6448_v19, %v6463_v1 }
 0x1ea   : > { %8056 = vst [vmem:[#allocation93_spill] sm:$0xff] %v6451_v46  ;;  %v6470_v13 = vand.u32 4294901760, %v1907_v40  ;;  %v1925_v45 = vsub.f32 %v6451_v46, %v6466_v4  ;;  %1814 = vmatpush.msrb.mxu2 %v6436_v27 }
 0x1eb   : > { %8057 = vst [vmem:[#allocation94_spill] sm:$0xff] %v6457_v26  ;;  %v1913_v36 = vsub.f32 %v6443_v53, %v6457_v26  ;;  %2041 = vmatpush.msrb.mxu0 %v6448_v19  ;;  %v6491_v53 = vand.u32 4294901760, %v1243_v47  ;;  %v6493_v2 = vand.u32 4294901760, %v1919_v12  ;;  %2131 = vmatpush.msrb.mxu1 %v6475_v3 }
 0x1ec   : > { %8058 = vst [vmem:[#allocation95_spill] sm:$0xff] %v6463_v1  ;;  %1909 = vmatpush.msrb.mxu3 %v6470_v13  ;;  %1816 = vmatpush.msrb.mxu2 %v6475_v3 }
 0x1ed   : > { %1779 = vmatmul.f32.gmra.mxu1 %v6296_v44  ;;  %8059 = vst [vmem:[#allocation96_spill] sm:$0xff] %v6466_v4  ;;  %v6486_v40 = vand.u32 4294901760, %v1913_v36  ;;  %v6502_v36 = vand.u32 4294901760, %v1925_v45  ;;  %v6508_v19 = vsub.f32 %v1243_v47, %v6491_v53  ;;  %2044 = vmatpush.msrb.mxu0 %v6451_v46  ;;  %v1240_v46 = vld [vmem:[#allocation10 + $0xb8] sm:$0xff] }
 0x1ee   : > { %1525 = vmatmul.f32.vlgmr.msra.gmra.mxu2 %v6288_v61  ;;  %8060 = vst [vmem:[#allocation97_spill] sm:$0xff] %v6470_v13  ;;  %1605 = vmatmul.f32.gmra.mxu3 %v8061_v6  ;;  %v6489_v61 = vsub.f32 %v1244_v5, %v6475_v3  ;;  %v1242_v6 = vld [vmem:[#allocation10 + $0xc8] sm:$0xff] }
 0x1ef   : > { %1710 = vmatmul.f32.vlgmr.msra.gmra.mxu0 %v6259_v34  ;;  %8062 = vst [vmem:[#allocation98_spill] sm:$0xff] %v6486_v40  ;;  %v6496_v11 = vand.u32 4294901760, %v1242_v6  ;;  %v6499_v34 = vand.u32 4294901760, %v1241_v10  ;;  %1915 = vmatpush.msrb.mxu3 %v6486_v40  ;;  %v6523_v47 = vand.u32 4294901760, %v6508_v19  ;;  %v6540_v40 = vand.u32 4294901760, %v1240_v46 }
 0x1f0   : > { %8063 = vst [vmem:[#allocation99_spill] sm:$0xff] %v6489_v61  ;;  %v6505_v5 = vand.u32 4294901760, %v6489_v61  ;;  %2133 = vmatpush.msrb.mxu1 %v6491_v53  ;;  %2047 = vmatpush.msrb.mxu0 %v6489_v61 }
 0x1f1   : > { %8064 = vst [vmem:[#allocation100_spill] sm:$0xff] %v6493_v2  ;;  %v6513_v12 = vsub.f32 %v1242_v6, %v6496_v11  ;;  %v6516_v13 = vsub.f32 %v1241_v10, %v6499_v34  ;;  %1921 = vmatpush.msrb.mxu3 %v6493_v2  ;;  %1818 = vmatpush.msrb.mxu2 %v6491_v53 }
 0x1f2   : > { %8065 = vst [vmem:[#allocation101_spill] sm:$0xff] %v6502_v36  ;;  %v1931_v45 = vsub.f32 %v6489_v61, %v6505_v5  ;;  %v1937_v61 = vsub.f32 %v6508_v19, %v6523_v47  ;;  %2135 = vmatpush.msrb.mxu1 %v6496_v11  ;;  %2050 = vmatpush.msrb.mxu0 %v6508_v19 }
 0x1f3   : > { %8066 = vst [vmem:[#allocation102_spill] sm:$0xff] %v6505_v5  ;;  %v6528_v6 = vand.u32 4294901760, %v6513_v12  ;;  %v6531_v10 = vand.u32 4294901760, %v6516_v13  ;;  %1927 = vmatpush.msrb.mxu3 %v6502_v36  ;;  %v6554_v36 = vsub.f32 %v1240_v46, %v6540_v40  ;;  %1820 = vmatpush.msrb.mxu2 %v6496_v11 }
 0x1f4   : > { %8067 = vst [vmem:[#allocation103_spill] sm:$0xff] %v6508_v19  ;;  %v6536_v2 = vand.u32 4294901760, %v1931_v45  ;;  %v6551_v45 = vand.u32 4294901760, %v1937_v61  ;;  %2137 = vmatpush.msrb.mxu1 %v6499_v34  ;;  %2053 = vmatpush.msrb.mxu0 %v6513_v12 }
 0x1f5   : > { %8068 = vst [vmem:[#allocation104_spill] sm:$0xff] %v6513_v12  ;;  %1783 = vmatmul.f32.gmra.mxu1 %v6349_v33  ;;  %v1943_v21 = vsub.f32 %v6513_v12, %v6528_v6  ;;  %v6570_v46 = vand.u32 4294901760, %v6554_v36  ;;  %1822 = vmatpush.msrb.mxu2 %v6499_v34 }
 0x1f6   : > { %8069 = vst [vmem:[#allocation105_spill] sm:$0xff] %v6516_v13  ;;  %1530 = vmatmul.f32.gmra.mxu2 %v6328_v56  ;;  %1611 = vmatmul.f32.gmra.mxu3 %v8074_v50  ;;  %v1949_v56 = vsub.f32 %v6516_v13, %v6531_v10  ;;  %v1238_v50 = vld [vmem:[#allocation10 + $0xa8] sm:$0xff] }
 0x1f7   : > { %8070 = vst [vmem:[#allocation106_spill] sm:$0xff] %v6523_v47  ;;  %1714 = vmatmul.f32.gmra.mxu0 %v6296_v44  ;;  %1933 = vmatpush.msrb.mxu3 %v6536_v2  ;;  %v6558_v15 = vand.u32 4294901760, %v1943_v21  ;;  %v6562_v38 = vand.u32 4294901760, %v1238_v50  ;;  %v6564_v44 = vand.u32 4294901760, %v1237_v31 }
 0x1f8   : > { %8071 = vst [vmem:[#allocation107_spill] sm:$0xff] %v6528_v6  ;;  %v6567_v61 = vand.u32 4294901760, %v1949_v56  ;;  %2139 = vmatpush.msrb.mxu1 %v6540_v40  ;;  %v1955_v56 = vsub.f32 %v6554_v36, %v6570_v46  ;;  %2056 = vmatpush.msrb.mxu0 %v6516_v13 }
 0x1f9   : > { %8072 = vst [vmem:[#allocation108_spill] sm:$0xff] %v6531_v10  ;;  %1939 = vmatpush.msrb.mxu3 %v6551_v45  ;;  %v6578_v21 = vsub.f32 %v1238_v50, %v6562_v38  ;;  %v6582_v19 = vsub.f32 %v1237_v31, %v6564_v44  ;;  %v1236_v31 = vld [vmem:[#allocation10 + $0x98] sm:$0xff]  ;;  %v1235_v10 = vld [vmem:[#allocation10 + $0x90] sm:$0xff]  ;;  %1824 = vmatpush.msrb.mxu2 %v6540_v40 }
 0x1fa   : > { %8073 = vst [vmem:[#allocation109_spill] sm:$0xff] %v6536_v2  ;;  %v6573_v2 = vsub.f32 %v1239_v55, %v6556_v9  ;;  %2141 = vmatpush.msrb.mxu1 %v6556_v9  ;;  %2059 = vmatpush.msrb.mxu0 %v6554_v36 }
 0x1fb   : > { %8075 = vst [vmem:[#allocation110_spill] sm:$0xff] %v6551_v45  ;;  %1945 = vmatpush.msrb.mxu3 %v6558_v15  ;;  %v6593_v50 = vand.u32 4294901760, %v6578_v21  ;;  %v6596_v12 = vand.u32 4294901760, %v6582_v19  ;;  %1826 = vmatpush.msrb.mxu2 %v6556_v9 }
 0x1fc   : > { %8076 = vst [vmem:[#allocation111_spill] sm:$0xff] %v6554_v36  ;;  %v6588_v55 = vand.u32 4294901760, %v6573_v2  ;;  %2143 = vmatpush.msrb.mxu1 %v6562_v38  ;;  %2062 = vmatpush.msrb.mxu0 %v6573_v2 }
 0x1fd   : > { %8077 = vst [vmem:[#allocation112_spill] sm:$0xff] %v6558_v15  ;;  %1787 = vmatmul.f32.gmra.mxu1 %v6389_v23  ;;  %1951 = vmatpush.msrb.mxu3 %v6567_v61  ;;  %v6601_v15 = vand.u32 4294901760, %v1955_v56  ;;  %v1967_v13 = vsub.f32 %v6578_v21, %v6593_v50 }
 0x1fe   : > { %8078 = vst [vmem:[#allocation113_spill] sm:$0xff] %v6567_v61  ;;  %1535 = vmatmul.f32.gmra.mxu2 %v6374_v0  ;;  %v1961_v45 = vsub.f32 %v6573_v2, %v6588_v55  ;;  %1617 = vmatmul.f32.gmra.mxu3 %v8085_v29  ;;  %v1973_v0 = vsub.f32 %v6582_v19, %v6596_v12  ;;  %v1234_v29 = vld [vmem:[#allocation10 + $0x88] sm:$0xff] }
 0x1ff   : > { %8079 = vst [vmem:[#allocation114_spill] sm:$0xff] %v6570_v46  ;;  %v6605_v46 = vand.u32 4294901760, %v1236_v31  ;;  %1718 = vmatmul.f32.gmra.mxu0 %v6349_v33  ;;  %1957 = vmatpush.msrb.mxu3 %v6601_v15  ;;  %v6623_v51 = vand.u32 4294901760, %v1967_v13  ;;  %v6629_v33 = vand.u32 4294901760, %v1233_v35 }
 0x200   : > { %8080 = vst [vmem:[#allocation115_spill] sm:$0xff] %v6573_v2  ;;  %v6616_v56 = vand.u32 4294901760, %v1961_v45  ;;  %v6632_v45 = vand.u32 4294901760, %v1973_v0  ;;  %2145 = vmatpush.msrb.mxu1 %v6564_v44  ;;  %1828 = vmatpush.msrb.mxu2 %v6562_v38  ;;  %v8092_v2 = vand.u32 4294901760, %v6284_v63 }
 0x201   : > { %8081 = vst [vmem:[#allocation116_spill] sm:$0xff] %v6588_v55  ;;  %v6619_v61 = vsub.f32 %v1236_v31, %v6605_v46  ;;  %v6621_v55 = vand.u32 4294901760, %v1235_v10  ;;  %2065 = vmatpush.msrb.mxu0 %v6578_v21 }
 0x202   : > { %8082 = vst [vmem:[#allocation117_spill] sm:$0xff] %v6593_v50  ;;  %1963 = vmatpush.msrb.mxu3 %v6616_v56  ;;  %v6647_v50 = vsub.f32 %v1233_v35, %v6629_v33  ;;  %2147 = vmatpush.msrb.mxu1 %v6605_v46 }
 0x203   : > { %8083 = vst [vmem:[#allocation118_spill] sm:$0xff] %v6596_v12  ;;  %v6627_v12 = vand.u32 4294901760, %v1234_v29  ;;  %v6635_v31 = vand.u32 4294901760, %v6619_v61  ;;  %v6639_v13 = vsub.f32 %v1235_v10, %v6621_v55  ;;  %1830 = vmatpush.msrb.mxu2 %v6564_v44  ;;  %2068 = vmatpush.msrb.mxu0 %v6582_v19 }
 0x204   : > { %8084 = vst [vmem:[#allocation119_spill] sm:$0xff] %v6601_v15  ;;  %1969 = vmatpush.msrb.mxu3 %v6623_v51  ;;  %v6662_v35 = vand.u32 4294901760, %v6647_v50  ;;  %2149 = vmatpush.msrb.mxu1 %v6621_v55 }
 0x205   : > { %8086 = vst [vmem:[#allocation120_spill] sm:$0xff] %v6616_v56  ;;  %v6644_v15 = vsub.f32 %v1234_v29, %v6627_v12  ;;  %v1979_v0 = vsub.f32 %v6619_v61, %v6635_v31  ;;  %v6653_v36 = vand.u32 4294901760, %v6639_v13  ;;  %1791 = vmatmul.f32.gmra.mxu1 %v6273_v24  ;;  %1832 = vmatpush.msrb.mxu2 %v6605_v46 }
 0x206   : > { %8087 = vst [vmem:[#allocation121_spill] sm:$0xff] %v6623_v51  ;;  %1540 = vmatmul.f32.gmra.mxu2 %v6409_v52  ;;  %1975 = vmatpush.msrb.mxu3 %v6632_v45 }
 0x207   : > { %8088 = vst [vmem:[#allocation122_spill] sm:$0xff] %v6635_v31  ;;  %v6659_v10 = vand.u32 4294901760, %v6644_v15  ;;  %v6666_v29 = vand.u32 4294901760, %v1979_v0  ;;  %v1985_v51 = vsub.f32 %v6639_v13, %v6653_v36  ;;  %1623 = vmatmul.f32.gmra.mxu3 %v8092_v2  ;;  %v1997_v31 = vsub.f32 %v6647_v50, %v6662_v35  ;;  %1722 = vmatmul.f32.gmra.mxu0 %v6389_v23  ;;  %v8098_v23 = vld [vmem:[#allocation47_spill] sm:$0xff] }
 0x208   : > { %8089 = vst [vmem:[#allocation123_spill] sm:$0xff] %v6653_v36  ;;  %2151 = vmatpush.msrb.mxu1 %v6627_v12  ;;  %2071 = vmatpush.msrb.mxu0 %v6619_v61 }
 0x209   : > { %8090 = vst [vmem:[#allocation124_spill] sm:$0xff] %v6659_v10  ;;  %v1991_v56 = vsub.f32 %v6644_v15, %v6659_v10  ;;  %1981 = vmatpush.msrb.mxu3 %v6666_v29  ;;  %v6679_v52 = vand.u32 4294901760, %v1985_v51  ;;  %v6687_v2 = vand.u32 4294901760, %v1997_v31  ;;  %v8093_v51 = vand.u32 4294901760, %v6302_v28  ;;  %1834 = vmatpush.msrb.mxu2 %v6621_v55 }
 0x20a   : > { %8091 = vst [vmem:[#allocation125_spill] sm:$0xff] %v6662_v35  ;;  %2153 = vmatpush.msrb.mxu1 %v6629_v33  ;;  %2074 = vmatpush.msrb.mxu0 %v6639_v13 }
 0x20b   : > { %v6682_v0 = vand.u32 4294901760, %v1991_v56  ;;  %1987 = vmatpush.msrb.mxu3 %v6679_v52  ;;  %1836 = vmatpush.msrb.mxu2 %v6627_v12  ;;  %v8100_v56 = vld [vmem:[#allocation83_spill] sm:$0xff] }
 0x20c   : > { %2483 = vmatpush.msra.mxu1 %v5901_v22  ;;  %2077 = vmatpush.msrb.mxu0 %v6644_v15  ;;  %v6724_v22 = vand.u32 4294901760, %v6398_v41  ;;  %v6766_v31 = vand.u32 4294901760, %v8100_v56 }
 0x20d   : > { %1993 = vmatpush.msrb.mxu3 %v6682_v0  ;;  %1795 = vmatmul.f32.gmra.mxu1 %v6262_v54 }
 0x20e   : > { %1545 = vmatmul.f32.gmra.mxu2 %v6284_v63  ;;  %2489 = vmatpush.msra.mxu1 %v5921_v49  ;;  %v8094_v63 = vand.u32 4294901760, %v6365_v42  ;;  %v8095_v49 = vld [vmem:[#allocation38_spill] sm:$0xff] }
 0x20f   : > { %1999 = vmatpush.msrb.mxu3 %v6687_v2  ;;  %1726 = vmatmul.f32.gmra.mxu0 %v6273_v24  ;;  %v6746_v24 = vand.u32 4294901760, %v6321_v62 }
 0x210   : > { %1629 = vmatmul.f32.gmra.mxu3 %v8093_v51  ;;  %1838 = vmatpush.msrb.mxu2 %v6629_v33  ;;  %v8101_v51 = vld [vmem:[#allocation61_spill] sm:$0xff] }
 0x211   : > { %2301 = vmatpush.msra.mxu3 %v6424_v32  ;;  %2080 = vmatpush.msrb.mxu0 %v6647_v50 }
 0x212   : > { %2495 = vmatpush.msra.mxu1 %v5926_v25  ;;  %2206 = vmatpush.msra.mxu2 %v6440_v48  ;;  %v8096_v25 = vand.u32 4294901760, %v6402_v7 }
 0x213   : > { %2303 = vmatpush.msra.mxu3 %v6432_v8  ;;  %2382 = vmatpush.msra.mxu0 %v5819_v59 }
 0x214   : > { %2501 = vmatpush.msra.mxu1 %v5947_v39  ;;  %2210 = vmatpush.msra.mxu2 %v6457_v26  ;;  %v1840_v39 = vsub.f32 %v6398_v41, %v6724_v22  ;;  %v8111_v41 = vld [vmem:[#allocation68_spill] sm:$0xff]  ;;  %v8162_v26 = vld [vmem:[#allocation63_spill] sm:$0xff] }
 0x215   : > { %1799 = vmatmul.f32.gmra.mxu1 %v6337_v18  ;;  %2305 = vmatpush.msra.mxu3 %v6434_v58 }
 0x216   : > { %1550 = vmatmul.f32.gmra.mxu2 %v6302_v28  ;;  %2507 = vmatpush.msra.mxu1 %v5987_v14  ;;  %v8097_v14 = vld [vmem:[#allocation39_spill] sm:$0xff]  ;;  %v1841_v28 = vand.u32 4294901760, %v1840_v39 }
 0x217   : > { %1730 = vmatmul.f32.gmra.mxu0 %v6262_v54  ;;  %2307 = vmatpush.msra.mxu3 %v6436_v27  ;;  %v8099_v54 = vld [vmem:[#allocation48_spill] sm:$0xff] }
 0x218   : > { %1635 = vmatmul.f32.gmra.mxu3 %v8094_v63  ;;  %2384 = vmatpush.msra.mxu0 %v5834_v37  ;;  %v8102_v63 = vld [vmem:[#allocation108_spill] sm:$0xff] }
 0x219   : > { %2309 = vmatpush.msra.mxu3 %v6475_v3  ;;  %2214 = vmatpush.msra.mxu2 %v6463_v1  ;;  %v8158_v1 = vld [vmem:[#allocation62_spill] sm:$0xff] }
 0x21a   : > { %2513 = vmatpush.msra.mxu1 %v8095_v49  ;;  %2386 = vmatpush.msra.mxu0 %v5840_v20  ;;  %v8103_v49 = vld [vmem:[#allocation33_spill] sm:$0xff] }
 0x21b   : > { %2311 = vmatpush.msra.mxu3 %v6491_v53  ;;  %2218 = vmatpush.msra.mxu2 %v6466_v4 }
 0x21c   : > { %2519 = vmatpush.msra.mxu1 %v8097_v14  ;;  %2388 = vmatpush.msra.mxu0 %v5860_v57  ;;  %v1856_v14 = vsub.f32 %v8100_v56, %v6766_v31  ;;  %v8112_v56 = vld [vmem:[#allocation117_spill] sm:$0xff] }
 0x21d   : > { %1803 = vmatmul.f32.gmra.mxu1 %v6384_v30  ;;  %2313 = vmatpush.msra.mxu3 %v6496_v11 }
 0x21e   : > { %1555 = vmatmul.f32.gmra.mxu2 %v6365_v42  ;;  %2525 = vmatpush.msra.mxu1 %v8098_v23  ;;  %v1842_v42 = vsub.f32 %v1840_v39, %v1841_v28 }
 0x21f   : > { %1734 = vmatmul.f32.gmra.mxu0 %v6337_v18  ;;  %2315 = vmatpush.msra.mxu3 %v6499_v34  ;;  %v1848_v18 = vsub.f32 %v6321_v62, %v6746_v24 }
 0x220   : > { %1641 = vmatmul.f32.gmra.mxu3 %v8096_v25  ;;  %2222 = vmatpush.msra.mxu2 %v6505_v5  ;;  %v8105_v25 = vld [vmem:[#allocation64_spill] sm:$0xff]  ;;  %v8144_v5 = vld [vmem:[#allocation75_spill] sm:$0xff] }
 0x221   : > { %2317 = vmatpush.msra.mxu3 %v6540_v40  ;;  %2390 = vmatpush.msra.mxu0 %v5885_v60  ;;  %v2365_v4 = vmul.f32 %v8144_v5, %v8144_v5 }
 0x222   : > { %2226 = vmatpush.msra.mxu2 %v6523_v47  ;;  %2531 = vmatpush.msra.mxu1 %v8099_v54  ;;  %v8107_v54 = vld [vmem:[#allocation66_spill] sm:$0xff] }
 0x223   : > { %2392 = vmatpush.msra.mxu0 %v5930_v17  ;;  %2319 = vmatpush.msra.mxu3 %v6556_v9  ;;  %v6898_v5 = vand.u32 4294901760, %v2365_v4 }
 0x224   : > { %2537 = vmatpush.msra.mxu1 %v6108_v16  ;;  %2230 = vmatpush.msra.mxu2 %v6528_v6  ;;  %v8104_v16 = vld [vmem:[#allocation114_spill] sm:$0xff] }
 0x225   : > { %2157 = vmatmul.f32.vlgmr.msrb.gmra.mxu1 %v1841_v28  ;;  %2321 = vmatpush.msra.mxu3 %v6562_v38  ;;  %v8106_v28 = vld [vmem:[#allocation34_spill] sm:$0xff] }
 0x226   : > { %1560 = vmatmul.f32.gmra.mxu2 %v6402_v7  ;;  %2394 = vmatpush.msra.mxu0 %v5932_v43  ;;  %v1849_v7 = vand.u32 4294901760, %v1848_v18  ;;  %v8119_v6 = vld [vmem:[#allocation46_spill] sm:$0xff] }
 0x227   : > { %1738 = vmatmul.f32.gmra.mxu0 %v6384_v30  ;;  %2543 = vmatpush.msra.mxu1 %v8101_v51  ;;  %v1843_v30 = vand.u32 4294901760, %v1842_v42  ;;  %v8108_v42 = vld [vmem:[#allocation116_spill] sm:$0xff]  ;;  %v8109_v51 = vld [vmem:[#allocation43_spill] sm:$0xff] }
 0x228   : > { %2001 = vmatmul.f32.vlgmr.msrb.gmra.mxu3 %v6724_v22  ;;  %2234 = vmatpush.msra.mxu2 %v8102_v63  ;;  %v1850_v23 = vsub.f32 %v1848_v18, %v1849_v7  ;;  %v8116_v63 = vld [vmem:[#allocation45_spill] sm:$0xff] }
 0x229   : > { %2323 = vmatpush.msra.mxu3 %v6564_v44  ;;  %2396 = vmatpush.msra.mxu0 %v8103_v49 }
 0x22a   : > { %2238 = vmatpush.msra.mxu2 %v8104_v16  ;;  %2549 = vmatpush.msra.mxu1 %v8105_v25  ;;  %v8110_v25 = vld [vmem:[#allocation86_spill] sm:$0xff] }
 0x22b   : > { %2398 = vmatpush.msra.mxu0 %v8106_v28  ;;  %2325 = vmatpush.msra.mxu3 %v6605_v46  ;;  %v6784_v62 = vand.u32 4294901760, %v8110_v25 }
 0x22c   : > { %2555 = vmatpush.msra.mxu1 %v8107_v54  ;;  %2242 = vmatpush.msra.mxu2 %v8108_v42  ;;  %v8114_v54 = vld [vmem:[#allocation118_spill] sm:$0xff] }
 0x22d   : > { %2163 = vmatmul.f32.gmra.mxu1 %v1849_v7  ;;  %2327 = vmatpush.msra.mxu3 %v6621_v55  ;;  %v8113_v7 = vld [vmem:[#allocation44_spill] sm:$0xff]  ;;  %v8115_v42 = vld [vmem:[#allocation70_spill] sm:$0xff]  ;;  %v1864_v16 = vsub.f32 %v8110_v25, %v6784_v62 }
 0x22e   : > { %1844 = vmatmul.f32.vlgmr.msrb.gmra.mxu2 %v1843_v30  ;;  %2400 = vmatpush.msra.mxu0 %v8109_v51  ;;  %v1857_v30 = vand.u32 4294901760, %v1856_v14 }
 0x22f   : > { %2083 = vmatmul.f32.vlgmr.msrb.gmra.mxu0 %v1840_v39  ;;  %2561 = vmatpush.msra.mxu1 %v8111_v41  ;;  %v1851_v39 = vand.u32 4294901760, %v1850_v23  ;;  %v8117_v23 = vld [vmem:[#allocation71_spill] sm:$0xff] }
 0x230   : > { %2005 = vmatmul.f32.gmra.mxu3 %v6746_v24  ;;  %2246 = vmatpush.msra.mxu2 %v8112_v56  ;;  %v1858_v41 = vsub.f32 %v1856_v14, %v1857_v30  ;;  %v8118_v56 = vld [vmem:[#allocation122_spill] sm:$0xff] }
 0x231   : > { %2329 = vmatpush.msra.mxu3 %v6627_v12  ;;  %2402 = vmatpush.msra.mxu0 %v8113_v7 }
 0x232   : > { %2250 = vmatpush.msra.mxu2 %v8114_v54  ;;  %2567 = vmatpush.msra.mxu1 %v8115_v42  ;;  %v1865_v42 = vand.u32 4294901760, %v1864_v16 }
 0x233   : > { %2404 = vmatpush.msra.mxu0 %v8116_v63  ;;  %2331 = vmatpush.msra.mxu3 %v6629_v33 }
 0x234   : > { %2573 = vmatpush.msra.mxu1 %v8117_v23  ;;  %2254 = vmatpush.msra.mxu2 %v8118_v56  ;;  %v8122_v23 = vld [vmem:[#allocation57_spill] sm:$0xff]  ;;  %v8125_v56 = vld [vmem:[#allocation78_spill] sm:$0xff] }
 0x235   : > { %2169 = vmatmul.f32.gmra.mxu1 %v1857_v30  ;;  %2406 = vmatpush.msra.mxu0 %v8119_v6  ;;  %v8121_v30 = vld [vmem:[#allocation56_spill] sm:$0xff]  ;;  %v6822_v47 = vand.u32 4294901760, %v8125_v56 }
 0x236   : > { %1852 = vmatmul.f32.gmra.mxu2 %v1851_v39  ;;  %2697 = vmatpush.msrb.mxu3 %v5819_v59  ;;  %v8120_v39 = vld [vmem:[#allocation81_spill] sm:$0xff] }
 0x237   : > { %2088 = vmatmul.f32.gmra.mxu0 %v1848_v18  ;;  %v6802_v54 = vand.u32 4294901760, %v8120_v39  ;;  %2258 = vmatpush.msra.mxu2 %v6653_v36  ;;  %v1859_v18 = vand.u32 4294901760, %v1858_v41  ;;  %v8123_v41 = vld [vmem:[#allocation65_spill] sm:$0xff] }
 0x238   : > { %2009 = vmatmul.f32.gmra.mxu3 %v6766_v31  ;;  %2875 = vmatpush.msrb.mxu1 %v5819_v59  ;;  %v1866_v59 = vsub.f32 %v1864_v16, %v1865_v42 }
 0x239   : > { %2408 = vmatpush.msra.mxu0 %v8121_v30  ;;  %2699 = vmatpush.msrb.mxu3 %v5834_v37  ;;  %v1872_v25 = vsub.f32 %v8120_v39, %v6802_v54  ;;  %v8131_v39 = vld [vmem:[#allocation77_spill] sm:$0xff] }
 0x23a   : > { %2262 = vmatpush.msra.mxu2 %v6659_v10  ;;  %2877 = vmatpush.msrb.mxu1 %v5834_v37  ;;  %v8127_v37 = vld [vmem:[#allocation23_spill] sm:$0xff] }
 0x23b   : > { %2410 = vmatpush.msra.mxu0 %v8122_v23  ;;  %2701 = vmatpush.msrb.mxu3 %v5840_v20  ;;  %v1873_v10 = vand.u32 4294901760, %v1872_v25 }
 0x23c   : > { %2266 = vmatpush.msra.mxu2 %v6662_v35  ;;  %2879 = vmatpush.msrb.mxu1 %v5840_v20  ;;  %v1880_v20 = vsub.f32 %v8125_v56, %v6822_v47  ;;  %v6842_v56 = vand.u32 4294901760, %v8131_v39  ;;  %v8137_v35 = vld [vmem:[#allocation35_spill] sm:$0xff] }
 0x23d   : > { %2175 = vmatmul.f32.gmra.mxu1 %v1865_v42  ;;  %2412 = vmatpush.msra.mxu0 %v8123_v41  ;;  %v1867_v42 = vand.u32 4294901760, %v1866_v59 }
 0x23e   : > { %1860 = vmatmul.f32.gmra.mxu2 %v1859_v18  ;;  %v8124_v18 = vld [vmem:[#allocation21_spill] sm:$0xff]  ;;  %2703 = vmatpush.msrb.mxu3 %v5860_v57 }
 0x23f   : > { %2093 = vmatmul.f32.gmra.mxu0 %v1856_v14  ;;  %2609 = vmatpush.msrb.mxu2 %v8124_v18  ;;  %v8126_v14 = vld [vmem:[#allocation22_spill] sm:$0xff]  ;;  %v8128_v18 = vld [vmem:[#allocation25_spill] sm:$0xff] }
 0x240   : > { %2013 = vmatmul.f32.gmra.mxu3 %v6784_v62  ;;  %2780 = vmatpush.msrb.mxu0 %v8126_v14  ;;  %v1874_v14 = vsub.f32 %v1872_v25, %v1873_v10 }
 0x241   : > { %2881 = vmatpush.msrb.mxu1 %v5860_v57  ;;  %2612 = vmatpush.msrb.mxu2 %v8127_v37  ;;  %v8129_v57 = vld [vmem:[#allocation24_spill] sm:$0xff] }
 0x242   : > { %v6817_v36 = vpop.f32.mrf.mxu1  ;;  %2705 = vmatpush.msrb.mxu3 %v5885_v60  ;;  %2784 = vmatpush.msrb.mxu0 %v8128_v18 }
 0x243   : > { %2883 = vmatpush.msrb.mxu1 %v5885_v60  ;;  %2615 = vmatpush.msrb.mxu2 %v8129_v57  ;;  %v8130_v60 = vld [vmem:[#allocation26_spill] sm:$0xff]  ;;  %v8134_v57 = vld [vmem:[#allocation29_spill] sm:$0xff] }
 0x244   : > { %2707 = vmatpush.msrb.mxu3 %v5930_v17  ;;  %2788 = vmatpush.msrb.mxu0 %v8130_v60  ;;  %v8135_v60 = vld [vmem:[#allocation30_spill] sm:$0xff] }
 0x245   : > { %2181 = vmatmul.f32.gmra.mxu1 %v1873_v10  ;;  %v8132_v10 = vld [vmem:[#allocation27_spill] sm:$0xff] }
 0x246   : > { %1868 = vmatmul.f32.gmra.mxu2 %v1867_v42  ;;  %2885 = vmatpush.msrb.mxu1 %v5930_v17  ;;  %v1881_v42 = vand.u32 4294901760, %v1880_v20  ;;  %v8133_v17 = vld [vmem:[#allocation28_spill] sm:$0xff] }
 0x247   : > { %2098 = vmatmul.f32.gmra.mxu0 %v1864_v16  ;;  %2709 = vmatpush.msrb.mxu3 %v5932_v43  ;;  %v1875_v16 = vand.u32 4294901760, %v1874_v14 }
 0x248   : > { %2017 = vmatmul.f32.gmra.mxu3 %v6802_v54  ;;  %v1460_v59 = vpop.f32.mrf.mxu3  ;;  %2887 = vmatpush.msrb.mxu1 %v5932_v43  ;;  %v1888_v43 = vsub.f32 %v8131_v39, %v6842_v56  ;;  %v1882_v14 = vsub.f32 %v1880_v20, %v1881_v42 }
 0x249   : > { %2618 = vmatpush.msrb.mxu2 %v8132_v10  ;;  %2711 = vmatpush.msrb.mxu3 %v8103_v49 }
 0x24a   : > { %v6837_v37 = vpop.f32.mrf.mxu1  ;;  %2792 = vmatpush.msrb.mxu0 %v8133_v17  ;;  %2889 = vmatpush.msrb.mxu1 %v8103_v49  ;;  %v8136_v17 = vld [vmem:[#allocation31_spill] sm:$0xff]  ;;  %v1889_v39 = vand.u32 4294901760, %v1888_v43 }
 0x24b   : > { %2621 = vmatpush.msrb.mxu2 %v8134_v57  ;;  %2713 = vmatpush.msrb.mxu3 %v8106_v28 }
 0x24c   : > { %v6848_v18 = vpop.f32.mrf.mxu0  ;;  %2796 = vmatpush.msrb.mxu0 %v8135_v60  ;;  %2891 = vmatpush.msrb.mxu1 %v8106_v28  ;;  %v8138_v60 = vld [vmem:[#allocation76_spill] sm:$0xff]  ;;  %v1883_v28 = vand.u32 4294901760, %v1882_v14  ;;  %v1890_v14 = vsub.f32 %v1888_v43, %v1889_v39 }
 0x24d   : > { %2187 = vmatmul.f32.gmra.mxu1 %v1881_v42  ;;  %2624 = vmatpush.msrb.mxu2 %v8136_v17  ;;  %v8139_v42 = vld [vmem:[#allocation32_spill] sm:$0xff]  ;;  %v8141_v17 = vld [vmem:[#allocation37_spill] sm:$0xff] }
 0x24e   : > { %1876 = vmatmul.f32.gmra.mxu2 %v1875_v16  ;;  %2715 = vmatpush.msrb.mxu3 %v8109_v51 }
 0x24f   : > { %2103 = vmatmul.f32.gmra.mxu0 %v1872_v25  ;;  %v6866_v25 = vand.u32 4294901760, %v8138_v60  ;;  %2893 = vmatpush.msrb.mxu1 %v8109_v51  ;;  %v8142_v51 = vld [vmem:[#allocation40_spill] sm:$0xff] }
 0x250   : > { %2021 = vmatmul.f32.gmra.mxu3 %v6822_v47  ;;  %2800 = vmatpush.msrb.mxu0 %v8137_v35 }
 0x251   : > { %v1319_v10 = vpop.f32.mrf.mxu2  ;;  %v1464_v16 = vpop.f32.mrf.mxu3  ;;  %2627 = vmatpush.msrb.mxu2 %v8139_v42  ;;  %2717 = vmatpush.msrb.mxu3 %v8113_v7  ;;  %v1896_v35 = vsub.f32 %v8138_v60, %v6866_v25  ;;  %v8152_v60 = vld [vmem:[#allocation80_spill] sm:$0xff] }
 0x252   : > { %v6859_v57 = vadd.f32 %v1460_v59, %v1319_v10  ;;  %v6861_v49 = vpop.f32.mrf.mxu1  ;;  %v8140_v59 = vld [vmem:[#allocation36_spill] sm:$0xff]  ;;  %2895 = vmatpush.msrb.mxu1 %v8113_v7 }
 0x253   : > { %2804 = vmatpush.msrb.mxu0 %v8140_v59  ;;  %2630 = vmatpush.msrb.mxu2 %v8141_v17  ;;  %v8143_v59 = vld [vmem:[#allocation41_spill] sm:$0xff] }
 0x254   : > { %v6872_v10 = vpop.f32.mrf.mxu0  ;;  %2719 = vmatpush.msrb.mxu3 %v8116_v63  ;;  %2897 = vmatpush.msrb.mxu1 %v8116_v63  ;;  %v1891_v63 = vand.u32 4294901760, %v1890_v14 }
 0x255   : > { %2193 = vmatmul.f32.gmra.mxu1 %v1889_v39  ;;  %2808 = vmatpush.msrb.mxu0 %v8142_v51  ;;  %v8145_v51 = vld [vmem:[#allocation42_spill] sm:$0xff]  ;;  %v1897_v39 = vand.u32 4294901760, %v1896_v35 }
 0x256   : > { %1884 = vmatmul.f32.gmra.mxu2 %v1883_v28  ;;  %2721 = vmatpush.msrb.mxu3 %v8119_v6 }
 0x257   : > { %2108 = vmatmul.f32.gmra.mxu0 %v1880_v20  ;;  %2633 = vmatpush.msrb.mxu2 %v8143_v59  ;;  %v8146_v20 = vld [vmem:[#allocation49_spill] sm:$0xff]  ;;  %v8148_v59 = vld [vmem:[#allocation50_spill] sm:$0xff]  ;;  %v1898_v14 = vsub.f32 %v1896_v35, %v1897_v39 }
 0x258   : > { %2025 = vmatmul.f32.gmra.mxu3 %v6842_v56  ;;  %2812 = vmatpush.msrb.mxu0 %v8145_v51 }
 0x259   : > { %v1327_v42 = vpop.f32.mrf.mxu2  ;;  %v1468_v28 = vpop.f32.mrf.mxu3  ;;  %2899 = vmatpush.msrb.mxu1 %v8119_v6  ;;  %2636 = vmatpush.msrb.mxu2 %v8146_v20  ;;  %v8149_v6 = vld [vmem:[#allocation53_spill] sm:$0xff]  ;;  %v8150_v20 = vld [vmem:[#allocation51_spill] sm:$0xff] }
 0x25a   : > { %v6883_v17 = vadd.f32 %v1464_v16, %v1327_v42  ;;  %v6885_v7 = vpop.f32.mrf.mxu1  ;;  %2723 = vmatpush.msrb.mxu3 %v8121_v30  ;;  %v8147_v16 = vld [vmem:[#allocation52_spill] sm:$0xff] }
 0x25b   : > { %2816 = vmatpush.msrb.mxu0 %v8147_v16  ;;  %2639 = vmatpush.msrb.mxu2 %v8148_v59 }
 0x25c   : > { %v6895_v42 = vpop.f32.mrf.mxu0  ;;  %2901 = vmatpush.msrb.mxu1 %v8121_v30  ;;  %2725 = vmatpush.msrb.mxu3 %v8122_v23  ;;  %v6911_v30 = vsub.f32 %v2365_v4, %v6898_v5  ;;  %v8156_v4 = vld [vmem:[#allocation59_spill] sm:$0xff] }
 0x25d   : > { %2199 = vmatmul.f32.gmra.mxu1 %v1897_v39  ;;  %2820 = vmatpush.msrb.mxu0 %v8149_v6  ;;  %v2367_v6 = vmul.f32 %v8152_v60, %v8152_v60  ;;  %v1899_v39 = vand.u32 4294901760, %v1898_v14  ;;  %v8160_v14 = vld [vmem:[#allocation97_spill] sm:$0xff] }
 0x25e   : > { %1892 = vmatmul.f32.gmra.mxu2 %v1891_v63  ;;  %2903 = vmatpush.msrb.mxu1 %v8122_v23  ;;  %8151 = vst [vmem:[#allocation38_spill] sm:$0xff] %v6911_v30  ;;  %v8154_v23 = vld [vmem:[#allocation55_spill] sm:$0xff] }
 0x25f   : > { %2113 = vmatmul.f32.gmra.mxu0 %v1888_v43  ;;  %2642 = vmatpush.msrb.mxu2 %v8150_v20  ;;  %v8153_v43 = vld [vmem:[#allocation54_spill] sm:$0xff]  ;;  %v6925_v60 = vand.u32 4294901760, %v2367_v6 }
 0x260   : > { %2029 = vmatmul.f32.gmra.mxu3 %v6866_v25  ;;  %2824 = vmatpush.msrb.mxu0 %v8153_v43 }
 0x261   : > { %v1335_v51 = vpop.f32.mrf.mxu2  ;;  %v1472_v63 = vpop.f32.mrf.mxu3  ;;  %2727 = vmatpush.msrb.mxu3 %v8123_v41  ;;  %2905 = vmatpush.msrb.mxu1 %v8123_v41  ;;  %8157 = vst [vmem:[#allocation39_spill] sm:$0xff] %v6925_v60  ;;  %v8159_v41 = vld [vmem:[#allocation60_spill] sm:$0xff] }
 0x262   : > { %v6906_v16 = vadd.f32 %v1468_v28, %v1335_v51  ;;  %v6908_v59 = vpop.f32.mrf.mxu1  ;;  %2645 = vmatpush.msrb.mxu2 %v8154_v23  ;;  %v8155_v28 = vld [vmem:[#allocation58_spill] sm:$0xff] }
 0x263   : > { %2828 = vmatpush.msrb.mxu0 %v8155_v28  ;;  %v8161_v23 = vld [vmem:[#allocation82_spill] sm:$0xff] }
 0x264   : > { %v6920_v51 = vpop.f32.mrf.mxu0  ;;  %2648 = vmatpush.msrb.mxu2 %v8156_v4  ;;  %v2369_v28 = vmul.f32 %v8161_v23, %v8161_v23  ;;  %v8167_v23 = vld [vmem:[#allocation69_spill] sm:$0xff] }
 0x265   : > { %2575 = vmatmul.f32.vlgmr.msra.gmra.mxu1 %v6898_v5  ;;  %2832 = vmatpush.msrb.mxu0 %v8158_v1  ;;  %v8165_v1 = vand.u32 4294901760, %v6911_v30 }
 0x266   : > { %1900 = vmatmul.f32.gmra.mxu2 %v1899_v39  ;;  %v8163_v39 = vld [vmem:[#allocation67_spill] sm:$0xff]  ;;  %3255 = vmatpush.msra.mxu1 %v6424_v32 }
 0x267   : > { %2651 = vmatpush.msrb.mxu2 %v8159_v41  ;;  %2118 = vmatmul.f32.gmra.mxu0 %v1896_v35  ;;  %v2416_v41 = vsub.f32 %v6911_v30, %v8165_v1  ;;  %v6943_v35 = vsub.f32 %v2367_v6, %v6925_v60  ;;  %v6953_v6 = vand.u32 4294901760, %v2369_v28  ;;  %v8169_v1 = vld [vmem:[#allocation101_spill] sm:$0xff] }
 0x268   : > { %2333 = vmatmul.f32.vlgmr.msra.gmra.mxu3 %v6724_v22  ;;  %2836 = vmatpush.msrb.mxu0 %v8162_v26  ;;  %v8168_v26 = vld [vmem:[#allocation100_spill] sm:$0xff] }
 0x269   : > { %3041 = vmatpush.msra.mxu3 %v8160_v14  ;;  %v1343_v43 = vpop.f32.mrf.mxu2  ;;  %2654 = vmatpush.msrb.mxu2 %v8163_v39  ;;  %v1600_v20 = vpop.f32.mrf.mxu3  ;;  %v8166_v14 = vld [vmem:[#allocation98_spill] sm:$0xff] }
 0x26a   : > { %v6935_v4 = vadd.f32 %v1472_v63, %v1343_v43  ;;  %v6937_v48 = vpop.f32.mrf.mxu1  ;;  %2840 = vmatpush.msrb.mxu0 %v8167_v23  ;;  %3257 = vmatpush.msra.mxu1 %v6432_v8  ;;  %v2417_v43 = vand.u32 4294901760, %v2416_v41  ;;  %v1445_v23 = vadd.f32 %v6817_v36, %v6848_v18  ;;  %v8171_v41 = vld [vmem:[#allocation89_spill] sm:$0xff]  ;;  %v6971_v36 = vsub.f32 %v2369_v28, %v6953_v6 }
 0x26b   : > { %3047 = vmatpush.msra.mxu3 %v8166_v14  ;;  %v8173_v18 = vld [vmem:[#allocation109_spill] sm:$0xff] }
 0x26c   : > { %8164 = vst [vmem:[#allocation47_spill] sm:$0xff] %v6935_v4  ;;  %v1711_v63 = vpop.f32.mrf.mxu0  ;;  %3259 = vmatpush.msra.mxu1 %v6434_v58 }
 0x26d   : > { %3053 = vmatpush.msra.mxu3 %v8168_v26  ;;  %2579 = vmatmul.f32.gmra.mxu1 %v6925_v60  ;;  %v8170_v26 = vld [vmem:[#allocation85_spill] sm:$0xff] }
 0x26e   : > { %2268 = vmatmul.f32.vlgmr.msra.gmra.mxu2 %v6724_v22  ;;  %v2371_v22 = vmul.f32 %v8170_v26, %v8170_v26  ;;  %3261 = vmatpush.msra.mxu1 %v6436_v27 }
 0x26f   : > { %2940 = vmatpush.msra.mxu2 %v6424_v32  ;;  %2418 = vmatmul.f32.vlgmr.msra.gmra.mxu0 %v2417_v43  ;;  %v8172_v32 = vand.u32 4294901760, %v6943_v35  ;;  %v8174_v43 = vld [vmem:[#allocation91_spill] sm:$0xff] }
 0x270   : > { %2337 = vmatmul.f32.gmra.mxu3 %v6746_v24  ;;  %3167 = vmatpush.msra.mxu0 %v8171_v41 }
 0x271   : > { %3059 = vmatpush.msra.mxu3 %v8169_v1  ;;  %v1526_v14 = vpop.f32.mrf.mxu2  ;;  %v1606_v60 = vpop.f32.mrf.mxu3  ;;  %v2424_v30 = vsub.f32 %v6943_v35, %v8172_v32  ;;  %2942 = vmatpush.msra.mxu2 %v6432_v8  ;;  %v8176_v32 = vld [vmem:[#allocation92_spill] sm:$0xff] }
 0x272   : > { %v1527_v39 = vadd.f32 %v1526_v14, %v1445_v23  ;;  %v6965_v4 = vpop.f32.mrf.mxu1  ;;  %3263 = vmatpush.msra.mxu1 %v6475_v3  ;;  %3170 = vmatpush.msra.mxu0 %v8174_v43  ;;  %v8175_v23 = vld [vmem:[#allocation110_spill] sm:$0xff]  ;;  %v8178_v43 = vld [vmem:[#allocation79_spill] sm:$0xff] }
 0x273   : > { %3065 = vmatpush.msra.mxu3 %v8173_v18  ;;  %2944 = vmatpush.msra.mxu2 %v6434_v58  ;;  %v2425_v28 = vand.u32 4294901760, %v2424_v30  ;;  %v6983_v18 = vand.u32 4294901760, %v2371_v22 }
 0x274   : > { %v1601_v1 = vadd.f32 %v1600_v20, %v1527_v39  ;;  %v1715_v14 = vpop.f32.mrf.mxu0  ;;  %3173 = vmatpush.msra.mxu0 %v8176_v32  ;;  %3265 = vmatpush.msra.mxu1 %v6491_v53  ;;  %v1449_v20 = vadd.f32 %v6837_v37, %v6872_v10  ;;  %v8180_v37 = vand.u32 4294901760, %v6971_v36 }
 0x275   : > { %3071 = vmatpush.msra.mxu3 %v8175_v23  ;;  %2583 = vmatmul.f32.gmra.mxu1 %v6953_v6  ;;  %v2373_v23 = vmul.f32 %v8178_v43, %v8178_v43 }
 0x276   : > { %2272 = vmatmul.f32.gmra.mxu2 %v6746_v24  ;;  %v1712_v26 = vadd.f32 %v1711_v63, %v1601_v1  ;;  %v8177_v24 = vld [vmem:[#allocation112_spill] sm:$0xff]  ;;  %3267 = vmatpush.msra.mxu1 %v6496_v11  ;;  %v8179_v63 = vld [vmem:[#allocation93_spill] sm:$0xff]  ;;  %v2432_v10 = vsub.f32 %v6971_v36, %v8180_v37 }
 0x277   : > { %2946 = vmatpush.msra.mxu2 %v6436_v27  ;;  %2426 = vmatmul.f32.gmra.mxu0 %v2425_v28  ;;  %v8182_v28 = vld [vmem:[#allocation99_spill] sm:$0xff] }
 0x278   : > { %2341 = vmatmul.f32.gmra.mxu3 %v6766_v31  ;;  %v6991_v39 = vadd.f32 %v6908_v59, %v1712_v26  ;;  %3176 = vmatpush.msra.mxu0 %v8179_v63  ;;  %v7004_v59 = vsub.f32 %v2371_v22, %v6983_v18  ;;  %v8181_v26 = vld [vmem:[#allocation113_spill] sm:$0xff]  ;;  %v8184_v63 = vld [vmem:[#allocation103_spill] sm:$0xff]  ;;  %v2433_v22 = vand.u32 4294901760, %v2432_v10 }
 0x279   : > { %3077 = vmatpush.msra.mxu3 %v8177_v24  ;;  %v1531_v30 = vpop.f32.mrf.mxu2  ;;  %v1612_v32 = vpop.f32.mrf.mxu3  ;;  %2948 = vmatpush.msra.mxu2 %v6475_v3 }
 0x27a   : > { %v1532_v1 = vadd.f32 %v1531_v30, %v1449_v20  ;;  %v6998_v41 = vpop.f32.mrf.mxu1  ;;  %3269 = vmatpush.msra.mxu1 %v6499_v34  ;;  %3179 = vmatpush.msra.mxu0 %v8182_v28  ;;  %v8183_v20 = vld [vmem:[#allocation119_spill] sm:$0xff]  ;;  %v8186_v28 = vld [vmem:[#allocation74_spill] sm:$0xff] }
 0x27b   : > { %3083 = vmatpush.msra.mxu3 %v8181_v26  ;;  %2950 = vmatpush.msra.mxu2 %v6491_v53  ;;  %v7016_v26 = vand.u32 4294901760, %v2373_v23 }
 0x27c   : > { %v1607_v24 = vadd.f32 %v1606_v60, %v1532_v1  ;;  %v1719_v30 = vpop.f32.mrf.mxu0  ;;  %3182 = vmatpush.msra.mxu0 %v8184_v63  ;;  %3271 = vmatpush.msra.mxu1 %v6540_v40  ;;  %v1453_v60 = vadd.f32 %v6861_v49, %v6895_v42  ;;  %v8188_v49 = vand.u32 4294901760, %v7004_v59 }
 0x27d   : > { %3089 = vmatpush.msra.mxu3 %v8183_v20  ;;  %2587 = vmatmul.f32.gmra.mxu1 %v6983_v18  ;;  %v2375_v20 = vmul.f32 %v8186_v28, %v8186_v28 }
 0x27e   : > { %2276 = vmatmul.f32.gmra.mxu2 %v6766_v31  ;;  %v1716_v43 = vadd.f32 %v1715_v14, %v1607_v24  ;;  %v8185_v31 = vld [vmem:[#allocation120_spill] sm:$0xff]  ;;  %3273 = vmatpush.msra.mxu1 %v6556_v9  ;;  %v2440_v42 = vsub.f32 %v7004_v59, %v8188_v49 }
 0x27f   : > { %2952 = vmatpush.msra.mxu2 %v6496_v11  ;;  %2434 = vmatmul.f32.gmra.mxu0 %v2433_v22  ;;  %v8187_v14 = vld [vmem:[#allocation104_spill] sm:$0xff]  ;;  %v8190_v22 = vld [vmem:[#allocation105_spill] sm:$0xff]  ;;  %v7049_v49 = vand.u32 4294901760, %v2375_v20 }
 0x280   : > { %2345 = vmatmul.f32.gmra.mxu3 %v6784_v62  ;;  %v7024_v1 = vadd.f32 %v6937_v48, %v1716_v43  ;;  %3185 = vmatpush.msra.mxu0 %v8187_v14  ;;  %v7037_v48 = vsub.f32 %v2373_v23, %v7016_v26  ;;  %v8189_v43 = vld [vmem:[#allocation121_spill] sm:$0xff]  ;;  %v2441_v23 = vand.u32 4294901760, %v2440_v42 }
 0x281   : > { %3095 = vmatpush.msra.mxu3 %v8185_v31  ;;  %v1536_v10 = vpop.f32.mrf.mxu2  ;;  %v1618_v63 = vpop.f32.mrf.mxu3  ;;  %2954 = vmatpush.msra.mxu2 %v6499_v34 }
 0x282   : > { %v1537_v24 = vadd.f32 %v1536_v10, %v1453_v60  ;;  %v7031_v37 = vpop.f32.mrf.mxu1  ;;  %3275 = vmatpush.msra.mxu1 %v6562_v38  ;;  %3188 = vmatpush.msra.mxu0 %v8190_v22  ;;  %v8191_v10 = vld [vmem:[#allocation111_spill] sm:$0xff]  ;;  %v2447_v14 = vand.u32 4294901760, %v7037_v48 }
 0x283   : > { %3101 = vmatpush.msra.mxu3 %v8189_v43  ;;  %2956 = vmatpush.msra.mxu2 %v6540_v40 }
 0x284   : > { %v1613_v31 = vadd.f32 %v1612_v32, %v1537_v24  ;;  %v1723_v60 = vpop.f32.mrf.mxu0  ;;  %3191 = vmatpush.msra.mxu0 %v8191_v10  ;;  %3277 = vmatpush.msra.mxu1 %v6564_v44  ;;  %v8192_v24 = vld [vmem:[#allocation73_spill] sm:$0xff] }
 0x285   : > { %3107 = vmatpush.msra.mxu3 %v6632_v45  ;;  %2591 = vmatmul.f32.gmra.mxu1 %v7016_v26  ;;  %v1457_v45 = vadd.f32 %v6885_v7, %v6920_v51  ;;  %v2377_v42 = vmul.f32 %v8192_v24, %v8192_v24  ;;  %v2448_v7 = vsub.f32 %v7037_v48, %v2447_v14 }
 0x286   : > { %2280 = vmatmul.f32.gmra.mxu2 %v6784_v62  ;;  %v1720_v43 = vadd.f32 %v1719_v30, %v1613_v31  ;;  %3279 = vmatpush.msra.mxu1 %v6605_v46  ;;  %v8193_v30 = vld [vmem:[#allocation115_spill] sm:$0xff]  ;;  %v7070_v51 = vsub.f32 %v2375_v20, %v7049_v49 }
 0x287   : > { %2958 = vmatpush.msra.mxu2 %v6556_v9  ;;  %2442 = vmatmul.f32.gmra.mxu0 %v2441_v23  ;;  %v2449_v20 = vand.u32 4294901760, %v2448_v7  ;;  %v7082_v23 = vand.u32 4294901760, %v2377_v42 }
 0x288   : > { %2349 = vmatmul.f32.gmra.mxu3 %v6802_v54  ;;  %v7057_v32 = vadd.f32 %v6965_v4, %v1720_v43  ;;  %3194 = vmatpush.msra.mxu0 %v8193_v30 }
 0x289   : > { %3113 = vmatpush.msra.mxu3 %v6666_v29  ;;  %v1541_v62 = vpop.f32.mrf.mxu2  ;;  %2960 = vmatpush.msra.mxu2 %v6562_v38 }
 0x28a   : > { %v1542_v22 = vadd.f32 %v1541_v62, %v1457_v45  ;;  %v1624_v31 = vpop.f32.mrf.mxu3  ;;  %v7064_v10 = vpop.f32.mrf.mxu1  ;;  %3281 = vmatpush.msra.mxu1 %v6621_v55  ;;  %3197 = vmatpush.msra.mxu0 %v6578_v21  ;;  %v7098_v45 = vsub.f32 %v2377_v42, %v7082_v23 }
 0x28b   : > { %3119 = vmatpush.msra.mxu3 %v6679_v52  ;;  %2962 = vmatpush.msra.mxu2 %v6564_v44  ;;  %v2455_v52 = vand.u32 4294901760, %v7070_v51 }
 0x28c   : > { %v1619_v29 = vadd.f32 %v1618_v63, %v1542_v22  ;;  %v1727_v4 = vpop.f32.mrf.mxu0  ;;  %3200 = vmatpush.msra.mxu0 %v6582_v19  ;;  %3283 = vmatpush.msra.mxu1 %v6627_v12  ;;  %v2463_v42 = vand.u32 4294901760, %v7098_v45 }
 0x28d   : > { %3125 = vmatpush.msra.mxu3 %v6682_v0  ;;  %2595 = vmatmul.f32.gmra.mxu1 %v7049_v49 }
 0x28e   : > { %2284 = vmatmul.f32.gmra.mxu2 %v6802_v54  ;;  %v1724_v43 = vadd.f32 %v1723_v60, %v1619_v29  ;;  %3285 = vmatpush.msra.mxu1 %v6629_v33  ;;  %v2456_v60 = vsub.f32 %v7070_v51, %v2455_v52  ;;  %v2464_v29 = vsub.f32 %v7098_v45, %v2463_v42 }
 0x28f   : > { %2964 = vmatpush.msra.mxu2 %v6605_v46  ;;  %2450 = vmatmul.f32.gmra.mxu0 %v2449_v20 }
 0x290   : > { %2353 = vmatmul.f32.gmra.mxu3 %v6822_v47  ;;  %v7088_v21 = vadd.f32 %v6998_v41, %v1724_v43  ;;  %3203 = vmatpush.msra.mxu0 %v6619_v61  ;;  %v8194_v41 = vld [vmem:[#allocation72_spill] sm:$0xff] }
 0x291   : > { %3131 = vmatpush.msra.mxu3 %v6687_v2  ;;  %v1546_v19 = vpop.f32.mrf.mxu2  ;;  %v2379_v62 = vmul.f32 %v8194_v41, %v8194_v41  ;;  %2966 = vmatpush.msra.mxu2 %v6621_v55 }
 0x292   : > { %v1547_v0 = vadd.f32 %v1546_v19, %v6859_v57  ;;  %v1800_v63 = vpop.f32.mrf.mxu1  ;;  %3206 = vmatpush.msra.mxu0 %v6639_v13  ;;  %v2457_v57 = vand.u32 4294901760, %v2456_v60 }
 0x293   : > { %v1630_v54 = vpop.f32.mrf.mxu3  ;;  %2968 = vmatpush.msra.mxu2 %v6627_v12  ;;  %v7109_v30 = vand.u32 4294901760, %v2379_v62 }
 0x294   : > { %v1625_v2 = vadd.f32 %v1624_v31, %v1547_v0  ;;  %v1731_v61 = vpop.f32.mrf.mxu0  ;;  %3209 = vmatpush.msra.mxu0 %v6644_v15 }
 0x295   : > { %2599 = vmatmul.f32.gmra.mxu1 %v7082_v23  ;;  %2970 = vmatpush.msra.mxu2 %v6629_v33 }
 0x296   : > { %2288 = vmatmul.f32.gmra.mxu2 %v6822_v47  ;;  %v1728_v22 = vadd.f32 %v1727_v4, %v1625_v2  ;;  %3212 = vmatpush.msra.mxu0 %v6647_v50  ;;  %v7122_v4 = vsub.f32 %v2379_v62, %v7109_v30 }
 0x297   : > { %2458 = vmatmul.f32.gmra.mxu0 %v2457_v57 }
 0x298   : > { %2357 = vmatmul.f32.gmra.mxu3 %v6842_v56  ;;  %v7114_v13 = vadd.f32 %v7031_v37, %v1728_v22  ;;  %v2465_v37 = vand.u32 4294901760, %v2464_v29  ;;  %v2471_v50 = vand.u32 4294901760, %v7122_v4 }
 0x299   : > { %v1551_v31 = vpop.f32.mrf.mxu2 }
 0x29a   : > { %v1552_v15 = vadd.f32 %v1551_v31, %v6883_v17  ;;  %v1804_v7 = vpop.f32.mrf.mxu1  ;;  %v2472_v2 = vsub.f32 %v7122_v4, %v2471_v50  ;;  %v8195_v31 = vld [vmem:[#allocation38_spill] sm:$0xff] }
 0x29b   : > { %v1636_v47 = vpop.f32.mrf.mxu3 }
 0x29c   : > { %v1631_v20 = vadd.f32 %v1630_v54, %v1552_v15  ;;  %v1735_v43 = vpop.f32.mrf.mxu0 }
 0x29d   : > { %2603 = vmatmul.f32.gmra.mxu1 %v7109_v30 }
 0x29e   : > { %2292 = vmatmul.f32.gmra.mxu2 %v6842_v56  ;;  %v1732_v19 = vadd.f32 %v1731_v61, %v1631_v20  ;;  %v2473_v61 = vand.u32 4294901760, %v2472_v2  ;;  %v8198_v20 = vld [vmem:[#allocation47_spill] sm:$0xff]  ;;  %v8201_v2 = vld [vmem:[#allocation90_spill] sm:$0xff] }
 0x29f   : > { %2466 = vmatmul.f32.gmra.mxu0 %v2465_v37 }
 0x2a0   : > { %2361 = vmatmul.f32.gmra.mxu3 %v6866_v25  ;;  %v7129_v17 = vadd.f32 %v7064_v10, %v1732_v19  ;;  %v8196_v10 = vand.u32 4294901760, %v8195_v31 }
 0x2a1   : > { %v1556_v0 = vpop.f32.mrf.mxu2 }
 0x2a2   : > { %v1557_v60 = vadd.f32 %v1556_v0, %v6906_v16  ;;  %v2158_v54 = vpop.f32.mrf.mxu1  ;;  %v8197_v16 = vld [vmem:[#allocation88_spill] sm:$0xff] }
 0x2a3   : > { %v1642_v62 = vpop.f32.mrf.mxu3 }
 0x2a4   : > { %v1637_v56 = vadd.f32 %v1636_v47, %v1557_v60  ;;  %v1739_v57 = vpop.f32.mrf.mxu0 }
 0x2a5   : > { %2907 = vmatmul.f32.vlgmr.msrb.gmra.mxu1 %v6898_v5 }
 0x2a6   : > { %2296 = vmatmul.f32.gmra.mxu2 %v6866_v25  ;;  %v1736_v22 = vadd.f32 %v1735_v43, %v1637_v56  ;;  %v8199_v43 = vld [vmem:[#allocation39_spill] sm:$0xff] }
 0x2a7   : > { %2474 = vmatmul.f32.gmra.mxu0 %v2473_v61 }
 0x2a8   : > { %2731 = vmatmul.f32.vlgmr.msrb.gmra.mxu3 %v8196_v10  ;;  %v7139_v15 = vadd.f32 %v1800_v63, %v1736_v22  ;;  %v8200_v63 = vand.u32 4294901760, %v6943_v35  ;;  %v8207_v10 = vld [vmem:[#allocation106_spill] sm:$0xff] }
 0x2a9   : > { %3433 = vmatpush.msrb.mxu3 %v8197_v16  ;;  %v1561_v29 = vpop.f32.mrf.mxu2 }
 0x2aa   : > { %v1562_v37 = vadd.f32 %v1561_v29, %v8198_v20  ;;  %v2164_v47 = vpop.f32.mrf.mxu1  ;;  %v8208_v29 = vld [vmem:[#allocation107_spill] sm:$0xff] }
 0x2ab   : > { %v2002_v19 = vpop.f32.mrf.mxu3  ;;  %3435 = vmatpush.msrb.mxu3 %v6432_v8 }
 0x2ac   : > { %v1643_v0 = vadd.f32 %v1642_v62, %v1562_v37  ;;  %v2084_v25 = vpop.f32.mrf.mxu0 }
 0x2ad   : > { %3437 = vmatpush.msrb.mxu3 %v6434_v58  ;;  %2911 = vmatmul.f32.gmra.mxu1 %v8199_v43  ;;  %v8202_v58 = vld [vmem:[#allocation94_spill] sm:$0xff] }
 0x2ae   : > { %2657 = vmatmul.f32.vlgmr.msrb.gmra.mxu2 %v8195_v31  ;;  %v1740_v60 = vadd.f32 %v1739_v57, %v1643_v0  ;;  %v8206_v31 = vld [vmem:[#allocation102_spill] sm:$0xff] }
 0x2af   : > { %3439 = vmatpush.msrb.mxu3 %v6436_v27  ;;  %3338 = vmatpush.msrb.mxu2 %v8201_v2  ;;  %v8203_v27 = vld [vmem:[#allocation95_spill] sm:$0xff]  ;;  %v8217_v2 = vld [vmem:[#allocation124_spill] sm:$0xff] }
 0x2b0   : > { %2737 = vmatmul.f32.gmra.mxu3 %v8200_v63  ;;  %2842 = vmatmul.f32.vlgmr.msrb.gmra.mxu0 %v6898_v5  ;;  %v7153_v62 = vadd.f32 %v1804_v7, %v1740_v60 }
 0x2b1   : > { %3441 = vmatpush.msrb.mxu3 %v6475_v3  ;;  %v1845_v8 = vpop.f32.mrf.mxu2  ;;  %3342 = vmatpush.msrb.mxu2 %v8202_v58  ;;  %v8204_v3 = vld [vmem:[#allocation96_spill] sm:$0xff] }
 0x2b2   : > { %v1846_v56 = vadd.f32 %v1845_v8, %v6991_v39  ;;  %v7157_v22 = vpop.f32.mrf.mxu1  ;;  %v8205_v39 = vand.u32 4294901760, %v6971_v36 }
 0x2b3   : > { %v2006_v61 = vpop.f32.mrf.mxu3  ;;  %3443 = vmatpush.msrb.mxu3 %v6491_v53  ;;  %3346 = vmatpush.msrb.mxu2 %v8203_v27 }
 0x2b4   : > { %v2003_v57 = vadd.f32 %v2002_v19, %v1846_v56  ;;  %v2089_v5 = vpop.f32.mrf.mxu0 }
 0x2b5   : > { %3445 = vmatpush.msrb.mxu3 %v6496_v11  ;;  %2915 = vmatmul.f32.gmra.mxu1 %v6953_v6 }
 0x2b6   : > { %3350 = vmatpush.msrb.mxu2 %v8204_v3  ;;  %v2085_v7 = vadd.f32 %v2084_v25, %v2003_v57 }
 0x2b7   : > { %2662 = vmatmul.f32.gmra.mxu2 %v6943_v35  ;;  %3447 = vmatpush.msrb.mxu3 %v6499_v34 }
 0x2b8   : > { %2743 = vmatmul.f32.gmra.mxu3 %v8205_v39  ;;  %3354 = vmatpush.msrb.mxu2 %v8206_v31  ;;  %v7171_v53 = vadd.f32 %v2158_v54, %v2085_v7 }
 0x2b9   : > { %2846 = vmatmul.f32.gmra.mxu0 %v8199_v43  ;;  %3449 = vmatpush.msrb.mxu3 %v6540_v40  ;;  %v1853_v11 = vpop.f32.mrf.mxu2  ;;  %v8209_v40 = vld [vmem:[#allocation108_spill] sm:$0xff] }
 0x2ba   : > { %3358 = vmatpush.msrb.mxu2 %v8207_v10  ;;  %v1854_v16 = vadd.f32 %v1853_v11, %v7024_v1  ;;  %v7176_v34 = vpop.f32.mrf.mxu1  ;;  %v8210_v1 = vand.u32 4294901760, %v7004_v59 }
 0x2bb   : > { %v2010_v35 = vpop.f32.mrf.mxu3  ;;  %3451 = vmatpush.msrb.mxu3 %v6556_v9  ;;  %v8211_v9 = vld [vmem:[#allocation114_spill] sm:$0xff] }
 0x2bc   : > { %3362 = vmatpush.msrb.mxu2 %v8208_v29  ;;  %v2007_v20 = vadd.f32 %v2006_v61, %v1854_v16  ;;  %v2094_v37 = vpop.f32.mrf.mxu0 }
 0x2bd   : > { %3453 = vmatpush.msrb.mxu3 %v6562_v38  ;;  %2919 = vmatmul.f32.gmra.mxu1 %v6983_v18  ;;  %v8212_v38 = vld [vmem:[#allocation116_spill] sm:$0xff] }
 0x2be   : > { %3366 = vmatpush.msrb.mxu2 %v8209_v40  ;;  %v2090_v25 = vadd.f32 %v2089_v5, %v2007_v20 }
 0x2bf   : > { %2667 = vmatmul.f32.gmra.mxu2 %v6971_v36  ;;  %3455 = vmatpush.msrb.mxu3 %v6564_v44  ;;  %v8213_v36 = vld [vmem:[#allocation117_spill] sm:$0xff] }
 0x2c0   : > { %2749 = vmatmul.f32.gmra.mxu3 %v8210_v1  ;;  %3370 = vmatpush.msrb.mxu2 %v8211_v9  ;;  %v7193_v43 = vadd.f32 %v2164_v47, %v2090_v25 }
 0x2c1   : > { %2850 = vmatmul.f32.gmra.mxu0 %v6953_v6  ;;  %3457 = vmatpush.msrb.mxu3 %v6605_v46  ;;  %v1861_v54 = vpop.f32.mrf.mxu2  ;;  %v8214_v46 = vld [vmem:[#allocation118_spill] sm:$0xff] }
 0x2c2   : > { %3374 = vmatpush.msrb.mxu2 %v8212_v38  ;;  %v1862_v19 = vadd.f32 %v1861_v54, %v7057_v32  ;;  %v7196_v6 = vpop.f32.mrf.mxu1 }
 0x2c3   : > { %v2014_v0 = vpop.f32.mrf.mxu3  ;;  %3459 = vmatpush.msrb.mxu3 %v6621_v55  ;;  %v8215_v55 = vld [vmem:[#allocation122_spill] sm:$0xff] }
 0x2c4   : > { %3378 = vmatpush.msrb.mxu2 %v8213_v36  ;;  %v2011_v44 = vadd.f32 %v2010_v35, %v1862_v19  ;;  %v2099_v63 = vpop.f32.mrf.mxu0 }
 0x2c5   : > { %3461 = vmatpush.msrb.mxu3 %v6627_v12  ;;  %2923 = vmatmul.f32.gmra.mxu1 %v7016_v26  ;;  %v8216_v12 = vld [vmem:[#allocation123_spill] sm:$0xff] }
 0x2c6   : > { %3382 = vmatpush.msrb.mxu2 %v8214_v46 }
 0x2c7   : > { %2672 = vmatmul.f32.gmra.mxu2 %v7004_v59  ;;  %3463 = vmatpush.msrb.mxu3 %v6629_v33  ;;  %v8218_v33 = vld [vmem:[#allocation125_spill] sm:$0xff] }
 0x2c8   : > { %2755 = vmatmul.f32.gmra.mxu3 %v2447_v14  ;;  %3386 = vmatpush.msrb.mxu2 %v8215_v55 }
 0x2c9   : > { %2854 = vmatmul.f32.gmra.mxu0 %v6983_v18  ;;  %v1869_v32 = vpop.f32.mrf.mxu2  ;;  %v2095_v18 = vadd.f32 %v2094_v37, %v2011_v44 }
 0x2ca   : > { %3390 = vmatpush.msrb.mxu2 %v8216_v12  ;;  %v1870_v47 = vadd.f32 %v1869_v32, %v7088_v21  ;;  %v7212_v59 = vpop.f32.mrf.mxu1 }
 0x2cb   : > { %v2018_v60 = vpop.f32.mrf.mxu3  ;;  %v7219_v61 = vadd.f32 %v7157_v22, %v2095_v18 }
 0x2cc   : > { %3394 = vmatpush.msrb.mxu2 %v8217_v2  ;;  %v2015_v8 = vadd.f32 %v2014_v0, %v1870_v47  ;;  %v2104_v58 = vpop.f32.mrf.mxu0 }
 0x2cd   : > { %2927 = vmatmul.f32.gmra.mxu1 %v7049_v49 }
 0x2ce   : > { %3398 = vmatpush.msrb.mxu2 %v8218_v33 }
 0x2cf   : > { %2677 = vmatmul.f32.gmra.mxu2 %v7037_v48  ;;  %v8219_v48 = vld [vmem:[#allocation87_spill] sm:$0xff] }
 0x2d0   : > { %2761 = vmatmul.f32.gmra.mxu3 %v2455_v52 }
 0x2d1   : > { %2858 = vmatmul.f32.gmra.mxu0 %v7016_v26  ;;  %v1877_v14 = vpop.f32.mrf.mxu2  ;;  %v2366_v26 = vmul.f32 %v8219_v48, %v8219_v48 }
 0x2d2   : > { %v1878_v21 = vadd.f32 %v1877_v14, %v7114_v13  ;;  %v7228_v52 = vpop.f32.mrf.mxu1  ;;  %v8223_v14 = vld [vmem:[#allocation81_spill] sm:$0xff] }
 0x2d3   : > { %v2022_v56 = vpop.f32.mrf.mxu3  ;;  %v7231_v3 = vand.u32 4294901760, %v2366_v26 }
 0x2d4   : > { %v2019_v27 = vadd.f32 %v2018_v60, %v1878_v21  ;;  %v2109_v57 = vpop.f32.mrf.mxu0  ;;  %v2374_v21 = vmul.f32 %v8223_v14, %v8223_v14 }
 0x2d5   : > { %2931 = vmatmul.f32.gmra.mxu1 %v7082_v23 }
 0x2d6   : > { %v2105_v40 = vadd.f32 %v2104_v58, %v2019_v27 }
 0x2d7   : > { %2682 = vmatmul.f32.gmra.mxu2 %v7070_v51  ;;  %v2100_v51 = vadd.f32 %v2099_v63, %v2015_v8 }
 0x2d8   : > { %2767 = vmatmul.f32.gmra.mxu3 %v2463_v42  ;;  %v8220_v42 = vld [vmem:[#allocation84_spill] sm:$0xff]  ;;  %v7261_v38 = vadd.f32 %v7196_v6, %v2105_v40 }
 0x2d9   : > { %2862 = vmatmul.f32.gmra.mxu0 %v7049_v49  ;;  %v1885_v13 = vpop.f32.mrf.mxu2  ;;  %v2972_v49 = vsub.f32 %v2366_v26, %v7231_v3  ;;  %v2368_v31 = vmul.f32 %v8220_v42, %v8220_v42 }
 0x2da   : > { %v1886_v22 = vadd.f32 %v1885_v13, %v7129_v17  ;;  %v7244_v17 = vadd.f32 %v7176_v34, %v2100_v51  ;;  %v7247_v35 = vpop.f32.mrf.mxu1  ;;  %v8221_v34 = vld [vmem:[#allocation83_spill] sm:$0xff] }
 0x2db   : > { %v2026_v5 = vpop.f32.mrf.mxu3  ;;  %v7249_v29 = vand.u32 4294901760, %v2368_v31  ;;  %v2370_v37 = vmul.f32 %v8221_v34, %v8221_v34 }
 0x2dc   : > { %v2023_v39 = vadd.f32 %v2022_v56, %v1886_v22  ;;  %v7233_v7 = vpop.f32.mrf.mxu0  ;;  %v7290_v22 = vand.u32 4294901760, %v2374_v21 }
 0x2dd   : > { %2935 = vmatmul.f32.gmra.mxu1 %v7109_v30 }
 0x2de   : > { %v2110_v60 = vadd.f32 %v2109_v57, %v2023_v39  ;;  %v3004_v51 = vsub.f32 %v2374_v21, %v7290_v22 }
 0x2df   : > { %2687 = vmatmul.f32.gmra.mxu2 %v7098_v45  ;;  %v2973_v45 = vand.u32 4294901760, %v2972_v49 }
 0x2e0   : > { %2773 = vmatmul.f32.gmra.mxu3 %v2471_v50  ;;  %v7281_v33 = vadd.f32 %v7212_v59, %v2110_v60 }
 0x2e1   : > { %2866 = vmatmul.f32.gmra.mxu0 %v7082_v23  ;;  %v1893_v11 = vpop.f32.mrf.mxu2  ;;  %v2980_v23 = vsub.f32 %v2368_v31, %v7249_v29 }
 0x2e2   : > { %v1894_v10 = vadd.f32 %v1893_v11, %v7139_v15  ;;  %v2974_v15 = vsub.f32 %v2972_v49, %v2973_v45  ;;  %v7265_v36 = vpop.f32.mrf.mxu1 }
 0x2e3   : > { %v2030_v16 = vpop.f32.mrf.mxu3  ;;  %v2981_v19 = vand.u32 4294901760, %v2980_v23 }
 0x2e4   : > { %v2027_v50 = vadd.f32 %v2026_v5, %v1894_v10  ;;  %v7251_v20 = vpop.f32.mrf.mxu0  ;;  %v2975_v25 = vand.u32 4294901760, %v2974_v15  ;;  %v3005_v15 = vand.u32 4294901760, %v3004_v51 }
 0x2e5   : > { %3289 = vmatmul.f32.vlgmr.msra.gmra.mxu1 %v2973_v45  ;;  %v2982_v6 = vsub.f32 %v2980_v23, %v2981_v19 }
 0x2e7   : > { %2692 = vmatmul.f32.gmra.mxu2 %v7122_v4  ;;  %v7263_v4 = vand.u32 4294901760, %v2370_v37  ;;  %v2983_v8 = vand.u32 4294901760, %v2982_v6 }
 0x2e8   : > { %3133 = vmatmul.f32.vlgmr.msra.gmra.mxu3 %v7231_v3 }
 0x2e9   : > { %2870 = vmatmul.f32.gmra.mxu0 %v7109_v30  ;;  %v1901_v1 = vpop.f32.mrf.mxu2  ;;  %v2988_v30 = vsub.f32 %v2370_v37, %v7263_v4 }
 0x2ea   : > { %v1902_v9 = vadd.f32 %v1901_v1, %v7153_v62  ;;  %v8222_v62 = vld [vmem:[#allocation86_spill] sm:$0xff]  ;;  %v7283_v18 = vpop.f32.mrf.mxu1 }
 0x2eb   : > { %v2334_v54 = vpop.f32.mrf.mxu3  ;;  %v2372_v63 = vmul.f32 %v8222_v62, %v8222_v62  ;;  %v2989_v12 = vand.u32 4294901760, %v2988_v30 }
 0x2ec   : > { %v2031_v0 = vadd.f32 %v2030_v16, %v1902_v9  ;;  %v7267_v44 = vpop.f32.mrf.mxu0 }
 0x2ed   : > { %3295 = vmatmul.f32.gmra.mxu1 %v2981_v19  ;;  %v7274_v47 = vand.u32 4294901760, %v2372_v63  ;;  %v2990_v56 = vsub.f32 %v2988_v30, %v2989_v12 }
 0x2ef   : > { %2976 = vmatmul.f32.vlgmr.msra.gmra.mxu2 %v2975_v25  ;;  %v2991_v5 = vand.u32 4294901760, %v2990_v56 }
 0x2f0   : > { %3137 = vmatmul.f32.gmra.mxu3 %v7249_v29 }
 0x2f1   : > { %3215 = vmatmul.f32.vlgmr.msra.gmra.mxu0 %v2972_v49  ;;  %v2269_v46 = vpop.f32.mrf.mxu2  ;;  %v8224_v49 = vld [vmem:[#allocation78_spill] sm:$0xff] }
 0x2f2   : > { %v2270_v55 = vadd.f32 %v2269_v46, %v7171_v53  ;;  %v2996_v53 = vsub.f32 %v2372_v63, %v7274_v47  ;;  %v2376_v31 = vmul.f32 %v8224_v49, %v8224_v49  ;;  %v7301_v10 = vpop.f32.mrf.mxu1 }
 0x2f3   : > { %v2338_v32 = vpop.f32.mrf.mxu3 }
 0x2f4   : > { %v7276_v2 = vadd.f32 %v2334_v54, %v2270_v55  ;;  %v7278_v58 = vpop.f32.mrf.mxu0  ;;  %v2997_v13 = vand.u32 4294901760, %v2996_v53  ;;  %v7305_v40 = vand.u32 4294901760, %v2376_v31 }
 0x2f5   : > { %3301 = vmatmul.f32.gmra.mxu1 %v2989_v12 }
 0x2f6   : > { %v2998_v11 = vsub.f32 %v2996_v53, %v2997_v13 }
 0x2f7   : > { %2984 = vmatmul.f32.gmra.mxu2 %v2983_v8 }
 0x2f8   : > { %3141 = vmatmul.f32.gmra.mxu3 %v7263_v4  ;;  %v2999_v9 = vand.u32 4294901760, %v2998_v11 }
 0x2f9   : > { %3220 = vmatmul.f32.gmra.mxu0 %v2980_v23  ;;  %v2273_v27 = vpop.f32.mrf.mxu2 }
 0x2fa   : > { %v2274_v57 = vadd.f32 %v2273_v27, %v7193_v43  ;;  %v2115_v43 = vadd.f32 %v7233_v7, %v2027_v50  ;;  %v3012_v7 = vsub.f32 %v2376_v31, %v7305_v40  ;;  %v8225_v50 = vld [vmem:[#allocation77_spill] sm:$0xff]  ;;  %v7318_v46 = vpop.f32.mrf.mxu1 }
 0x2fb   : > { %v2342_v26 = vpop.f32.mrf.mxu3  ;;  %v2378_v54 = vmul.f32 %v8225_v50, %v8225_v50 }
 0x2fc   : > { %v7292_v59 = vadd.f32 %v2338_v32, %v2274_v57  ;;  %v7294_v39 = vpop.f32.mrf.mxu0  ;;  %v2195_v45 = vadd.f32 %v7228_v52, %v2115_v43  ;;  %v2120_v52 = vadd.f32 %v7251_v20, %v2031_v0  ;;  %v3013_v55 = vand.u32 4294901760, %v3012_v7  ;;  %v8226_v0 = vld [vmem:[#allocation76_spill] sm:$0xff] }
 0x2fd   : > { %3307 = vmatmul.f32.gmra.mxu1 %v2997_v13  ;;  %v7320_v32 = vand.u32 4294901760, %v2378_v54 }
 0x2ff   : > { %2992 = vmatmul.f32.gmra.mxu2 %v2991_v5  ;;  %v3020_v20 = vsub.f32 %v2378_v54, %v7320_v32 }
 0x300   : > { %3145 = vmatmul.f32.gmra.mxu3 %v7274_v47 }
 0x301   : > { %3225 = vmatmul.f32.gmra.mxu0 %v2988_v30  ;;  %v2277_v16 = vpop.f32.mrf.mxu2  ;;  %v2201_v30 = vadd.f32 %v7247_v35, %v2120_v52  ;;  %v2380_v35 = vmul.f32 %v8226_v0, %v8226_v0  ;;  %v3021_v27 = vand.u32 4294901760, %v3020_v20 }
 0x302   : > { %v2278_v23 = vadd.f32 %v2277_v16, %v7219_v61  ;;  %v3006_v61 = vsub.f32 %v3004_v51, %v3005_v15  ;;  %v7335_v5 = vpop.f32.mrf.mxu1 }
 0x303   : > { %v2346_v37 = vpop.f32.mrf.mxu3  ;;  %v7331_v57 = vand.u32 4294901760, %v2380_v35  ;;  %v3022_v31 = vsub.f32 %v3020_v20, %v3021_v27 }
 0x304   : > { %v7307_v1 = vadd.f32 %v2342_v26, %v2278_v23  ;;  %v7314_v19 = vpop.f32.mrf.mxu0  ;;  %v3007_v60 = vand.u32 4294901760, %v3006_v61 }
 0x305   : > { %3313 = vmatmul.f32.gmra.mxu1 %v3005_v15 }
 0x307   : > { %3000 = vmatmul.f32.gmra.mxu2 %v2999_v9 }
 0x308   : > { %3149 = vmatmul.f32.gmra.mxu3 %v7290_v22 }
 0x309   : > { %3230 = vmatmul.f32.gmra.mxu0 %v2996_v53  ;;  %v2281_v25 = vpop.f32.mrf.mxu2 }
 0x30a   : > { %v2282_v63 = vadd.f32 %v2281_v25, %v7244_v17  ;;  %v3014_v17 = vsub.f32 %v3012_v7, %v3013_v55  ;;  %v7344_v9 = vpop.f32.mrf.mxu1 }
 0x30b   : > { %v2350_v6 = vpop.f32.mrf.mxu3 }
 0x30c   : > { %v7322_v12 = vadd.f32 %v2346_v37, %v2282_v63  ;;  %v7329_v56 = vpop.f32.mrf.mxu0  ;;  %v3015_v13 = vand.u32 4294901760, %v3014_v17  ;;  %v3023_v37 = vand.u32 4294901760, %v3022_v31 }
 0x30d   : > { %3319 = vmatmul.f32.gmra.mxu1 %v3013_v55 }
 0x30f   : > { %3008 = vmatmul.f32.gmra.mxu2 %v3007_v60 }
 0x310   : > { %3153 = vmatmul.f32.gmra.mxu3 %v7305_v40 }
 0x311   : > { %3235 = vmatmul.f32.gmra.mxu0 %v3004_v51  ;;  %v2285_v8 = vpop.f32.mrf.mxu2  ;;  %v3028_v51 = vsub.f32 %v2380_v35, %v7331_v57 }
 0x312   : > { %v2286_v53 = vadd.f32 %v2285_v8, %v7261_v38 }
 0x313   : > { %v2354_v21 = vpop.f32.mrf.mxu3  ;;  %v3029_v16 = vand.u32 4294901760, %v3028_v51 }
 0x314   : > { %v7333_v26 = vadd.f32 %v2350_v6, %v2286_v53  ;;  %v7342_v15 = vpop.f32.mrf.mxu0  ;;  %v7352_v6 = vpop.f32.mrf.mxu1 }
 0x315   : > { %3325 = vmatmul.f32.gmra.mxu1 %v3021_v27  ;;  %v3030_v54 = vsub.f32 %v3028_v51, %v3029_v16 }
 0x317   : > { %3016 = vmatmul.f32.gmra.mxu2 %v3015_v13 }
 0x318   : > { %3157 = vmatmul.f32.gmra.mxu3 %v7320_v32 }
 0x319   : > { %3240 = vmatmul.f32.gmra.mxu0 %v3012_v7  ;;  %v2289_v38 = vpop.f32.mrf.mxu2 }
 0x31a   : > { %v2290_v43 = vadd.f32 %v2289_v38, %v7281_v33  ;;  %v3031_v33 = vand.u32 4294901760, %v3030_v54 }
 0x31b   : > { %v2358_v11 = vpop.f32.mrf.mxu3 }
 0x31c   : > { %v7340_v23 = vadd.f32 %v2354_v21, %v2290_v43  ;;  %v7349_v63 = vpop.f32.mrf.mxu0  ;;  %v7360_v53 = vpop.f32.mrf.mxu1 }
 0x31d   : > { %3331 = vmatmul.f32.gmra.mxu1 %v3029_v16 }
 0x31f   : > { %3024 = vmatmul.f32.gmra.mxu2 %v3023_v37 }
 0x320   : > { %3161 = vmatmul.f32.gmra.mxu3 %v7331_v57 }
 0x321   : > { %3245 = vmatmul.f32.gmra.mxu0 %v3020_v20  ;;  %v2293_v7 = vpop.f32.mrf.mxu2 }
 0x322   : > { %v2294_v52 = vadd.f32 %v2293_v7, %v2195_v45 }
 0x323   : > { %v2362_v61 = vpop.f32.mrf.mxu3 }
 0x324   : > { %v7347_v25 = vadd.f32 %v2358_v11, %v2294_v52  ;;  %v7358_v45 = vpop.f32.mrf.mxu0  ;;  %v2908_v13 = vpop.f32.mrf.mxu1 }
 0x327   : > { %3032 = vmatmul.f32.gmra.mxu2 %v3031_v33 }
 0x328   : > { %3465 = vmatmul.f32.vlgmr.msrb.gmra.mxu3 %v7231_v3 }
 0x329   : > { %3250 = vmatmul.f32.gmra.mxu0 %v3028_v51  ;;  %v2297_v55 = vpop.f32.mrf.mxu2 }
 0x32a   : > { %v2298_v60 = vadd.f32 %v2297_v55, %v2201_v30 }
 0x32b   : > { %v2732_v35 = vpop.f32.mrf.mxu3 }
 0x32c   : > { %v7354_v17 = vadd.f32 %v2362_v61, %v2298_v60  ;;  %v2912_v38 = vpop.f32.mrf.mxu1  ;;  %v2577_v61 = vadd.f32 %v7265_v36, %v7267_v44 }
 0x32d   : > { %v2843_v30 = vpop.f32.mrf.mxu0 }
 0x32e   : > { %8227 = vst [vmem:[#allocation48_spill] sm:$0xff] %v7354_v17 }
 0x32f   : > { %3400 = vmatmul.f32.vlgmr.msrb.gmra.mxu2 %v7231_v3 }
 0x330   : > { %3469 = vmatmul.f32.gmra.mxu3 %v7249_v29 }
 0x331   : > { %v2658_v20 = vpop.f32.mrf.mxu2 }
 0x333   : > { %v2738_v8 = vpop.f32.mrf.mxu3 }
 0x334   : > { %v2916_v16 = vpop.f32.mrf.mxu1 }
 0x336   : > { %v2847_v31 = vpop.f32.mrf.mxu0 }
 0x337   : > { %3404 = vmatmul.f32.gmra.mxu2 %v7249_v29 }
 0x338   : > { %3473 = vmatmul.f32.gmra.mxu3 %v7263_v4 }
 0x33a   : > { %v2663_v21 = vpop.f32.mrf.mxu2 }
 0x33b   : > { %v2744_v27 = vpop.f32.mrf.mxu3 }
 0x33c   : > { %v2920_v52 = vpop.f32.mrf.mxu1 }
 0x33e   : > { %v2851_v11 = vpop.f32.mrf.mxu0 }
 0x33f   : > { %3408 = vmatmul.f32.gmra.mxu2 %v7263_v4 }
 0x340   : > { %3477 = vmatmul.f32.gmra.mxu3 %v7274_v47 }
 0x342   : > { %v2668_v3 = vpop.f32.mrf.mxu2 }
 0x343   : > { %v2750_v51 = vpop.f32.mrf.mxu3 }
 0x344   : > { %v2924_v60 = vpop.f32.mrf.mxu1 }
 0x346   : > { %v2855_v54 = vpop.f32.mrf.mxu0 }
 0x347   : > { %3412 = vmatmul.f32.gmra.mxu2 %v7274_v47 }
 0x348   : > { %3481 = vmatmul.f32.gmra.mxu3 %v7290_v22 }
 0x34a   : > { %v2673_v43 = vpop.f32.mrf.mxu2 }
 0x34b   : > { %v2756_v29 = vpop.f32.mrf.mxu3 }
 0x34c   : > { %v2928_v24 = vpop.f32.mrf.mxu1 }
 0x34e   : > { %v2859_v55 = vpop.f32.mrf.mxu0 }
 0x34f   : > { %3416 = vmatmul.f32.gmra.mxu2 %v7290_v22 }
 0x350   : > { %3485 = vmatmul.f32.gmra.mxu3 %v7305_v40 }
 0x352   : > { %v2678_v37 = vpop.f32.mrf.mxu2 }
 0x353   : > { %v7370_v4 = vpop.f32.mrf.mxu3 }
 0x356   : > { %v2863_v50 = vpop.f32.mrf.mxu0 }
 0x357   : > { %3420 = vmatmul.f32.gmra.mxu2 %v7305_v40  ;;  %v2659_v40 = vadd.f32 %v2658_v20, %v2577_v61  ;;  %v2585_v20 = vadd.f32 %v7301_v10, %v7294_v39 }
 0x358   : > { %3489 = vmatmul.f32.gmra.mxu3 %v7320_v32 }
 0x359   : > { %v2733_v0 = vadd.f32 %v2732_v35, %v2659_v40 }
 0x35a   : > { %v2683_v47 = vpop.f32.mrf.mxu2 }
 0x35b   : > { %v7374_v7 = vpop.f32.mrf.mxu3  ;;  %v2844_v62 = vadd.f32 %v2843_v30, %v2733_v0  ;;  %v2589_v0 = vadd.f32 %v7318_v46, %v7314_v19 }
 0x35d   : > { %v2909_v36 = vadd.f32 %v2908_v13, %v2844_v62  ;;  %v2674_v62 = vadd.f32 %v2673_v43, %v2589_v0 }
 0x35e   : > { %v2867_v48 = vpop.f32.mrf.mxu0 }
 0x35f   : > { %3424 = vmatmul.f32.gmra.mxu2 %v7320_v32  ;;  %v2581_v32 = vadd.f32 %v7283_v18, %v7278_v58  ;;  %v2932_v58 = vpop.f32.mrf.mxu1  ;;  %v2751_v39 = vadd.f32 %v2750_v51, %v2674_v62 }
 0x360   : > { %3493 = vmatmul.f32.gmra.mxu3 %v7331_v57 }
 0x361   : > { %v2664_v28 = vadd.f32 %v2663_v21, %v2581_v32  ;;  %v2856_v46 = vadd.f32 %v2855_v54, %v2751_v39 }
 0x362   : > { %v7378_v22 = vpop.f32.mrf.mxu2 }
 0x363   : > { %v7382_v33 = vpop.f32.mrf.mxu3  ;;  %v2739_v42 = vadd.f32 %v2738_v8, %v2664_v28 }
 0x365   : > { %v2848_v40 = vadd.f32 %v2847_v31, %v2739_v42  ;;  %v2593_v42 = vadd.f32 %v7335_v5, %v7329_v56 }
 0x366   : > { %v7395_v13 = vpop.f32.mrf.mxu0 }
 0x367   : > { %3428 = vmatmul.f32.gmra.mxu2 %v7331_v57  ;;  %v2669_v57 = vadd.f32 %v2668_v3, %v2585_v20  ;;  %v2913_v17 = vadd.f32 %v2912_v38, %v2848_v40  ;;  %v7399_v31 = vpop.f32.mrf.mxu1  ;;  %v2679_v38 = vadd.f32 %v2678_v37, %v2593_v42 }
 0x369   : > { %v2745_v34 = vadd.f32 %v2744_v27, %v2669_v57 }
 0x36a   : > { %v7385_v41 = vpop.f32.mrf.mxu2 }
 0x36b   : > { %v3134_v49 = vpop.f32.mrf.mxu3  ;;  %v2852_v30 = vadd.f32 %v2851_v11, %v2745_v34  ;;  %v2597_v34 = vadd.f32 %v7344_v9, %v7342_v15 }
 0x36d   : > { %v2917_v10 = vadd.f32 %v2916_v16, %v2852_v30  ;;  %v2684_v32 = vadd.f32 %v2683_v47, %v2597_v34 }
 0x36e   : > { %v3216_v16 = vpop.f32.mrf.mxu0 }
 0x36f   : > { %v2763_v37 = vadd.f32 %v7370_v4, %v2684_v32 }
 0x371   : > { %v2864_v40 = vadd.f32 %v2863_v50, %v2763_v37 }
 0x372   : > { %v2977_v44 = vpop.f32.mrf.mxu2 }
 0x373   : > { %v2978_v61 = vadd.f32 %v2977_v44, %v2909_v36  ;;  %v3138_v14 = vpop.f32.mrf.mxu3  ;;  %v3290_v44 = vpop.f32.mrf.mxu1 }
 0x375   : > { %v3135_v35 = vadd.f32 %v3134_v49, %v2978_v61 }
 0x377   : > { %v3217_v5 = vadd.f32 %v3216_v16, %v3135_v35  ;;  %v2605_v16 = vadd.f32 %v7360_v53, %v7358_v45 }
 0x379   : > { %v3291_v20 = vadd.f32 %v3290_v44, %v3217_v5  ;;  %v2694_v5 = vadd.f32 %v7385_v41, %v2605_v16 }
 0x37a   : > { %v2985_v18 = vpop.f32.mrf.mxu2 }
 0x37b   : > { %v2986_v21 = vadd.f32 %v2985_v18, %v2913_v17  ;;  %v3142_v28 = vpop.f32.mrf.mxu3  ;;  %v2757_v17 = vadd.f32 %v2756_v29, %v2679_v38  ;;  %v2601_v29 = vadd.f32 %v7352_v6, %v7349_v63  ;;  %v2929_v18 = vadd.f32 %v2928_v24, %v2864_v40  ;;  %v3221_v6 = vpop.f32.mrf.mxu0 }
 0x37d   : > { %v7393_v8 = vadd.f32 %v3138_v14, %v2986_v21  ;;  %v2921_v14 = vadd.f32 %v2920_v52, %v2856_v46  ;;  %v2860_v56 = vadd.f32 %v2859_v55, %v2757_v17  ;;  %v2689_v15 = vadd.f32 %v7378_v22, %v2601_v29  ;;  %v3296_v22 = vpop.f32.mrf.mxu1 }
 0x37f   : > { %v2925_v61 = vadd.f32 %v2924_v60, %v2860_v56  ;;  %v2769_v47 = vadd.f32 %v7374_v7, %v2689_v15 }
 0x382   : > { %v2993_v49 = vpop.f32.mrf.mxu2 }
 0x383   : > { %v2994_v27 = vadd.f32 %v2993_v49, %v2917_v10  ;;  %v3146_v3 = vpop.f32.mrf.mxu3  ;;  %v3226_v49 = vpop.f32.mrf.mxu0 }
 0x385   : > { %v7401_v19 = vadd.f32 %v3142_v28, %v2994_v27  ;;  %v2868_v28 = vadd.f32 %v2867_v48, %v2769_v47  ;;  %v3302_v27 = vpop.f32.mrf.mxu1 }
 0x387   : > { %v2933_v4 = vadd.f32 %v2932_v58, %v2868_v28 }
 0x38a   : > { %v3001_v43 = vpop.f32.mrf.mxu2 }
 0x38b   : > { %v3002_v51 = vadd.f32 %v3001_v43, %v2921_v14  ;;  %v3150_v11 = vpop.f32.mrf.mxu3  ;;  %v3231_v48 = vpop.f32.mrf.mxu0  ;;  %v3222_v43 = vadd.f32 %v3221_v6, %v7393_v8  ;;  %v2775_v8 = vadd.f32 %v7382_v33, %v2694_v5 }
 0x38d   : > { %v7405_v36 = vadd.f32 %v3146_v3, %v3002_v51  ;;  %v3308_v58 = vpop.f32.mrf.mxu1 }
 0x392   : > { %v3009_v54 = vpop.f32.mrf.mxu2 }
 0x393   : > { %v3010_v52 = vadd.f32 %v3009_v54, %v2925_v61  ;;  %v3154_v57 = vpop.f32.mrf.mxu3  ;;  %v3236_v14 = vpop.f32.mrf.mxu0 }
 0x395   : > { %v3151_v9 = vadd.f32 %v3150_v11, %v3010_v52  ;;  %v3314_v34 = vpop.f32.mrf.mxu1  ;;  %v3297_v11 = vadd.f32 %v3296_v22, %v3222_v43 }
 0x397   : > { %v3237_v41 = vadd.f32 %v3236_v14, %v3151_v9 }
 0x39a   : > { %v3017_v55 = vpop.f32.mrf.mxu2 }
 0x39b   : > { %v3018_v35 = vadd.f32 %v3017_v55, %v2929_v18  ;;  %v3158_v0 = vpop.f32.mrf.mxu3  ;;  %v3241_v44 = vpop.f32.mrf.mxu0  ;;  %v3232_v55 = vadd.f32 %v3231_v48, %v7405_v36 }
 0x39d   : > { %v3155_v21 = vadd.f32 %v3154_v57, %v3018_v35  ;;  %v3320_v29 = vpop.f32.mrf.mxu1  ;;  %v2872_v57 = vadd.f32 %v7395_v13, %v2775_v8  ;;  %v3309_v9 = vadd.f32 %v3308_v58, %v3232_v55 }
 0x39f   : > { %v3242_v53 = vadd.f32 %v3241_v44, %v3155_v21 }
 0x3a1   : > { %v3321_v33 = vadd.f32 %v3320_v29, %v3242_v53 }
 0x3a2   : > { %v3025_v60 = vpop.f32.mrf.mxu2 }
 0x3a3   : > { %v3026_v62 = vadd.f32 %v3025_v60, %v2933_v4  ;;  %v7412_v30 = vpop.f32.mrf.mxu3  ;;  %v3315_v60 = vadd.f32 %v3314_v34, %v3237_v41  ;;  %v3522_v41 = vmul.f32 0.00390625, %v7292_v59  ;;  %v3526_v59 = vmul.f32 0.00390625, %v7340_v23 }
 0x3a5   : > { %v3159_v63 = vadd.f32 %v3158_v0, %v3026_v62  ;;  %v2937_v0 = vadd.f32 %v7399_v31, %v2872_v57 }
 0x3aa   : > { %v3033_v39 = vpop.f32.mrf.mxu2 }
 0x3ab   : > { %v3466_v10 = vpop.f32.mrf.mxu3  ;;  %v3034_v62 = vadd.f32 %v3033_v39, %v2937_v0 }
 0x3ad   : > { %v3163_v31 = vadd.f32 %v7412_v30, %v3034_v62 }
 0x3b2   : > { %v3401_v50 = vpop.f32.mrf.mxu2 }
 0x3b3   : > { %v3402_v42 = vadd.f32 %v3401_v50, %v3291_v20  ;;  %v3470_v7 = vpop.f32.mrf.mxu3  ;;  %v3227_v20 = vadd.f32 %v3226_v49, %v7401_v19  ;;  %v3246_v19 = vpop.f32.mrf.mxu0 }
 0x3b4   : > { %v3247_v13 = vadd.f32 %v3246_v19, %v3159_v63  ;;  %v3521_v63 = vmul.f32 0.00390625, %v7276_v2 }
 0x3b5   : > { %v7414_v24 = vadd.f32 %v3466_v10, %v3402_v42  ;;  %v3303_v52 = vadd.f32 %v3302_v27, %v3227_v20  ;;  %v3326_v10 = vpop.f32.mrf.mxu1 }
 0x3b7   : > { %4697 = vrsqrt.f32 %v7414_v24  ;;  %vm3536_vm2 = vcmp.eq.f32.partialorder %v7414_v24, inf  ;;  %v3539_v58 = vand.u32 2147483648, %v7414_v24  ;;  %vm3538_vm3 = vcmp.eq.f32.partialorder %v7414_v24, 0.0 }
 0x3ba   : > { %v3405_v3 = vpop.f32.mrf.mxu2 }
 0x3bb   : > { %v3474_v38 = vpop.f32.mrf.mxu3  ;;  %v3406_v32 = vadd.f32 %v3405_v3, %v3297_v11  ;;  %v3251_v34 = vpop.f32.mrf.mxu0 }
 0x3bc   : > { %v3252_v16 = vadd.f32 %v3251_v34, %v3163_v31 }
 0x3bd   : > { %v7424_v37 = vadd.f32 %v3470_v7, %v3406_v32  ;;  %v4698_v54 = vpop.eup %4697  ;;  %v3327_v7 = vadd.f32 %v3326_v10, %v3247_v13  ;;  %v3332_v44 = vpop.f32.mrf.mxu1 }
 0x3be   : > { %v3530_v15 = vmul.f32 %v4698_v54, %v7414_v24 }
 0x3bf   : > { %4699 = vrsqrt.f32 %v7424_v37  ;;  %vm3548_vm4 = vcmp.eq.f32.partialorder %v7424_v37, inf  ;;  %vm3550_vm5 = vcmp.eq.f32.partialorder %v7424_v37, 0.0 }
 0x3c0   : > { %v3531_v47 = vmul.f32 %v4698_v54, %v3530_v15 }
 0x3c2   : > { %v3409_v46 = vpop.f32.mrf.mxu2  ;;  %v3532_v28 = vmul.f32 0.5, %v3531_v47 }
 0x3c3   : > { %v7416_v17 = vpop.f32.mrf.mxu3  ;;  %v3410_v45 = vadd.f32 %v3409_v46, %v3303_v52  ;;  %v3551_v52 = vand.u32 2147483648, %v7424_v37 }
 0x3c4   : > { %v3533_v6 = vsub.f32 1.5, %v3532_v28 }
 0x3c5   : > { %v7430_v18 = vadd.f32 %v3474_v38, %v3410_v45  ;;  %v4700_v4 = vpop.eup %4699 }
 0x3c6   : > { %v3542_v49 = vmul.f32 %v4700_v4, %v7424_v37  ;;  %v3534_v50 = vmul.f32 %v4698_v54, %v3533_v6  ;;  %v7460_v54 = vpop.xlane.xlu2 %3519  ;;  %v3527_v6 = vmul.f32 0.00390625, %v7347_v25 }
 0x3c7   : > { %4701 = vrsqrt.f32 %v7430_v18  ;;  %vm3560_vm6 = vcmp.eq.f32.partialorder %v7430_v18, inf  ;;  %vm3562_vm7 = vcmp.eq.f32.partialorder %v7430_v18, 0.0 }
 0x3c8   : > { %v3543_v27 = vmul.f32 %v4700_v4, %v3542_v49  ;;  %v3535_v3 = vmul.f32 %v3534_v50, %v7414_v24  ;;  %v3563_v50 = vand.u32 2147483648, %v7430_v18 }
 0x3ca   : > { %v3413_v51 = vpop.f32.mrf.mxu2  ;;  %v3544_v14 = vmul.f32 0.5, %v3543_v27  ;;  %v3537_v43 = vsel %vm3536_vm2, %v7414_v24, %v3535_v3 }
 0x3cb   : > { %v3482_v56 = vpop.f32.mrf.mxu3  ;;  %v3414_v36 = vadd.f32 %v3413_v51, %v3309_v9  ;;  %v3540_v2 = vsel %vm3538_vm3, %v3539_v58, %v3537_v43 }
 0x3cc   : > { %v3545_v32 = vsub.f32 1.5, %v3544_v14 }
 0x3cd   : > { %v4702_v30 = vpop.eup %4701  ;;  %v7448_v51 = vadd.f32 %v7416_v17, %v3414_v36  ;;  %v3333_v17 = vadd.f32 %v3332_v44, %v3252_v16 }
 0x3ce   : > { %v3554_v24 = vmul.f32 %v4702_v30, %v7430_v18  ;;  %v3546_v5 = vmul.f32 %v4700_v4, %v3545_v32  ;;  %v3511_v36 = vpop.xlane.xlu2 %3510 }
 0x3cf   : > { %vm3572_vm10 = vcmp.eq.f32.partialorder %v7448_v51, inf  ;;  %vm3574_vm15 = vcmp.eq.f32.partialorder %v7448_v51, 0.0 }
 0x3d0   : > { %v3555_v20 = vmul.f32 %v4702_v30, %v3554_v24 }
 0x3d2   : > { %v3417_v61 = vpop.f32.mrf.mxu2  ;;  %v3556_v53 = vmul.f32 0.5, %v3555_v20 }
 0x3d3   : > { %v3486_v40 = vpop.f32.mrf.mxu3  ;;  %v3418_v22 = vadd.f32 %v3417_v61, %v3315_v60  ;;  %v3547_v61 = vmul.f32 %v3546_v5, %v7424_v37  ;;  %v3523_v60 = vmul.f32 0.00390625, %v7307_v1 }
 0x3d4   : > { %v3557_v28 = vsub.f32 1.5, %v3556_v53 }
 0x3d5   : > { %v7441_v39 = vadd.f32 %v3482_v56, %v3418_v22  ;;  %v7453_v56 = vadd.f32 %v3540_v2, %v3521_v63  ;;  %v3549_v57 = vsel %vm3548_vm4, %v7424_v37, %v3547_v61  ;;  %v7475_v37 = vmul.f32 0.00390625, %v7333_v26 }
 0x3d6   : > { %v3552_v47 = vsel %vm3550_vm5, %v3551_v52, %v3549_v57  ;;  %v3558_v9 = vmul.f32 %v4702_v30, %v3557_v28 }
 0x3d7   : > { %v7471_v4 = vadd.f32 %v3552_v47, %v3522_v41  ;;  %vm3584_vm13 = vcmp.eq.f32.partialorder %v7441_v39, inf  ;;  %vm3586_vm14 = vcmp.eq.f32.partialorder %v7441_v39, 0.0  ;;  %v3514_v47 = vpop.xlane.xlu1 %3513 }
 0x3d8   : > { %v3559_v23 = vmul.f32 %v3558_v9, %v7430_v18 }
 0x3da   : > { %v3421_v35 = vpop.f32.mrf.mxu2 }
 0x3db   : > { %v3422_v21 = vadd.f32 %v3421_v35, %v3321_v33  ;;  %v3490_v38 = vpop.f32.mrf.mxu3 }
 0x3dd   : > { %v7436_v42 = vadd.f32 %v3486_v40, %v3422_v21 }
 0x3df   : > { %4703 = vrsqrt.f32 %v7436_v42  ;;  %vm3596_vm11 = vcmp.eq.f32.partialorder %v7436_v42, inf  ;;  %vm3598_vm12 = vcmp.eq.f32.partialorder %v7436_v42, 0.0  ;;  %v3599_v43 = vand.u32 2147483648, %v7436_v42 }
 0x3e0   : > { %4705 = vrsqrt.f32 %v7441_v39 }
 0x3e2   : > { %v3425_v48 = vpop.f32.mrf.mxu2 }
 0x3e3   : > { %v3426_v46 = vadd.f32 %v3425_v48, %v3327_v7  ;;  %v3494_v40 = vpop.f32.mrf.mxu3 }
 0x3e5   : > { %v7451_v11 = vadd.f32 %v3490_v38, %v3426_v46  ;;  %v4704_v8 = vpop.eup %4703  ;;  %v3561_v38 = vsel %vm3560_vm6, %v7430_v18, %v3559_v23 }
 0x3e6   : > { %v4706_v15 = vpop.eup %4705  ;;  %v3590_v33 = vmul.f32 %v4704_v8, %v7436_v42  ;;  %v3564_v34 = vsel %vm3562_vm7, %v3563_v50, %v3561_v38 }
 0x3e7   : > { %4707 = vrsqrt.f32 %v7451_v11  ;;  %v3578_v13 = vmul.f32 %v4706_v15, %v7441_v39  ;;  %vm3608_vm8 = vcmp.eq.f32.partialorder %v7451_v11, inf  ;;  %vm3610_vm9 = vcmp.eq.f32.partialorder %v7451_v11, 0.0 }
 0x3e8   : > { %4709 = vrsqrt.f32 %v7448_v51  ;;  %v3591_v62 = vmul.f32 %v4704_v8, %v3590_v33  ;;  %v3611_v3 = vand.u32 2147483648, %v7451_v11  ;;  %v3627_v44 = vadd.f32 %v3564_v34, %v3523_v60  ;;  %v3508_v33 = vpop.xlane.xlu2 %3507 }
 0x3e9   : > { %v3579_v49 = vmul.f32 %v4706_v15, %v3578_v13  ;;  %v3524_v60 = vmul.f32 0.00390625, %v7322_v12 }
 0x3ea   : > { %v3429_v29 = vpop.f32.mrf.mxu2  ;;  %v3592_v1 = vmul.f32 0.5, %v3591_v62  ;;  %v8228_v62 = vld [vmem:[#allocation48_spill] sm:$0xff] }
 0x3eb   : > { %v3430_v45 = vadd.f32 %v3429_v29, %v3333_v17  ;;  %v3580_v7 = vmul.f32 0.5, %v3579_v49  ;;  %v3517_v17 = vpop.xlane.xlu0 %3516 }
 0x3ec   : > { %v3593_v25 = vsub.f32 1.5, %v3592_v1 }
 0x3ed   : > { %v4708_v19 = vpop.eup %4707  ;;  %v7467_v55 = vadd.f32 %v3494_v40, %v3430_v45  ;;  %v3581_v14 = vsub.f32 1.5, %v3580_v7  ;;  %v3587_v45 = vand.u32 2147483648, %v7441_v39 }
 0x3ee   : > { %v4710_v35 = vpop.eup %4709  ;;  %v3602_v0 = vmul.f32 %v4708_v19, %v7451_v11  ;;  %v3594_v46 = vmul.f32 %v4704_v8, %v3593_v25 }
 0x3ef   : > { %4711 = vrsqrt.f32 %v7467_v55  ;;  %v3566_v10 = vmul.f32 %v4710_v35, %v7448_v51  ;;  %v3582_v24 = vmul.f32 %v4706_v15, %v3581_v14  ;;  %vm3620_vm1 = vcmp.eq.f32.partialorder %v7467_v55, inf }
 0x3f0   : > { %v3603_v21 = vmul.f32 %v4708_v19, %v3602_v0  ;;  %v3595_v32 = vmul.f32 %v3594_v46, %v7436_v42  ;;  %vm3622_vm2 = vcmp.eq.f32.partialorder %v7467_v55, 0.0  ;;  %v3642_v46 = vld [vmem:[#allocation11 + $0x8] sm:$0xff] }
 0x3f1   : > { %v3567_v26 = vmul.f32 %v4710_v35, %v3566_v10  ;;  %v3583_v8 = vmul.f32 %v3582_v24, %v7441_v39  ;;  %v3623_v10 = vand.u32 2147483648, %v7467_v55 }
 0x3f2   : > { %v3604_v22 = vmul.f32 0.5, %v3603_v21  ;;  %v3597_v18 = vsel %vm3596_vm11, %v7436_v42, %v3595_v32  ;;  %v3641_v21 = vld [vmem:[#allocation11] sm:$0xff] }
 0x3f3   : > { %v3568_v63 = vmul.f32 0.5, %v3567_v26  ;;  %v3600_v52 = vsel %vm3598_vm12, %v3599_v43, %v3597_v18  ;;  %v3585_v40 = vsel %vm3584_vm13, %v7441_v39, %v3583_v8  ;;  %v3528_v39 = vmul.f32 0.00390625, %v8228_v62  ;;  %v3505_v49 = vpop.xlane.xlu0 %3504 }
 0x3f4   : > { %v3605_v31 = vsub.f32 1.5, %v3604_v22  ;;  %v3630_v41 = vadd.f32 %v3600_v52, %v3526_v59  ;;  %v3650_v12 = vsel %vm393_vm0, %v3641_v21, 0 }
 0x3f5   : > { %v4712_v27 = vpop.eup %4711  ;;  %v3569_v30 = vsub.f32 1.5, %v3568_v63  ;;  %v7539_v25 = vand.u32 4294901760, %v3650_v12 }
 0x3f6   : > { %v3614_v48 = vmul.f32 %v4712_v27, %v7467_v55  ;;  %v3606_v58 = vmul.f32 %v4708_v19, %v3605_v31  ;;  %v3588_v19 = vsel %vm3586_vm14, %v3587_v45, %v3585_v40  ;;  %v3635_v31 = vadd.f32 %v3627_v44, %v3505_v49 }
 0x3f7   : > { %v3570_v5 = vmul.f32 %v4710_v35, %v3569_v30  ;;  %v3629_v28 = vadd.f32 %v3588_v19, %v7475_v37  ;;  %v7559_v43 = vsub.f32 %v3650_v12, %v7539_v25 }
 0x3f8   : > { %v3615_v2 = vmul.f32 %v4712_v27, %v3614_v48  ;;  %v3607_v16 = vmul.f32 %v3606_v58, %v7451_v11  ;;  %v7555_v14 = vand.u32 4294901760, %v3635_v31 }
 0x3f9   : > { %v3571_v53 = vmul.f32 %v3570_v5, %v7448_v51 }
 0x3fa   : > { %v3616_v20 = vmul.f32 0.5, %v3615_v2  ;;  %v3609_v61 = vsel %vm3608_vm8, %v7451_v11, %v3607_v16  ;;  %v3575_v11 = vand.u32 2147483648, %v7448_v51  ;;  %v3653_v2 = vsel %vm393_vm0, %v3642_v46, 0 }
 0x3fb   : > { %v3612_v29 = vsel %vm3610_vm9, %v3611_v3, %v3609_v61  ;;  %v3573_v42 = vsel %vm3572_vm10, %v7448_v51, %v3571_v53  ;;  %v3637_v51 = vadd.f32 %v3629_v28, %v3511_v36  ;;  %v3502_v3 = vpop.xlane.xlu1 %3501  ;;  %v3499_v36 = vpop.xlane.xlu2 %3498  ;;  %v7582_v5 = vsub.f32 %v3635_v31, %v7555_v14 }
 0x3fc   : > { %v3617_v57 = vsub.f32 1.5, %v3616_v20  ;;  %v3631_v15 = vadd.f32 %v3612_v29, %v3527_v6  ;;  %v3576_v59 = vsel %vm3574_vm15, %v3575_v11, %v3573_v42  ;;  %v3638_v6 = vadd.f32 %v3630_v41, %v3514_v47 }
 0x3fd   : > { %v3628_v9 = vadd.f32 %v3576_v59, %v3524_v60  ;;  %v3634_v58 = vadd.f32 %v7471_v4, %v3502_v3  ;;  %v7596_v8 = vand.u32 4294901760, %v3653_v2  ;;  %v3802_v41 = vand.u32 4294901760, %v7582_v5  ;;  %v3645_v3 = vld [vmem:[#allocation11 + $0x20] sm:$0xff] }
 0x3fe   : > { %v3618_v35 = vmul.f32 %v4712_v27, %v3617_v57  ;;  %v3639_v0 = vadd.f32 %v3631_v15, %v3517_v17  ;;  %v7537_v23 = vand.u32 4294901760, %v3638_v6  ;;  %v3699_v17 = vand.u32 4294901760, %v7559_v43  ;;  %v3643_v57 = vld [vmem:[#allocation11 + $0x10] sm:$0xff] }
 0x3ff   : > { %v3636_v50 = vadd.f32 %v3628_v9, %v3508_v33  ;;  %v7577_v32 = vand.u32 4294901760, %v3634_v58  ;;  %v3706_v42 = vsub.f32 %v3653_v2, %v7596_v8  ;;  %v3656_v11 = vsel %vm393_vm0, %v3643_v57, 0 }
 0x400   : > { %v3619_v13 = vmul.f32 %v3618_v35, %v7467_v55  ;;  %v7534_v22 = vand.u32 4294901760, %v3639_v0  ;;  %v7550_v38 = vsub.f32 %v3638_v6, %v7537_v23  ;;  %v3700_v19 = vsub.f32 %v7559_v43, %v3699_v17 }
 0x401   : > { %v7552_v48 = vand.u32 4294901760, %v3636_v50  ;;  %v7605_v45 = vsub.f32 %v3634_v58, %v7577_v32  ;;  %v3803_v28 = vsub.f32 %v7582_v5, %v3802_v41  ;;  %v3707_v62 = vand.u32 4294901760, %v3706_v42 }
 0x402   : > { %v3621_v37 = vsel %vm3620_vm1, %v7467_v55, %v3619_v13  ;;  %v7543_v27 = vsub.f32 %v3639_v0, %v7534_v22  ;;  %v7545_v55 = vand.u32 4294901760, %v3637_v51  ;;  %v3784_v24 = vand.u32 4294901760, %v7550_v38 }
 0x403   : > { %v3624_v1 = vsel %vm3622_vm2, %v3623_v10, %v3621_v37  ;;  %v7575_v16 = vsub.f32 %v3636_v50, %v7552_v48  ;;  %v3808_v0 = vand.u32 4294901760, %v7605_v45  ;;  %v3701_v21 = vand.u32 4294901760, %v3700_v19  ;;  %v3644_v10 = vld [vmem:[#allocation11 + $0x18] sm:$0xff] }
 0x404   : > { %v3632_v26 = vadd.f32 %v3624_v1, %v3528_v39  ;;  %v7567_v34 = vsub.f32 %v3637_v51, %v7545_v55  ;;  %v3778_v4 = vand.u32 4294901760, %v7543_v27  ;;  %v3785_v52 = vsub.f32 %v7550_v38, %v3784_v24 }
 0x405   : > { %v3796_v53 = vand.u32 4294901760, %v7575_v16  ;;  %v7636_v39 = vand.u32 4294901760, %v3656_v11  ;;  %v3809_v6 = vsub.f32 %v7605_v45, %v3808_v0  ;;  %v3804_v9 = vand.u32 4294901760, %v3803_v28 }
 0x406   : > { %v3640_v7 = vadd.f32 %v3632_v26, %v7460_v54  ;;  %v3633_v54 = vadd.f32 %v7453_v56, %v3499_v36  ;;  %v3779_v61 = vsub.f32 %v7543_v27, %v3778_v4  ;;  %v3790_v18 = vand.u32 4294901760, %v7567_v34 }
 0x407   : > { %v3786_v33 = vand.u32 4294901760, %v3785_v52  ;;  %v3797_v35 = vsub.f32 %v7575_v16, %v3796_v53  ;;  %v3708_v51 = vsub.f32 %v3706_v42, %v3707_v62  ;;  %v3714_v12 = vsub.f32 %v3656_v11, %v7636_v39 }
 0x408   : > { %v7547_v63 = vand.u32 4294901760, %v3640_v7  ;;  %v7584_v44 = vand.u32 4294901760, %v3633_v54  ;;  %v3780_v40 = vand.u32 4294901760, %v3779_v61  ;;  %v3791_v47 = vsub.f32 %v7567_v34, %v3790_v18 }
 0x409   : > { %v3798_v13 = vand.u32 4294901760, %v3797_v35  ;;  %v3659_v1 = vsel %vm393_vm0, %v3644_v10, 0  ;;  %v3810_v49 = vand.u32 4294901760, %v3809_v6  ;;  %v3709_v50 = vand.u32 4294901760, %v3708_v51 }
 0x40a   : > { %3682 = vmatpush.msrb.mxu0 %v7547_v63  ;;  %3933 = vmatpush.msra.mxu3 %v7547_v63  ;;  %v7564_v30 = vsub.f32 %v3640_v7, %v7547_v63  ;;  %v7610_v15 = vsub.f32 %v3633_v54, %v7584_v44  ;;  %v3792_v59 = vand.u32 4294901760, %v3791_v47  ;;  %v3715_v31 = vand.u32 4294901760, %v3714_v12  ;;  %v3646_v54 = vld [vmem:[#allocation11 + $0x28] sm:$0xff] }
 0x40b   : > { %v7655_v7 = vand.u32 4294901760, %v3659_v1  ;;  %v3662_v58 = vsel %vm393_vm0, %v3645_v3, 0 }
 0x40c   : > { %3684 = vmatpush.msrb.mxu0 %v7534_v22  ;;  %3861 = vmatpush.msra.mxu2 %v7564_v30  ;;  %v3772_v56 = vand.u32 4294901760, %v7564_v30  ;;  %v3814_v60 = vand.u32 4294901760, %v7610_v15 }
 0x40d   : > { %3935 = vmatpush.msra.mxu3 %v7534_v22  ;;  %v3722_v36 = vsub.f32 %v3659_v1, %v7655_v7 }
 0x40e   : > { %3686 = vmatpush.msrb.mxu0 %v7537_v23  ;;  %3864 = vmatpush.msra.mxu2 %v7543_v27  ;;  %v3773_v20 = vsub.f32 %v7564_v30, %v3772_v56  ;;  %v3815_v37 = vsub.f32 %v7610_v15, %v3814_v60  ;;  %v3716_v27 = vsub.f32 %v3714_v12, %v3715_v31  ;;  %v3665_v30 = vsel %vm393_vm0, %v3646_v54, 0 }
 0x40f   : > { %3937 = vmatpush.msra.mxu3 %v7537_v23  ;;  %v3723_v46 = vand.u32 4294901760, %v3722_v36  ;;  %v5027_v54 = vmov 0  }
 0x410   : > { %3688 = vmatpush.msrb.mxu0 %v7545_v55  ;;  %3867 = vmatpush.msra.mxu2 %v7550_v38  ;;  %v3774_v29 = vand.u32 4294901760, %v3773_v20  ;;  %v3816_v26 = vand.u32 4294901760, %v3815_v37  ;;  %v3717_v38 = vand.u32 4294901760, %v3716_v27 }
 0x411   : > { %3939 = vmatpush.msra.mxu3 %v7545_v55  ;;  %4686 = vset.pattern.permute.xlu0 %v5027_v54 }
 0x412   : > { %3690 = vmatpush.msrb.mxu0 %v7552_v48  ;;  %3775 = vmatpush.msrb.mxu1 %v3774_v29 }
 0x413   : > { %3870 = vmatpush.msra.mxu2 %v7567_v34  ;;  %3941 = vmatpush.msra.mxu3 %v7552_v48  ;;  %v3737_v34 = vand.u32 4294901760, %v3665_v30 }
 0x414   : > { %3692 = vmatpush.msrb.mxu0 %v7555_v14  ;;  %3781 = vmatpush.msrb.mxu1 %v3780_v40 }
 0x415   : > { %3873 = vmatpush.msra.mxu2 %v7575_v16  ;;  %3943 = vmatpush.msra.mxu3 %v7555_v14  ;;  %v3738_v2 = vsub.f32 %v3665_v30, %v3737_v34 }
 0x416   : > { %3694 = vmatpush.msrb.mxu0 %v7577_v32  ;;  %3787 = vmatpush.msrb.mxu1 %v3786_v33 }
 0x417   : > { %3876 = vmatpush.msra.mxu2 %v7582_v5  ;;  %3945 = vmatpush.msra.mxu3 %v7577_v32  ;;  %v3739_v16 = vand.u32 4294901760, %v3738_v2  ;;  %v3648_v5 = vld [vmem:[#allocation11 + $0x38] sm:$0xff] }
 0x418   : > { %3696 = vmatpush.msrb.mxu0 %v7584_v44  ;;  %3793 = vmatpush.msrb.mxu1 %v3792_v59 }
 0x419   : > { %3879 = vmatpush.msra.mxu2 %v7605_v45  ;;  %3947 = vmatpush.msra.mxu3 %v7584_v44 }
 0x41a   : > { %3702 = vmatmul.f32.vlgmr.msrb.gmra.mxu0 %v3701_v21  ;;  %3799 = vmatpush.msrb.mxu1 %v3798_v13 }
 0x41b   : > { %4008 = vmatpush.msra.mxu0 %v3772_v56  ;;  %3882 = vmatpush.msra.mxu2 %v7610_v15 }
 0x41c   : > { %3805 = vmatpush.msrb.mxu1 %v3804_v9  ;;  %3885 = vmatmul.f32.vlgmr.msra.gmra.mxu2 %v7559_v43 }
 0x41d   : > { %4012 = vmatpush.msra.mxu0 %v3778_v4  ;;  %3951 = vmatmul.f32.vlgmr.msra.gmra.mxu3 %v3699_v17  ;;  %v3647_v4 = vld [vmem:[#allocation11 + $0x30] sm:$0xff] }
 0x41e   : > { %3811 = vmatpush.msrb.mxu1 %v3810_v49  ;;  %v3668_v56 = vsel %vm393_vm0, %v3647_v4, 0  ;;  %4687 = vset.pattern.permute.xlu1 %v5027_v54 }
 0x41f   : > { %4016 = vmatpush.msra.mxu0 %v3784_v24  ;;  %v3745_v24 = vand.u32 4294901760, %v3668_v56  ;;  %4688 = vset.pattern.permute.xlu2 %v5027_v54 }
 0x420   : > { %3817 = vmatpush.msrb.mxu1 %v3816_v26 }
 0x421   : > { %4020 = vmatpush.msra.mxu0 %v3790_v18  ;;  %3819 = vmatmul.f32.vlgmr.msrb.gmra.mxu1 %v7539_v25  ;;  %v3746_v17 = vsub.f32 %v3668_v56, %v3745_v24 }
 0x422   : > { %3710 = vmatmul.f32.gmra.mxu0 %v3709_v50  ;;  %4079 = vmatpush.msra.mxu1 %v7547_v63  ;;  %v7671_v63 = vand.u32 4294901760, %v3662_v58 }
 0x423   : > { %4024 = vmatpush.msra.mxu0 %v3796_v53  ;;  %v3747_v61 = vand.u32 4294901760, %v3746_v17 }
 0x424   : > { %4081 = vmatpush.msra.mxu1 %v7534_v22  ;;  %3890 = vmatmul.f32.gmra.mxu2 %v3706_v42  ;;  %v3724_v22 = vsub.f32 %v3722_v36, %v3723_v46  ;;  %v3730_v43 = vsub.f32 %v3662_v58, %v7671_v63 }
 0x425   : > { %4028 = vmatpush.msra.mxu0 %v3802_v41  ;;  %3957 = vmatmul.f32.gmra.mxu3 %v3707_v62  ;;  %v3748_v29 = vsub.f32 %v3746_v17, %v3747_v61 }
 0x426   : > { %4083 = vmatpush.msra.mxu1 %v7537_v23  ;;  %v3725_v23 = vand.u32 4294901760, %v3724_v22 }
 0x427   : > { %4032 = vmatpush.msra.mxu0 %v3808_v0  ;;  %v3749_v45 = vand.u32 4294901760, %v3748_v29 }
 0x428   : > { %4085 = vmatpush.msra.mxu1 %v7545_v55  ;;  %v3731_v55 = vand.u32 4294901760, %v3730_v43 }
 0x429   : > { %4036 = vmatpush.msra.mxu0 %v3814_v60  ;;  %3823 = vmatmul.f32.gmra.mxu1 %v7596_v8 }
 0x42a   : > { %3718 = vmatmul.f32.gmra.mxu0 %v3717_v38  ;;  %4087 = vmatpush.msra.mxu1 %v7552_v48  ;;  %v3732_v48 = vsub.f32 %v3730_v43, %v3731_v55 }
 0x42c   : > { %4089 = vmatpush.msra.mxu1 %v7555_v14  ;;  %3895 = vmatmul.f32.gmra.mxu2 %v3714_v12  ;;  %v3733_v14 = vand.u32 4294901760, %v3732_v48 }
 0x42d   : > { %3963 = vmatmul.f32.gmra.mxu3 %v3715_v31 }
 0x42e   : > { %4091 = vmatpush.msra.mxu1 %v7577_v32  ;;  %v3740_v32 = vsub.f32 %v3738_v2, %v3739_v16 }
 0x430   : > { %4093 = vmatpush.msra.mxu1 %v7584_v44  ;;  %v3671_v44 = vsel %vm393_vm0, %v3648_v5, 0  ;;  %v3741_v20 = vand.u32 4294901760, %v3740_v32 }
 0x431   : > { %3827 = vmatmul.f32.gmra.mxu1 %v7636_v39  ;;  %v3753_v18 = vand.u32 4294901760, %v3671_v44 }
 0x432   : > { %3726 = vmatmul.f32.gmra.mxu0 %v3725_v23 }
 0x433   : > { %v3754_v52 = vsub.f32 %v3671_v44, %v3753_v18 }
 0x434   : > { %3900 = vmatmul.f32.gmra.mxu2 %v3722_v36 }
 0x435   : > { %3969 = vmatmul.f32.gmra.mxu3 %v3723_v46  ;;  %v3755_v53 = vand.u32 4294901760, %v3754_v52 }
 0x437   : > { %v3756_v57 = vsub.f32 %v3754_v52, %v3755_v53 }
 0x439   : > { %3831 = vmatmul.f32.gmra.mxu1 %v7655_v7  ;;  %v3757_v15 = vand.u32 4294901760, %v3756_v57 }
 0x43a   : > { %3734 = vmatmul.f32.gmra.mxu0 %v3733_v14 }
 0x43c   : > { %3905 = vmatmul.f32.gmra.mxu2 %v3730_v43 }
 0x43d   : > { %3975 = vmatmul.f32.gmra.mxu3 %v3731_v55 }
 0x441   : > { %3835 = vmatmul.f32.gmra.mxu1 %v7671_v63 }
 0x442   : > { %3742 = vmatmul.f32.gmra.mxu0 %v3741_v20 }
 0x444   : > { %3910 = vmatmul.f32.gmra.mxu2 %v3738_v2 }
 0x445   : > { %3981 = vmatmul.f32.gmra.mxu3 %v3739_v16 }
 0x449   : > { %3839 = vmatmul.f32.gmra.mxu1 %v3737_v34 }
 0x44a   : > { %3750 = vmatmul.f32.gmra.mxu0 %v3749_v45 }
 0x44c   : > { %3915 = vmatmul.f32.gmra.mxu2 %v3746_v17 }
 0x44d   : > { %3987 = vmatmul.f32.gmra.mxu3 %v3747_v61 }
 0x451   : > { %3843 = vmatmul.f32.gmra.mxu1 %v3745_v24 }
 0x452   : > { %3758 = vmatmul.f32.gmra.mxu0 %v3757_v15 }
 0x454   : > { %3920 = vmatmul.f32.gmra.mxu2 %v3754_v52 }
 0x455   : > { %3993 = vmatmul.f32.gmra.mxu3 %v3755_v53 }
 0x459   : > { %3847 = vmatmul.f32.gmra.mxu1 %v3753_v18 }
 0x45a   : > { %4038 = vmatmul.f32.vlgmr.msra.gmra.mxu0 %v7539_v25 }
 0x461   : > { %4095 = vmatmul.f32.vlgmr.msra.gmra.mxu1 %v7539_v25 }
 0x462   : > { %4042 = vmatmul.f32.gmra.mxu0 %v7596_v8 }
 0x469   : > { %4099 = vmatmul.f32.gmra.mxu1 %v7596_v8 }
 0x46a   : > { %4046 = vmatmul.f32.gmra.mxu0 %v7636_v39 }
 0x471   : > { %4103 = vmatmul.f32.gmra.mxu1 %v7636_v39 }
 0x472   : > { %4050 = vmatmul.f32.gmra.mxu0 %v7655_v7 }
 0x479   : > { %4107 = vmatmul.f32.gmra.mxu1 %v7655_v7 }
 0x47a   : > { %4054 = vmatmul.f32.gmra.mxu0 %v7671_v63 }
 0x481   : > { %4111 = vmatmul.f32.gmra.mxu1 %v7671_v63 }
 0x482   : > { %4058 = vmatmul.f32.gmra.mxu0 %v3737_v34 }
 0x489   : > { %4115 = vmatmul.f32.gmra.mxu1 %v3737_v34 }
 0x48a   : > { %4062 = vmatmul.f32.gmra.mxu0 %v3745_v24 }
 0x491   : > { %4119 = vmatmul.f32.gmra.mxu1 %v3745_v24 }
 0x492   : > { %4066 = vmatmul.f32.gmra.mxu0 %v3753_v18 }
 0x497   : > { %v3703_v25 = vpop.f32.mrf.mxu0 }
 0x499   : > { %4123 = vmatmul.f32.gmra.mxu1 %v3753_v18 }
 0x49e   : > { %v3820_v8 = vpop.f32.mrf.mxu1 }
 0x49f   : > { %v3711_v41 = vpop.f32.mrf.mxu0  ;;  %v3886_v28 = vpop.f32.mrf.mxu2  ;;  %v3821_v6 = vadd.f32 %v3820_v8, %v3703_v25 }
 0x4a0   : > { %v3952_v21 = vpop.f32.mrf.mxu3 }
 0x4a1   : > { %v3887_v37 = vadd.f32 %v3886_v28, %v3821_v6 }
 0x4a3   : > { %v3953_v49 = vadd.f32 %v3952_v21, %v3887_v37 }
 0x4a6   : > { %v3824_v40 = vpop.f32.mrf.mxu1 }
 0x4a7   : > { %v3719_v47 = vpop.f32.mrf.mxu0  ;;  %v3891_v13 = vpop.f32.mrf.mxu2  ;;  %v3825_v1 = vadd.f32 %v3824_v40, %v3711_v41 }
 0x4a8   : > { %v3958_v10 = vpop.f32.mrf.mxu3 }
 0x4a9   : > { %v3892_v7 = vadd.f32 %v3891_v13, %v3825_v1 }
 0x4ab   : > { %v3959_v38 = vadd.f32 %v3958_v10, %v3892_v7 }
 0x4ae   : > { %v3828_v19 = vpop.f32.mrf.mxu1 }
 0x4af   : > { %v3727_v42 = vpop.f32.mrf.mxu0  ;;  %v3896_v12 = vpop.f32.mrf.mxu2  ;;  %v3829_v58 = vadd.f32 %v3828_v19, %v3719_v47 }
 0x4b0   : > { %v3964_v50 = vpop.f32.mrf.mxu3 }
 0x4b1   : > { %v3897_v43 = vadd.f32 %v3896_v12, %v3829_v58 }
 0x4b3   : > { %v3965_v56 = vadd.f32 %v3964_v50, %v3897_v43 }
 0x4b6   : > { %v3832_v11 = vpop.f32.mrf.mxu1 }
 0x4b7   : > { %v3735_v33 = vpop.f32.mrf.mxu0  ;;  %v3901_v46 = vpop.f32.mrf.mxu2  ;;  %v3833_v2 = vadd.f32 %v3832_v11, %v3727_v42 }
 0x4b8   : > { %v3970_v55 = vpop.f32.mrf.mxu3 }
 0x4b9   : > { %v3902_v5 = vadd.f32 %v3901_v46, %v3833_v2 }
 0x4bb   : > { %v3971_v45 = vadd.f32 %v3970_v55, %v3902_v5 }
 0x4be   : > { %v3836_v35 = vpop.f32.mrf.mxu1 }
 0x4bf   : > { %v7696_v0 = vpop.f32.mrf.mxu0  ;;  %v3906_v16 = vpop.f32.mrf.mxu2  ;;  %v3837_v29 = vadd.f32 %v3836_v35, %v3735_v33 }
 0x4c0   : > { %v3976_v61 = vpop.f32.mrf.mxu3 }
 0x4c1   : > { %v3907_v25 = vadd.f32 %v3906_v16, %v3837_v29 }
 0x4c3   : > { %v3977_v10 = vadd.f32 %v3976_v61, %v3907_v25 }
 0x4c6   : > { %v7698_v60 = vpop.f32.mrf.mxu1 }
 0x4c7   : > { %v7700_v59 = vpop.f32.mrf.mxu0  ;;  %v3911_v19 = vpop.f32.mrf.mxu2  ;;  %v3841_v35 = vadd.f32 %v7698_v60, %v7696_v0 }
 0x4ce   : > { %v7702_v62 = vpop.f32.mrf.mxu1 }
 0x4cf   : > { %v7704_v39 = vpop.f32.mrf.mxu0  ;;  %v3916_v46 = vpop.f32.mrf.mxu2 }
 0x4d6   : > { %v7706_v9 = vpop.f32.mrf.mxu1 }
 0x4d7   : > { %v4039_v51 = vpop.f32.mrf.mxu0 }
 0x4d8   : > { %v4040_v26 = vadd.f32 %v4039_v51, %v3953_v49  ;;  %v3982_v51 = vpop.f32.mrf.mxu3 }
 0x4de   : > { %v4096_v31 = vpop.f32.mrf.mxu1 }
 0x4df   : > { %v4043_v3 = vpop.f32.mrf.mxu0  ;;  %v4097_v27 = vadd.f32 %v4096_v31, %v4040_v26  ;;  %v3912_v31 = vadd.f32 %v3911_v19, %v3841_v35 }
 0x4e0   : > { %v4044_v63 = vadd.f32 %v4043_v3, %v3959_v38  ;;  %v3988_v2 = vpop.f32.mrf.mxu3 }
 0x4e1   : > { %v4528_v36 = vmul.f32 -1.442695, %v4097_v27 }
 0x4e3   : > { %4713 = vpow2.f32 %v4528_v36 }
 0x4e6   : > { %v4100_v22 = vpop.f32.mrf.mxu1 }
 0x4e7   : > { %v4047_v30 = vpop.f32.mrf.mxu0  ;;  %v4101_v23 = vadd.f32 %v4100_v22, %v4044_v63  ;;  %v3845_v22 = vadd.f32 %v7702_v62, %v7700_v59 }
 0x4e8   : > { %v4048_v14 = vadd.f32 %v4047_v30, %v3965_v56  ;;  %v3983_v30 = vadd.f32 %v3982_v51, %v3912_v31 }
 0x4e9   : > { %v4714_v34 = vpop.eup %4713  ;;  %v4529_v4 = vmul.f32 -1.442695, %v4101_v23 }
 0x4ea   : > { %v4151_v48 = vadd.f32 1.0, %v4714_v34 }
 0x4eb   : > { %4715 = vpow2.f32 %v4529_v4 }
 0x4ec   : > { %4717 = vrcp.f32 %v4151_v48  ;;  %v4170_v41 = vand.u32 2147483648, %v4151_v48  ;;  %v4168_v11 = vand.u32 2147483647, %v4151_v48  ;;  %vm4164_vm3 = vweird.f32 %v4151_v48 }
 0x4ee   : > { %v4104_v24 = vpop.f32.mrf.mxu1  ;;  %v4171_v37 = vor.u32 1.1754944e-38, %v4170_v41  ;;  %vm4169_vm5 = vcmp.eq.f32.partialorder %v4168_v11, 8.507059e+37 }
 0x4ef   : > { %v4051_v32 = vpop.f32.mrf.mxu0  ;;  %v4105_v17 = vadd.f32 %v4104_v24, %v4048_v14  ;;  %v3917_v14 = vadd.f32 %v3916_v46, %v3845_v22 }
 0x4f0   : > { %v4052_v57 = vadd.f32 %v4051_v32, %v3971_v45 }
 0x4f1   : > { %v4716_v44 = vpop.eup %4715  ;;  %v4530_v20 = vmul.f32 -1.442695, %v4105_v17 }
 0x4f2   : > { %v4718_v18 = vpop.eup %4717  ;;  %v4152_v52 = vadd.f32 1.0, %v4716_v44 }
 0x4f3   : > { %4719 = vpow2.f32 %v4530_v20  ;;  %v4160_v53 = vmul.f32 %v4718_v18, %v4151_v48  ;;  %vm4165_vm0 = vweird.f32 %v4718_v18 }
 0x4f4   : > { %4721 = vrcp.f32 %v4152_v52  ;;  %vm4166_vm4 = vmor %vm4164_vm3, %vm4165_vm0  ;;  %v4185_v3 = vand.u32 2147483648, %v4152_v52  ;;  %v4183_v36 = vand.u32 2147483647, %v4152_v52  ;;  %vm4179_vm7 = vweird.f32 %v4152_v52 }
 0x4f5   : > { %v4161_v15 = vsub.f32 1.0, %v4160_v53  ;;  %v3921_v53 = vpop.f32.mrf.mxu2 }
 0x4f6   : > { %v4108_v8 = vpop.f32.mrf.mxu1  ;;  %v4186_v23 = vor.u32 1.1754944e-38, %v4185_v3  ;;  %vm4184_vm9 = vcmp.eq.f32.partialorder %v4183_v36, 8.507059e+37 }
 0x4f7   : > { %v4055_v40 = vpop.f32.mrf.mxu0  ;;  %v4109_v47 = vadd.f32 %v4108_v8, %v4052_v57  ;;  %v4162_v42 = vmul.f32 %v4718_v18, %v4161_v15 }
 0x4f8   : > { %v4056_v26 = vadd.f32 %v4055_v40, %v3977_v10 }
 0x4f9   : > { %v4720_v28 = vpop.eup %4719  ;;  %v4531_v21 = vmul.f32 -1.442695, %v4109_v47  ;;  %v4163_v13 = vadd.f32 %v4718_v18, %v4162_v42 }
 0x4fa   : > { %v4722_v33 = vpop.eup %4721  ;;  %v7710_v6 = vadd.f32 1.0, %v4720_v28 }
 0x4fb   : > { %4723 = vpow2.f32 %v4531_v21  ;;  %v4167_v12 = vsel %vm4166_vm4, %v4718_v18, %v4163_v13  ;;  %v4175_v1 = vmul.f32 %v4722_v33, %v4152_v52  ;;  %vm4180_vm6 = vweird.f32 %v4722_v33 }
 0x4fc   : > { %4725 = vrcp.f32 %v7710_v6  ;;  %v4172_v49 = vsel %vm4169_vm5, %v4171_v37, %v4167_v12  ;;  %vm4181_vm8 = vmor %vm4179_vm7, %vm4180_vm6  ;;  %v4200_v59 = vand.u32 2147483648, %v7710_v6  ;;  %v4198_v5 = vand.u32 2147483647, %v7710_v6 }
 0x4fd   : > { %4281 = vperm.xlu0 %4686, %v4172_v49   ;;  %v4176_v50 = vsub.f32 1.0, %v4175_v1  ;;  %vm4194_vm11 = vweird.f32 %v7710_v6  ;;  %v3849_v18 = vadd.f32 %v7706_v9, %v7704_v39  ;;  %v3989_v52 = vadd.f32 %v3988_v2, %v3917_v14  ;;  %v3994_v39 = vpop.f32.mrf.mxu3 }
 0x4fe   : > { %v4112_v7 = vpop.f32.mrf.mxu1  ;;  %v4201_v45 = vor.u32 1.1754944e-38, %v4200_v59  ;;  %vm4199_vm13 = vcmp.eq.f32.partialorder %v4198_v5, 8.507059e+37 }
 0x4ff   : > { %v4059_v0 = vpop.f32.mrf.mxu0  ;;  %v4113_v60 = vadd.f32 %v4112_v7, %v4056_v26  ;;  %v4177_v27 = vmul.f32 %v4722_v33, %v4176_v50  ;;  %v3922_v40 = vadd.f32 %v3921_v53, %v3849_v18 }
 0x500   : > { %v4060_v48 = vadd.f32 %v4059_v0, %v3983_v30 }
 0x501   : > { %v4724_v58 = vpop.eup %4723  ;;  %v4532_v38 = vmul.f32 -1.442695, %v4113_v60  ;;  %v4178_v63 = vadd.f32 %v4722_v33, %v4177_v27 }
 0x502   : > { %v4726_v54 = vpop.eup %4725  ;;  %v7715_v43 = vadd.f32 1.0, %v4724_v58 }
 0x503   : > { %4727 = vpow2.f32 %v4532_v38  ;;  %v4182_v55 = vsel %vm4181_vm8, %v4722_v33, %v4178_v63  ;;  %v4190_v34 = vmul.f32 %v4726_v54, %v7710_v6  ;;  %vm4195_vm10 = vweird.f32 %v4726_v54 }
 0x504   : > { %4729 = vrcp.f32 %v7715_v43  ;;  %v4187_v4 = vsel %vm4184_vm9, %v4186_v23, %v4182_v55  ;;  %vm4196_vm12 = vmor %vm4194_vm11, %vm4195_vm10  ;;  %v4215_v19 = vand.u32 2147483648, %v7715_v43  ;;  %v4213_v11 = vand.u32 2147483647, %v7715_v43 }
 0x505   : > { %4286 = vperm.xlu1 %4687, %v4187_v4   ;;  %v4191_v56 = vsub.f32 1.0, %v4190_v34  ;;  %vm4209_vm15 = vweird.f32 %v7715_v43  ;;  %v3995_v6 = vadd.f32 %v3994_v39, %v3922_v40  ;;  %v8230_v39 = vld [vmem:[#allocation83_spill] sm:$0xff] }
 0x506   : > { %v4116_v16 = vpop.f32.mrf.mxu1  ;;  %v4216_v37 = vor.u32 1.1754944e-38, %v4215_v19  ;;  %vm4214_vm2 = vcmp.eq.f32.partialorder %v4213_v11, 8.507059e+37  ;;  %v8231_v11 = vld [vmem:[#allocation75_spill] sm:$0xff] }
 0x507   : > { %v4117_v62 = vadd.f32 %v4116_v16, %v4060_v48  ;;  %v4192_v24 = vmul.f32 %v4726_v54, %v4191_v56  ;;  %v4063_v32 = vpop.f32.mrf.mxu0 }
 0x508   : > { %v4064_v8 = vadd.f32 %v4063_v32, %v3989_v52 }
 0x509   : > { %v4728_v17 = vpop.eup %4727  ;;  %v4533_v44 = vmul.f32 -1.442695, %v4117_v62  ;;  %v4193_v20 = vadd.f32 %v4726_v54, %v4192_v24 }
 0x50a   : > { %v4730_v61 = vpop.eup %4729  ;;  %v4155_v29 = vadd.f32 1.0, %v4728_v17 }
 0x50b   : > { %4731 = vpow2.f32 %v4533_v44  ;;  %v4197_v57 = vsel %vm4196_vm12, %v4726_v54, %v4193_v20  ;;  %v4205_v15 = vmul.f32 %v4730_v61, %v7715_v43  ;;  %vm4210_vm14 = vweird.f32 %v4730_v61 }
 0x50c   : > { %4733 = vrcp.f32 %v4155_v29  ;;  %v4202_v25 = vsel %vm4199_vm13, %v4201_v45, %v4197_v57  ;;  %vm4211_vm1 = vmor %vm4209_vm15, %vm4210_vm14  ;;  %v4230_v31 = vand.u32 2147483648, %v4155_v29  ;;  %v4228_v0 = vand.u32 2147483647, %v4155_v29 }
 0x50d   : > { %4291 = vperm.xlu2 %4688, %v4202_v25   ;;  %v4206_v41 = vsub.f32 1.0, %v4205_v15  ;;  %vm4224_vm3 = vweird.f32 %v4155_v29 }
 0x50e   : > { %v4120_v47 = vpop.f32.mrf.mxu1  ;;  %v4231_v46 = vor.u32 1.1754944e-38, %v4230_v31  ;;  %vm4229_vm5 = vcmp.eq.f32.partialorder %v4228_v0, 8.507059e+37  ;;  %v8238_v0 = vld [vmem:[#allocation77_spill] sm:$0xff] }
 0x50f   : > { %v4121_v9 = vadd.f32 %v4120_v47, %v4064_v8  ;;  %v4207_v42 = vmul.f32 %v4730_v61, %v4206_v41  ;;  %v4067_v10 = vpop.f32.mrf.mxu0  ;;  %v8229_v47 = vld [vmem:[#allocation82_spill] sm:$0xff] }
 0x510   : > { %v4068_v49 = vadd.f32 %v4067_v10, %v3995_v6  ;;  %v8233_v6 = vld [vmem:[#allocation79_spill] sm:$0xff] }
 0x511   : > { %v4732_v28 = vpop.eup %4731  ;;  %v4534_v21 = vmul.f32 -1.442695, %v4121_v9  ;;  %v4208_v13 = vadd.f32 %v4730_v61, %v4207_v42 }
 0x512   : > { %v4734_v33 = vpop.eup %4733  ;;  %v4156_v35 = vadd.f32 1.0, %v4732_v28 }
 0x513   : > { %4735 = vpow2.f32 %v4534_v21  ;;  %v4212_v51 = vsel %vm4211_vm1, %v4730_v61, %v4208_v13  ;;  %v4220_v12 = vmul.f32 %v4734_v33, %v4155_v29  ;;  %vm4225_vm0 = vweird.f32 %v4734_v33  ;;  %v8232_v21 = vld [vmem:[#allocation87_spill] sm:$0xff] }
 0x514   : > { %4737 = vrcp.f32 %v4156_v35  ;;  %v4217_v1 = vsel %vm4214_vm2, %v4216_v37, %v4212_v51  ;;  %vm4226_vm4 = vmor %vm4224_vm3, %vm4225_vm0  ;;  %v4245_v30 = vand.u32 2147483648, %v4156_v35  ;;  %v4243_v55 = vand.u32 2147483647, %v4156_v35  ;;  %v8234_v37 = vld [vmem:[#allocation81_spill] sm:$0xff] }
 0x515   : > { %4296 = vperm.xlu1 %4687, %v4217_v1   ;;  %v4221_v26 = vsub.f32 1.0, %v4220_v12  ;;  %vm4239_vm7 = vweird.f32 %v4156_v35  ;;  %v8235_v12 = vld [vmem:[#allocation80_spill] sm:$0xff] }
 0x516   : > { %v4124_v50 = vpop.f32.mrf.mxu1  ;;  %v4246_v56 = vor.u32 1.1754944e-38, %v4245_v30  ;;  %vm4244_vm9 = vcmp.eq.f32.partialorder %v4243_v55, 8.507059e+37 }
 0x517   : > { %v4125_v7 = vadd.f32 %v4124_v50, %v4068_v49  ;;  %v4222_v3 = vmul.f32 %v4734_v33, %v4221_v26  ;;  %v8236_v49 = vld [vmem:[#allocation84_spill] sm:$0xff] }
 0x519   : > { %v4736_v60 = vpop.eup %4735  ;;  %v4535_v27 = vmul.f32 -1.442695, %v4125_v7  ;;  %v4223_v36 = vadd.f32 %v4734_v33, %v4222_v3  ;;  %v8237_v7 = vld [vmem:[#allocation73_spill] sm:$0xff] }
 0x51a   : > { %v4738_v58 = vpop.eup %4737  ;;  %v4157_v38 = vadd.f32 1.0, %v4736_v60 }
 0x51b   : > { %4739 = vpow2.f32 %v4535_v27  ;;  %v4227_v63 = vsel %vm4226_vm4, %v4734_v33, %v4223_v36  ;;  %v4235_v54 = vmul.f32 %v4738_v58, %v4156_v35  ;;  %vm4240_vm6 = vweird.f32 %v4738_v58  ;;  %v8239_v27 = vld [vmem:[#allocation85_spill] sm:$0xff] }
 0x51c   : > { %4741 = vrcp.f32 %v4157_v38  ;;  %v4232_v22 = vsel %vm4229_vm5, %v4231_v46, %v4227_v63  ;;  %vm4241_vm8 = vmor %vm4239_vm7, %vm4240_vm6  ;;  %v4260_v24 = vand.u32 2147483648, %v4157_v38  ;;  %v4258_v32 = vand.u32 2147483647, %v4157_v38  ;;  %v8241_v63 = vld [vmem:[#allocation74_spill] sm:$0xff] }
 0x51d   : > { %4301 = vperm.xlu2 %4688, %v4232_v22   ;;  %v4236_v43 = vsub.f32 1.0, %v4235_v54  ;;  %vm4254_vm11 = vweird.f32 %v4157_v38  ;;  %v8242_v22 = vld [vmem:[#allocation78_spill] sm:$0xff] }
 0x51e   : > { %v4261_v20 = vor.u32 1.1754944e-38, %v4260_v24  ;;  %vm4259_vm13 = vcmp.eq.f32.partialorder %v4258_v32, 8.507059e+37 }
 0x51f   : > { %v4237_v23 = vmul.f32 %v4738_v58, %v4236_v43 }
 0x521   : > { %v4740_v34 = vpop.eup %4739  ;;  %v4238_v4 = vadd.f32 %v4738_v58, %v4237_v23  ;;  %v8243_v23 = vld [vmem:[#allocation72_spill] sm:$0xff] }
 0x522   : > { %v4742_v48 = vpop.eup %4741  ;;  %v4158_v2 = vadd.f32 1.0, %v4740_v34  ;;  %v8244_v34 = vld [vmem:[#allocation76_spill] sm:$0xff] }
 0x523   : > { %v4242_v14 = vsel %vm4241_vm8, %v4738_v58, %v4238_v4  ;;  %v4250_v16 = vmul.f32 %v4742_v48, %v4157_v38  ;;  %vm4255_vm10 = vweird.f32 %v4742_v48  ;;  %v8240_v58 = vld [vmem:[#allocation86_spill] sm:$0xff] }
 0x524   : > { %4743 = vrcp.f32 %v4158_v2  ;;  %v4247_v59 = vsel %vm4244_vm9, %v4246_v56, %v4242_v14  ;;  %vm4256_vm12 = vmor %vm4254_vm11, %vm4255_vm10  ;;  %v4275_v45 = vand.u32 2147483648, %v4158_v2  ;;  %v4273_v57 = vand.u32 2147483647, %v4158_v2 }
 0x525   : > { %4306 = vperm.xlu1 %4687, %v4247_v59   ;;  %v4251_v62 = vsub.f32 1.0, %v4250_v16  ;;  %vm4269_vm15 = vweird.f32 %v4158_v2 }
 0x526   : > { %v4276_v25 = vor.u32 1.1754944e-38, %v4275_v45  ;;  %vm4274_vm2 = vcmp.eq.f32.partialorder %v4273_v57, 8.507059e+37 }
 0x527   : > { %v4252_v5 = vmul.f32 %v4742_v48, %v4251_v62 }
 0x529   : > { %v4253_v17 = vadd.f32 %v4742_v48, %v4252_v5 }
 0x52a   : > { %v4744_v44 = vpop.eup %4743 }
 0x52b   : > { %v4257_v61 = vsel %vm4256_vm12, %v4742_v48, %v4253_v17  ;;  %v4265_v18 = vmul.f32 %v4744_v44, %v4158_v2  ;;  %vm4270_vm14 = vweird.f32 %v4744_v44 }
 0x52c   : > { %v4262_v29 = vsel %vm4259_vm13, %v4261_v20, %v4257_v61  ;;  %vm4271_vm1 = vmor %vm4269_vm15, %vm4270_vm14 }
 0x52d   : > { %4311 = vperm.xlu2 %4688, %v4262_v29   ;;  %v4266_v52 = vsub.f32 1.0, %v4265_v18 }
 0x52f   : > { %v4267_v53 = vmul.f32 %v4744_v44, %v4266_v52 }
 0x531   : > { %v4268_v15 = vadd.f32 %v4744_v44, %v4267_v53 }
 0x533   : > { %v4272_v8 = vsel %vm4271_vm1, %v4744_v44, %v4268_v15 }
 0x534   : > { %v4277_v41 = vsel %vm4274_vm2, %v4276_v25, %v4272_v8 }
 0x535   : > { %4316 = vperm.xlu0 %4686, %v4277_v41  }
 0x567   : > { %v4292_v40 = vpop.permute.xlu2 %4291 }
 0x568   : > { %v4323_v19 = vmul.f32 %v4292_v40, %v8229_v47  ;;  %v4324_v9 = vmul.f32 %v4292_v40, %v8230_v39 }
 0x56a   : > { %4339 = vst [vmem:[%s7731_s11 + $0x20] sm:$0xff] %v4323_v19 }
 0x56b   : > { %4340 = vst [vmem:[%s7731_s11 + $0x28] sm:$0xff] %v4324_v9 }
 0x56f   : > { %v4282_v42 = vpop.permute.xlu0 %4281 }
 0x570   : > { %v4319_v28 = vmul.f32 %v4282_v42, %v8231_v11  ;;  %v4320_v13 = vmul.f32 %v4282_v42, %v8232_v21 }
 0x572   : > { %4335 = vst [vmem:[%s7731_s11] sm:$0xff] %v4319_v28 }
 0x573   : > { %4336 = vst [vmem:[%s7731_s11 + $0x8] sm:$0xff] %v4320_v13 }
 0x577   : > { %v4302_v33 = vpop.permute.xlu2 %4301  ;;  %v4287_v35 = vpop.permute.xlu1 %4286 }
 0x578   : > { %v4327_v10 = vmul.f32 %v4302_v33, %v8233_v6  ;;  %v4328_v51 = vmul.f32 %v4302_v33, %v8234_v37  ;;  %v4321_v1 = vmul.f32 %v4287_v35, %v8235_v12  ;;  %v4322_v26 = vmul.f32 %v4287_v35, %v8236_v49 }
 0x57a   : > { %4343 = vst [vmem:[%s7731_s11 + $0x40] sm:$0xff] %v4327_v10 }
 0x57b   : > { %4344 = vst [vmem:[%s7731_s11 + $0x48] sm:$0xff] %v4328_v51 }
 0x57c   : > { %4337 = vst [vmem:[%s7731_s11 + $0x10] sm:$0xff] %v4321_v1 }
 0x57d   : > { %4338 = vst [vmem:[%s7731_s11 + $0x18] sm:$0xff] %v4322_v26 }
 0x587   : > { %v4312_v50 = vpop.permute.xlu2 %4311  ;;  %v4297_v31 = vpop.permute.xlu1 %4296 }
 0x588   : > { %v4331_v3 = vmul.f32 %v4312_v50, %v8237_v7  ;;  %v4332_v60 = vmul.f32 %v4312_v50, %v8238_v0  ;;  %v4325_v36 = vmul.f32 %v4297_v31, %v8239_v27  ;;  %v4326_v38 = vmul.f32 %v4297_v31, %v8240_v58 }
 0x58a   : > { %4347 = vst [vmem:[%s7731_s11 + $0x60] sm:$0xff] %v4331_v3 }
 0x58b   : > { %4348 = vst [vmem:[%s7731_s11 + $0x68] sm:$0xff] %v4332_v60 }
 0x58c   : > { %4341 = vst [vmem:[%s7731_s11 + $0x30] sm:$0xff] %v4325_v36 }
 0x58d   : > { %4342 = vst [vmem:[%s7731_s11 + $0x38] sm:$0xff] %v4326_v38 }
 0x597   : > { %v4307_v46 = vpop.permute.xlu1 %4306 }
 0x598   : > { %v4329_v54 = vmul.f32 %v4307_v46, %v8241_v63  ;;  %v4330_v43 = vmul.f32 %v4307_v46, %v8242_v22 }
 0x59a   : > { %4345 = vst [vmem:[%s7731_s11 + $0x50] sm:$0xff] %v4329_v54 }
 0x59b   : > { %4346 = vst [vmem:[%s7731_s11 + $0x58] sm:$0xff] %v4330_v43 }
 0x5a7   : > { %v4317_v30 = vpop.permute.xlu0 %4316 }
 0x5a8   : > { %v4333_v55 = vmul.f32 %v4317_v30, %v8243_v23  ;;  %v4334_v4 = vmul.f32 %v4317_v30, %v8244_v34 }
 0x5aa   : > { %4349 = vst [vmem:[%s7731_s11 + $0x70] sm:$0xff] %v4333_v55 }
 0x5ab   : > { %4350 = vst [vmem:[%s7731_s11 + $0x78] sm:$0xff] %v4334_v4 }
 0x5ac   : > { %4953 = shalt.err (!%p4950_p10)
}
 0x5ad   : > { %s5028_s20 = smov 256  }
 0x5ae   : > { %4597 = dma.vmem_to_hbm [thread:$0]  (%p5168_p7), %s4365_s16, 2048, %s4367_s25, %s4352_s13, %s5028_s20, %s5028_s20, %s5020_s17  }
 0x5af PF: > { %s4381_s11 = sand.u32 1, %s4996_s26   ;;  %p8245_p12 = scmp.ge.s32.totalorder %s5008_s29, 2 }
 0x5b0   : > { %s4382_s22 = scalar_lea.sflag [#allocation5], %s4381_s11 }
 0x5b1   : > { %p4620_p13 = pnand %p8245_p12, %p5107_p6 }
 0x5b3   : > { %p4621_p0 = pneg %p4620_p13 }
 0x5b5   : > { %4991 = dma.done.wait (%p4621_p0), %s4382_s22, 2048  }
 0x5b6   : > { %4993 = vsyncadd (%p4621_p0), %s4382_s22, 4294965248  ;;  %p22_p3 = scmp.ge.s32.totalorder %s5154_s10, 4   ;;  %s8246_s26 = smov %s5000_s27 }
 0x5b7   : > { %s8247_s27 = smov %s5004_s28  ;;  %s8248_s28 = smov %s5164_s14 }
 0x5b8   : > { %s8249_s29 = smov %s5154_s10  ;;  %24 = sbr.rel (!%p22_p3) target bundleno = 9 (0x9), region = 113 }
 0x5bd   :  { %4388 = vsyncpa [#allocation4], 1 }
 0x5be   :  { %4390 = vsyncpa [#allocation4 + $0x1], 1 }
 0x5bf   :  { %4391 = vsyncpa [#allocation9], 1 }
 0x5c0   :  { %4392 = vsyncpa [#allocation12], 1 }
 0x5c1   :  { %4393 = vsyncpa [#allocation5], 1 }
 0x5c2   :  { %4395 = vsyncpa [#allocation5 + $0x1], 1 }
 0x5c3   :  { %4396 = vsyncpa [#allocation6], 1 }
 0x5c4   :  { %4398 = vsyncpa [#allocation6 + $0x1], 1 }

</bundles_post_ra>
